<compile_context>
chip_gen: v7x
topology: tpu7x:2x2x1
jax: 0.10.0
libtpu: 0.0.40
codegen_flags: <defaults>
</compile_context>

<pallas_src>
import jax
import jax.numpy as jnp
import numpy as np
from jax import lax
from jax.experimental import pallas as pl
from jax.experimental.pallas import tpu as pltpu


# --------------------- static (numpy) interpolation matrix --------------------

def _bilinear_1d(size_in, size_out):
    """1-D bilinear interpolation matrix (size_out, size_in), align_corners=True."""
    if size_out == 1:
        src = np.zeros((1,), np.float64)
    else:
        src = np.arange(size_out, dtype=np.float64) * ((size_in - 1) / (size_out - 1))
    i0 = np.clip(np.floor(src).astype(np.int64), 0, size_in - 1)
    i1 = np.clip(i0 + 1, 0, size_in - 1)
    frac = src - i0
    u = np.zeros((size_out, size_in), np.float64)
    rows = np.arange(size_out)
    u[rows, i0] += 1.0 - frac
    u[rows, i1] += frac
    return u


def _upsample_pad_matrix(H1, W1, H, W, pad_t, pad_l):
    """(H1*W1, (H+2)*(W+2)) matrix folding: bilinear x2 upsample
    (align_corners=True) + F.pad placement + the 1-pixel conv halo."""
    Hp, Wp = H + 2, W + 2
    uh = _bilinear_1d(H1, 2 * H1)                       # (Hup, H1)
    uw = _bilinear_1d(W1, 2 * W1)                       # (Wup, W1)
    u = np.zeros((H1 * W1, Hp * Wp), np.float64)
    for oy in range(2 * H1):
        for ox in range(2 * W1):
            col = (1 + pad_t + oy) * Wp + (1 + pad_l + ox)
            u[:, col] = np.outer(uh[oy], uw[ox]).reshape(-1)
    return jnp.asarray(u, jnp.float32)


# ------------------------------- fused kernel ---------------------------------

def _make_up_kernel(N, H, W, C1, C2, Cmid, Cout):
    Hp, Wp = H + 2, W + 2
    Mimg = Hp * Wp                      # per-image padded-flat length
    M = N * Mimg
    MARG = Wp + 1                       # widest tap shift (+/- (Wp+1))
    Ccat = C1 + C2
    inv_cnt = 1.0 / (N * H * W)         # BatchNorm batch-stat divisor
    f32 = jnp.float32
    hi = lax.Precision.HIGHEST
    eps = 1e-5

    def conv3x3_bn_relu(xwide_ref, w_ref, g, be, mask):
        """3x3 conv as 9 shifted-slice MXU matmuls accumulated into an f32
        value, then batch-stat BatchNorm + ReLU, all in the transposed
        lane-dense (Cout, N*Hp*Wp) layout.  Garbage at padded-border output
        positions is excluded from the stats via `mask`."""
        acc = None
        for ky in range(3):
            for kx in range(3):
                s = (ky - 1) * Wp + (kx - 1)
                rhs = xwide_ref[:, MARG + s:MARG + s + M]          # (Cin, M)
                t = jnp.dot(w_ref[ky * 3 + kx], rhs, precision=hi,
                            preferred_element_type=f32)            # (Cout, M)
                acc = t if acc is None else acc + t
        # Conv bias omitted: cancelled exactly by the mean subtraction below.
        m = jnp.sum(acc * mask, axis=1, keepdims=True) * inv_cnt    # (Cout, 1)
        d = (acc - m) * mask
        v = jnp.sum(d * d, axis=1, keepdims=True) * inv_cnt         # biased var
        scale = g * lax.rsqrt(v + eps)
        return jnp.maximum((acc - m) * scale + be, 0.0)             # (Cout, M)

    def kernel(x1_ref, upadT_ref, x2pad_ref, mask_ref,
               w1_ref, g1_ref, be1_ref, w2_ref, g2_ref, be2_ref,
               o_ref, xwide_ref, hwide_ref):
        mask = mask_ref[...]                                         # (1, M)

        # ---- bilinear x2 upsample + F.pad: ONE MXU matmul -------------------
        up = jnp.dot(x1_ref[...], upadT_ref[...], precision=hi,
                     preferred_element_type=f32)                     # (N*C1, Mimg)

        # ---- "concat": x2 (pre-padded) and upsampled x1 go into disjoint
        #      channel rows of the widened conv-1 input; only the tiny margin
        #      strips are zero-filled (interior is written exactly once). -----
        xwide_ref[:, 0:MARG] = jnp.zeros((Ccat, MARG), f32)
        xwide_ref[:, MARG + M:MARG + M + MARG] = jnp.zeros((Ccat, MARG), f32)
        xwide_ref[0:C2, MARG:MARG + M] = x2pad_ref[...]
        for n in range(N):                                           # N tiny & static
            base = MARG + n * Mimg
            for c in range(C1):
                xwide_ref[C2 + c:C2 + c + 1, base:base + Mimg] = (
                    up[n * C1 + c:n * C1 + c + 1, :])

        # ---- conv1 -> BN -> ReLU (transposed, lane-dense) -------------------
        h1 = conv3x3_bn_relu(xwide_ref, w1_ref, g1_ref[...], be1_ref[...],
                             mask)                                   # (Cmid, M)

        # conv2 input: mask re-zeroes the 1-pixel padding ring of each image.
        hwide_ref[:, 0:MARG] = jnp.zeros((Cmid, MARG), f32)
        hwide_ref[:, MARG + M:MARG + M + MARG] = jnp.zeros((Cmid, MARG), f32)
        hwide_ref[:, MARG:MARG + M] = h1 * mask

        # ---- conv2 -> BN -> ReLU --------------------------------------------
        h2 = conv3x3_bn_relu(hwide_ref, w2_ref, g2_ref[...], be2_ref[...],
                             mask)                                   # (Cout, M)

        # Lane-dense output store; wrapper slices the interior and transposes.
        o_ref[...] = h2

    return kernel


# --------------------------------- wrapper ------------------------------------

@jax.jit
def up_forward(x1_nchw, x2_nchw, params):
    """Forward pass of `Up` (bilinear=True). Inputs NCHW, output NCHW."""
    N, C1, H1, W1 = x1_nchw.shape
    _, C2, H, W = x2_nchw.shape
    Ccat = C1 + C2
    Cmid = params["w1"].shape[-1]
    Cout = params["w2"].shape[-1]
    Hp, Wp = H + 2, W + 2
    Mimg = Hp * Wp
    M = N * Mimg
    MARG = Wp + 1
    f32 = jnp.float32

    diffY, diffX = H - 2 * H1, W - 2 * W1            # F.pad amounts (>= 0)
    pad_t, pad_l = diffY // 2, diffX // 2

    # Layout plumbing on tiny arrays (wrapper-side XLA, not compute hoisting):
    x1_flat = x1_nchw.astype(f32).reshape(N * C1, H1 * W1)          # free reshape
    x2pad = jnp.pad(x2_nchw.astype(f32), ((0, 0), (0, 0), (1, 1), (1, 1)))
    x2pad = jnp.transpose(x2pad, (1, 0, 2, 3)).reshape(C2, M)       # channel-major

    upadT = _upsample_pad_matrix(H1, W1, H, W, pad_t, pad_l)        # (H1*W1, Mimg)

    interior = np.zeros((N, Hp, Wp), np.float32)
    interior[:, 1:H + 1, 1:W + 1] = 1.0
    mask = jnp.asarray(interior.reshape(1, M))

    # 3x3 weights as 9 transposed taps (cout, cin).  Conv biases b1/b2 are NOT
    # passed: a per-channel bias is exactly cancelled by the batch-stat BN.
    w1_t = jnp.transpose(params["w1"].astype(f32), (0, 1, 3, 2)).reshape(9, Cmid, Ccat)
    w2_t = jnp.transpose(params["w2"].astype(f32), (0, 1, 3, 2)).reshape(9, Cout, Cmid)

    vmem = pl.BlockSpec(memory_space=pltpu.MemorySpace.VMEM)
    kernel = _make_up_kernel(N, H, W, C1, C2, Cmid, Cout)
    out_flat = pl.pallas_call(
        kernel,
        out_shape=jax.ShapeDtypeStruct((Cout, M), f32),
        in_specs=[vmem] * 10,
        out_specs=vmem,
        scratch_shapes=[
            pltpu.VMEM((Ccat, MARG + M + MARG), f32),   # widened conv-1 input
            pltpu.VMEM((Cmid, MARG + M + MARG), f32),   # widened conv-2 input
        ],
    )(x1_flat, upadT, x2pad, mask,
      w1_t,
      params["g1"].astype(f32).reshape(Cmid, 1),
      params["be1"].astype(f32).reshape(Cmid, 1),
      w2_t,
      params["g2"].astype(f32).reshape(Cout, 1),
      params["be2"].astype(f32).reshape(Cout, 1))

    # (Cout, N*Hp*Wp) lane-dense slab -> NCHW (tiny XLA rearrange, ~10 KB).
    out = out_flat.reshape(Cout, N, Hp, Wp)[:, :, 1:H + 1, 1:W + 1]
    return jnp.transpose(out, (1, 0, 2, 3))


# ------------------------------- reference ------------------------------------

def upsample_bilinear2x_align_corners(x):
    """Bilinear x2 upsample (align_corners=True), NHWC, gather-based reference."""
    N, H, W, C = x.shape
    Ho, Wo = 2 * H, 2 * W

    def coords(size_in, size_out):
        if size_out == 1:
            src = jnp.zeros((1,), jnp.float32)
        else:
            src = jnp.arange(size_out, dtype=jnp.float32) * (
                (size_in - 1) / (size_out - 1))
        i0 = jnp.clip(jnp.floor(src).astype(jnp.int32), 0, size_in - 1)
        i1 = jnp.clip(i0 + 1, 0, size_in - 1)
        frac = src - i0.astype(jnp.float32)
        return i0, i1, frac

    y0, y1, wy = coords(H, Ho)
    x0, x1i, wx = coords(W, Wo)

    rows0 = x[:, y0]
    rows1 = x[:, y1]

    def interp_w(rows):
        a = rows[:, :, x0]
        b = rows[:, :, x1i]
        return a * (1.0 - wx)[None, None, :, None] + b * wx[None, None, :, None]

    r0 = interp_w(rows0)
    r1 = interp_w(rows1)
    return r0 * (1.0 - wy)[None, :, None, None] + r1 * wy[None, :, None, None]


def ref_conv3x3(x, w, b):
    return lax.conv_general_dilated(
        x, w, (1, 1), 'SAME',
        dimension_numbers=('NHWC', 'HWIO', 'NHWC'),
        precision=lax.Precision.HIGHEST) + b


def ref_bn_relu(x, gamma, beta, eps=1e-5):
    mean = jnp.mean(x, axis=(0, 1, 2))
    var = jnp.var(x, axis=(0, 1, 2))
    return jnp.maximum((x - mean) * gamma / jnp.sqrt(var + eps) + beta, 0.0)


def ref_up_forward(x1_nchw, x2_nchw, params):
    x1 = jnp.transpose(x1_nchw, (0, 2, 3, 1)).astype(jnp.float32)
    x2 = jnp.transpose(x2_nchw, (0, 2, 3, 1)).astype(jnp.float32)
    x1 = upsample_bilinear2x_align_corners(x1)
    x = jnp.concatenate([x2, x1], axis=-1)
    h = ref_bn_relu(ref_conv3x3(x, params["w1"], params["b1"]),
                    params["g1"], params["be1"])
    h = ref_bn_relu(ref_conv3x3(h, params["w2"], params["b2"]),
                    params["g2"], params["be2"])
    return jnp.transpose(h, (0, 3, 1, 2))


# ---------------------------------- main --------------------------------------

if __name__ == "__main__":
    # Up(in_channels=4, out_channels=4, bilinear=True)
    in_channels, out_channels = 4, 4
    c_cat = in_channels + in_channels // 2       # 6 (conv1 input channels)

    key = jax.random.PRNGKey(0)
    ks = jax.random.split(key, 10)

    # x1: features to upsample (in_channels), x2: skip connection (in_channels // 2)
    x1 = jax.random.normal(ks[0], (2, in_channels, 8, 8), jnp.float32)
    x2 = jax.random.normal(ks[1], (2, in_channels // 2, 16, 16), jnp.float32)

    params = {
        "w1": 0.1 * jax.random.normal(ks[2], (3, 3, c_cat, out_channels), jnp.float32),
        "b1": 0.1 * jax.random.normal(ks[3], (out_channels,), jnp.float32),
        "g1": 1.0 + 0.1 * jax.random.normal(ks[4], (out_channels,), jnp.float32),
        "be1": 0.1 * jax.random.normal(ks[5], (out_channels,), jnp.float32),
        "w2": 0.1 * jax.random.normal(ks[6], (3, 3, out_channels, out_channels), jnp.float32),
        "b2": 0.1 * jax.random.normal(ks[7], (out_channels,), jnp.float32),
        "g2": 1.0 + 0.1 * jax.random.normal(ks[8], (out_channels,), jnp.float32),
        "be2": 0.1 * jax.random.normal(ks[9], (out_channels,), jnp.float32),
    }

    out = up_forward(x1, x2, params)
    out = jax.block_until_ready(out)

    ref = jax.block_until_ready(ref_up_forward(x1, x2, params))
    np.testing.assert_allclose(np.asarray(out), np.asarray(ref),
                               rtol=1e-4, atol=1e-4)
    assert out.shape == (2, out_channels, 16, 16)

    print("KERNEL_OK")
</pallas_src>

<mosaic_0001>
module attributes {stable_mosaic.version = 11 : i64} {
  func.func @kernel(%arg0: memref<8x64xf32, #tpu.memory_space<vmem>>, %arg1: memref<64x324xf32, #tpu.memory_space<vmem>>, %arg2: memref<2x648xf32, #tpu.memory_space<vmem>>, %arg3: memref<1x648xf32, #tpu.memory_space<vmem>>, %arg4: memref<9x4x6xf32, #tpu.memory_space<vmem>>, %arg5: memref<4x1xf32, #tpu.memory_space<vmem>>, %arg6: memref<4x1xf32, #tpu.memory_space<vmem>>, %arg7: memref<9x4x4xf32, #tpu.memory_space<vmem>>, %arg8: memref<4x1xf32, #tpu.memory_space<vmem>>, %arg9: memref<4x1xf32, #tpu.memory_space<vmem>>, %arg10: memref<4x648xf32, #tpu.memory_space<vmem>>, %arg11: memref<6x686xf32, #tpu.memory_space<vmem>>, %arg12: memref<4x686xf32, #tpu.memory_space<vmem>>) attributes {dimension_semantics = [], scalar_prefetch = 0 : i64, scratch_operands = 2 : i64, tpu.core_type = #tpu.core_type<tc>} {
    %c0 = arith.constant 0 : index
    %c0_0 = arith.constant 0 : index
    %0 = vector.load %arg3[%c0, %c0_0] : memref<1x648xf32, #tpu.memory_space<vmem>>, vector<1x648xf32>
    %c0_1 = arith.constant 0 : index
    %c0_2 = arith.constant 0 : index
    %1 = vector.load %arg0[%c0_1, %c0_2] : memref<8x64xf32, #tpu.memory_space<vmem>>, vector<8x64xf32>
    %c0_3 = arith.constant 0 : index
    %c0_4 = arith.constant 0 : index
    %2 = vector.load %arg1[%c0_3, %c0_4] : memref<64x324xf32, #tpu.memory_space<vmem>>, vector<64x324xf32>
    %cst = arith.constant dense<0.000000e+00> : vector<8x324xf32>
    %3 = tpu.matmul %1, %2, %cst {dimension_numbers = #tpu.dot_dimension_numbers<[1], [0], [0], [1], [0, 0, 1, 1], [], []>, precision = #tpu.contract_precision<fp32>} : vector<8x64xf32>, vector<64x324xf32>, vector<8x324xf32> -> vector<8x324xf32>
    %cst_5 = arith.constant 0.000000e+00 : f32
    %4 = vector.broadcast %cst_5 : f32 to vector<6x19xf32>
    %c0_6 = arith.constant 0 : index
    %c0_7 = arith.constant 0 : index
    %5 = vector.load %arg11[%c0_6, %c0_7] : memref<6x686xf32, #tpu.memory_space<vmem>>, vector<6x19xf32>
    tpu.vector_store %arg11[%c0_6, %c0_7], %4 {strides = array<i32>} : memref<6x686xf32, #tpu.memory_space<vmem>>, vector<6x19xf32>,
    %cst_8 = arith.constant 0.000000e+00 : f32
    %6 = vector.broadcast %cst_8 : f32 to vector<6x19xf32>
    %c0_9 = arith.constant 0 : index
    %c667 = arith.constant 667 : index
    %7 = vector.load %arg11[%c0_9, %c667] : memref<6x686xf32, #tpu.memory_space<vmem>>, vector<6x19xf32>
    tpu.vector_store %arg11[%c0_9, %c667], %6 {strides = array<i32>} : memref<6x686xf32, #tpu.memory_space<vmem>>, vector<6x19xf32>,
    %c0_10 = arith.constant 0 : index
    %c0_11 = arith.constant 0 : index
    %8 = vector.load %arg2[%c0_10, %c0_11] : memref<2x648xf32, #tpu.memory_space<vmem>>, vector<2x648xf32>
    %c0_12 = arith.constant 0 : index
    %c19 = arith.constant 19 : index
    %9 = vector.load %arg11[%c0_12, %c19] : memref<6x686xf32, #tpu.memory_space<vmem>>, vector<2x648xf32>
    tpu.vector_store %arg11[%c0_12, %c19], %8 {strides = array<i32>} : memref<6x686xf32, #tpu.memory_space<vmem>>, vector<2x648xf32>,
    %10 = vector.extract_strided_slice %3 {offsets = [0, 0], sizes = [1, 324], strides = [1, 1]} : vector<8x324xf32> to vector<1x324xf32>
    %c2 = arith.constant 2 : index
    %c19_13 = arith.constant 19 : index
    %11 = vector.load %arg11[%c2, %c19_13] : memref<6x686xf32, #tpu.memory_space<vmem>>, vector<1x324xf32>
    tpu.vector_store %arg11[%c2, %c19_13], %10 {strides = array<i32>} : memref<6x686xf32, #tpu.memory_space<vmem>>, vector<1x324xf32>,
    %12 = vector.extract_strided_slice %3 {offsets = [1, 0], sizes = [1, 324], strides = [1, 1]} : vector<8x324xf32> to vector<1x324xf32>
    %c3 = arith.constant 3 : index
    %c19_14 = arith.constant 19 : index
    %13 = vector.load %arg11[%c3, %c19_14] : memref<6x686xf32, #tpu.memory_space<vmem>>, vector<1x324xf32>
    tpu.vector_store %arg11[%c3, %c19_14], %12 {strides = array<i32>} : memref<6x686xf32, #tpu.memory_space<vmem>>, vector<1x324xf32>,
    %14 = vector.extract_strided_slice %3 {offsets = [2, 0], sizes = [1, 324], strides = [1, 1]} : vector<8x324xf32> to vector<1x324xf32>
    %c4 = arith.constant 4 : index
    %c19_15 = arith.constant 19 : index
    %15 = vector.load %arg11[%c4, %c19_15] : memref<6x686xf32, #tpu.memory_space<vmem>>, vector<1x324xf32>
    tpu.vector_store %arg11[%c4, %c19_15], %14 {strides = array<i32>} : memref<6x686xf32, #tpu.memory_space<vmem>>, vector<1x324xf32>,
    %16 = vector.extract_strided_slice %3 {offsets = [3, 0], sizes = [1, 324], strides = [1, 1]} : vector<8x324xf32> to vector<1x324xf32>
    %c5 = arith.constant 5 : index
    %c19_16 = arith.constant 19 : index
    %17 = vector.load %arg11[%c5, %c19_16] : memref<6x686xf32, #tpu.memory_space<vmem>>, vector<1x324xf32>
    tpu.vector_store %arg11[%c5, %c19_16], %16 {strides = array<i32>} : memref<6x686xf32, #tpu.memory_space<vmem>>, vector<1x324xf32>,
    %18 = vector.extract_strided_slice %3 {offsets = [4, 0], sizes = [1, 324], strides = [1, 1]} : vector<8x324xf32> to vector<1x324xf32>
    %c2_17 = arith.constant 2 : index
    %c343 = arith.constant 343 : index
    %19 = vector.load %arg11[%c2_17, %c343] : memref<6x686xf32, #tpu.memory_space<vmem>>, vector<1x324xf32>
    tpu.vector_store %arg11[%c2_17, %c343], %18 {strides = array<i32>} : memref<6x686xf32, #tpu.memory_space<vmem>>, vector<1x324xf32>,
    %20 = vector.extract_strided_slice %3 {offsets = [5, 0], sizes = [1, 324], strides = [1, 1]} : vector<8x324xf32> to vector<1x324xf32>
    %c3_18 = arith.constant 3 : index
    %c343_19 = arith.constant 343 : index
    %21 = vector.load %arg11[%c3_18, %c343_19] : memref<6x686xf32, #tpu.memory_space<vmem>>, vector<1x324xf32>
    tpu.vector_store %arg11[%c3_18, %c343_19], %20 {strides = array<i32>} : memref<6x686xf32, #tpu.memory_space<vmem>>, vector<1x324xf32>,
    %22 = vector.extract_strided_slice %3 {offsets = [6, 0], sizes = [1, 324], strides = [1, 1]} : vector<8x324xf32> to vector<1x324xf32>
    %c4_20 = arith.constant 4 : index
    %c343_21 = arith.constant 343 : index
    %23 = vector.load %arg11[%c4_20, %c343_21] : memref<6x686xf32, #tpu.memory_space<vmem>>, vector<1x324xf32>
    tpu.vector_store %arg11[%c4_20, %c343_21], %22 {strides = array<i32>} : memref<6x686xf32, #tpu.memory_space<vmem>>, vector<1x324xf32>,
    %24 = vector.extract_strided_slice %3 {offsets = [7, 0], sizes = [1, 324], strides = [1, 1]} : vector<8x324xf32> to vector<1x324xf32>
    %c5_22 = arith.constant 5 : index
    %c343_23 = arith.constant 343 : index
    %25 = vector.load %arg11[%c5_22, %c343_23] : memref<6x686xf32, #tpu.memory_space<vmem>>, vector<1x324xf32>
    tpu.vector_store %arg11[%c5_22, %c343_23], %24 {strides = array<i32>} : memref<6x686xf32, #tpu.memory_space<vmem>>, vector<1x324xf32>,
    %c0_24 = arith.constant 0 : index
    %c0_25 = arith.constant 0 : index
    %26 = vector.load %arg5[%c0_24, %c0_25] : memref<4x1xf32, #tpu.memory_space<vmem>>, vector<4x1xf32>
    %c0_26 = arith.constant 0 : index
    %c0_27 = arith.constant 0 : index
    %27 = vector.load %arg6[%c0_26, %c0_27] : memref<4x1xf32, #tpu.memory_space<vmem>>, vector<4x1xf32>
    %c0_28 = arith.constant 0 : index
    %c0_29 = arith.constant 0 : index
    %28 = vector.load %arg11[%c0_28, %c0_29] : memref<6x686xf32, #tpu.memory_space<vmem>>, vector<6x648xf32>
    %c0_30 = arith.constant 0 : index
    %c0_31 = arith.constant 0 : index
    %c0_32 = arith.constant 0 : index
    %29 = vector.load %arg4[%c0_30, %c0_31, %c0_32] : memref<9x4x6xf32, #tpu.memory_space<vmem>>, vector<1x4x6xf32>
    %30 = vector.shape_cast %29 : vector<1x4x6xf32> to vector<4x6xf32>
    %cst_33 = arith.constant dense<0.000000e+00> : vector<4x648xf32>
    %31 = tpu.matmul %30, %28, %cst_33 {dimension_numbers = #tpu.dot_dimension_numbers<[1], [0], [0], [1], [0, 0, 1, 1], [], []>, precision = #tpu.contract_precision<fp32>} : vector<4x6xf32>, vector<6x648xf32>, vector<4x648xf32> -> vector<4x648xf32>
    %c0_34 = arith.constant 0 : index
    %c1 = arith.constant 1 : index
    %32 = vector.load %arg11[%c0_34, %c1] : memref<6x686xf32, #tpu.memory_space<vmem>>, vector<6x648xf32>
    %c1_35 = arith.constant 1 : index
    %c0_36 = arith.constant 0 : index
    %c0_37 = arith.constant 0 : index
    %33 = vector.load %arg4[%c1_35, %c0_36, %c0_37] : memref<9x4x6xf32, #tpu.memory_space<vmem>>, vector<1x4x6xf32>
    %34 = vector.shape_cast %33 : vector<1x4x6xf32> to vector<4x6xf32>
    %cst_38 = arith.constant dense<0.000000e+00> : vector<4x648xf32>
    %35 = tpu.matmul %34, %32, %cst_38 {dimension_numbers = #tpu.dot_dimension_numbers<[1], [0], [0], [1], [0, 0, 1, 1], [], []>, precision = #tpu.contract_precision<fp32>} : vector<4x6xf32>, vector<6x648xf32>, vector<4x648xf32> -> vector<4x648xf32>
    %36 = arith.addf %31, %35 : vector<4x648xf32>
    %c0_39 = arith.constant 0 : index
    %c2_40 = arith.constant 2 : index
    %37 = vector.load %arg11[%c0_39, %c2_40] : memref<6x686xf32, #tpu.memory_space<vmem>>, vector<6x648xf32>
    %c2_41 = arith.constant 2 : index
    %c0_42 = arith.constant 0 : index
    %c0_43 = arith.constant 0 : index
    %38 = vector.load %arg4[%c2_41, %c0_42, %c0_43] : memref<9x4x6xf32, #tpu.memory_space<vmem>>, vector<1x4x6xf32>
    %39 = vector.shape_cast %38 : vector<1x4x6xf32> to vector<4x6xf32>
    %cst_44 = arith.constant dense<0.000000e+00> : vector<4x648xf32>
    %40 = tpu.matmul %39, %37, %cst_44 {dimension_numbers = #tpu.dot_dimension_numbers<[1], [0], [0], [1], [0, 0, 1, 1], [], []>, precision = #tpu.contract_precision<fp32>} : vector<4x6xf32>, vector<6x648xf32>, vector<4x648xf32> -> vector<4x648xf32>
    %41 = arith.addf %36, %40 : vector<4x648xf32>
    %c0_45 = arith.constant 0 : index
    %c18 = arith.constant 18 : index
    %42 = vector.load %arg11[%c0_45, %c18] : memref<6x686xf32, #tpu.memory_space<vmem>>, vector<6x648xf32>
    %c3_46 = arith.constant 3 : index
    %c0_47 = arith.constant 0 : index
    %c0_48 = arith.constant 0 : index
    %43 = vector.load %arg4[%c3_46, %c0_47, %c0_48] : memref<9x4x6xf32, #tpu.memory_space<vmem>>, vector<1x4x6xf32>
    %44 = vector.shape_cast %43 : vector<1x4x6xf32> to vector<4x6xf32>
    %cst_49 = arith.constant dense<0.000000e+00> : vector<4x648xf32>
    %45 = tpu.matmul %44, %42, %cst_49 {dimension_numbers = #tpu.dot_dimension_numbers<[1], [0], [0], [1], [0, 0, 1, 1], [], []>, precision = #tpu.contract_precision<fp32>} : vector<4x6xf32>, vector<6x648xf32>, vector<4x648xf32> -> vector<4x648xf32>
    %46 = arith.addf %41, %45 : vector<4x648xf32>
    %c0_50 = arith.constant 0 : index
    %c19_51 = arith.constant 19 : index
    %47 = vector.load %arg11[%c0_50, %c19_51] : memref<6x686xf32, #tpu.memory_space<vmem>>, vector<6x648xf32>
    %c4_52 = arith.constant 4 : index
    %c0_53 = arith.constant 0 : index
    %c0_54 = arith.constant 0 : index
    %48 = vector.load %arg4[%c4_52, %c0_53, %c0_54] : memref<9x4x6xf32, #tpu.memory_space<vmem>>, vector<1x4x6xf32>
    %49 = vector.shape_cast %48 : vector<1x4x6xf32> to vector<4x6xf32>
    %cst_55 = arith.constant dense<0.000000e+00> : vector<4x648xf32>
    %50 = tpu.matmul %49, %47, %cst_55 {dimension_numbers = #tpu.dot_dimension_numbers<[1], [0], [0], [1], [0, 0, 1, 1], [], []>, precision = #tpu.contract_precision<fp32>} : vector<4x6xf32>, vector<6x648xf32>, vector<4x648xf32> -> vector<4x648xf32>
    %51 = arith.addf %46, %50 : vector<4x648xf32>
    %c0_56 = arith.constant 0 : index
    %c20 = arith.constant 20 : index
    %52 = vector.load %arg11[%c0_56, %c20] : memref<6x686xf32, #tpu.memory_space<vmem>>, vector<6x648xf32>
    %c5_57 = arith.constant 5 : index
    %c0_58 = arith.constant 0 : index
    %c0_59 = arith.constant 0 : index
    %53 = vector.load %arg4[%c5_57, %c0_58, %c0_59] : memref<9x4x6xf32, #tpu.memory_space<vmem>>, vector<1x4x6xf32>
    %54 = vector.shape_cast %53 : vector<1x4x6xf32> to vector<4x6xf32>
    %cst_60 = arith.constant dense<0.000000e+00> : vector<4x648xf32>
    %55 = tpu.matmul %54, %52, %cst_60 {dimension_numbers = #tpu.dot_dimension_numbers<[1], [0], [0], [1], [0, 0, 1, 1], [], []>, precision = #tpu.contract_precision<fp32>} : vector<4x6xf32>, vector<6x648xf32>, vector<4x648xf32> -> vector<4x648xf32>
    %56 = arith.addf %51, %55 : vector<4x648xf32>
    %c0_61 = arith.constant 0 : index
    %c36 = arith.constant 36 : index
    %57 = vector.load %arg11[%c0_61, %c36] : memref<6x686xf32, #tpu.memory_space<vmem>>, vector<6x648xf32>
    %c6 = arith.constant 6 : index
    %c0_62 = arith.constant 0 : index
    %c0_63 = arith.constant 0 : index
    %58 = vector.load %arg4[%c6, %c0_62, %c0_63] : memref<9x4x6xf32, #tpu.memory_space<vmem>>, vector<1x4x6xf32>
    %59 = vector.shape_cast %58 : vector<1x4x6xf32> to vector<4x6xf32>
    %cst_64 = arith.constant dense<0.000000e+00> : vector<4x648xf32>
    %60 = tpu.matmul %59, %57, %cst_64 {dimension_numbers = #tpu.dot_dimension_numbers<[1], [0], [0], [1], [0, 0, 1, 1], [], []>, precision = #tpu.contract_precision<fp32>} : vector<4x6xf32>, vector<6x648xf32>, vector<4x648xf32> -> vector<4x648xf32>
    %61 = arith.addf %56, %60 : vector<4x648xf32>
    %c0_65 = arith.constant 0 : index
    %c37 = arith.constant 37 : index
    %62 = vector.load %arg11[%c0_65, %c37] : memref<6x686xf32, #tpu.memory_space<vmem>>, vector<6x648xf32>
    %c7 = arith.constant 7 : index
    %c0_66 = arith.constant 0 : index
    %c0_67 = arith.constant 0 : index
    %63 = vector.load %arg4[%c7, %c0_66, %c0_67] : memref<9x4x6xf32, #tpu.memory_space<vmem>>, vector<1x4x6xf32>
    %64 = vector.shape_cast %63 : vector<1x4x6xf32> to vector<4x6xf32>
    %cst_68 = arith.constant dense<0.000000e+00> : vector<4x648xf32>
    %65 = tpu.matmul %64, %62, %cst_68 {dimension_numbers = #tpu.dot_dimension_numbers<[1], [0], [0], [1], [0, 0, 1, 1], [], []>, precision = #tpu.contract_precision<fp32>} : vector<4x6xf32>, vector<6x648xf32>, vector<4x648xf32> -> vector<4x648xf32>
    %66 = arith.addf %61, %65 : vector<4x648xf32>
    %c0_69 = arith.constant 0 : index
    %c38 = arith.constant 38 : index
    %67 = vector.load %arg11[%c0_69, %c38] : memref<6x686xf32, #tpu.memory_space<vmem>>, vector<6x648xf32>
    %c8 = arith.constant 8 : index
    %c0_70 = arith.constant 0 : index
    %c0_71 = arith.constant 0 : index
    %68 = vector.load %arg4[%c8, %c0_70, %c0_71] : memref<9x4x6xf32, #tpu.memory_space<vmem>>, vector<1x4x6xf32>
    %69 = vector.shape_cast %68 : vector<1x4x6xf32> to vector<4x6xf32>
    %cst_72 = arith.constant dense<0.000000e+00> : vector<4x648xf32>
    %70 = tpu.matmul %69, %67, %cst_72 {dimension_numbers = #tpu.dot_dimension_numbers<[1], [0], [0], [1], [0, 0, 1, 1], [], []>, precision = #tpu.contract_precision<fp32>} : vector<4x6xf32>, vector<6x648xf32>, vector<4x648xf32> -> vector<4x648xf32>
    %71 = arith.addf %66, %70 : vector<4x648xf32>
    %72 = vector.broadcast %0 : vector<1x648xf32> to vector<4x648xf32>
    %73 = arith.mulf %71, %72 : vector<4x648xf32>
    %cst_73 = arith.constant dense<0.000000e+00> : vector<4xf32>
    %74 = vector.multi_reduction <add>, %73, %cst_73 [1] : vector<4x648xf32> to vector<4xf32>
    %75 = vector.shape_cast %74 : vector<4xf32> to vector<4x1xf32>
    %cst_74 = arith.constant 0.001953125 : f32
    %76 = vector.broadcast %cst_74 : f32 to vector<4x1xf32>
    %77 = arith.mulf %75, %76 : vector<4x1xf32>
    %78 = vector.broadcast %77 : vector<4x1xf32> to vector<4x648xf32>
    %79 = arith.subf %71, %78 : vector<4x648xf32>
    %80 = vector.broadcast %0 : vector<1x648xf32> to vector<4x648xf32>
    %81 = arith.mulf %79, %80 : vector<4x648xf32>
    %82 = arith.mulf %81, %81 : vector<4x648xf32>
    %cst_75 = arith.constant dense<0.000000e+00> : vector<4xf32>
    %83 = vector.multi_reduction <add>, %82, %cst_75 [1] : vector<4x648xf32> to vector<4xf32>
    %84 = vector.shape_cast %83 : vector<4xf32> to vector<4x1xf32>
    %cst_76 = arith.constant 0.001953125 : f32
    %85 = vector.broadcast %cst_76 : f32 to vector<4x1xf32>
    %86 = arith.mulf %84, %85 : vector<4x1xf32>
    %cst_77 = arith.constant 9.99999974E-6 : f32
    %87 = vector.broadcast %cst_77 : f32 to vector<4x1xf32>
    %88 = arith.addf %86, %87 : vector<4x1xf32>
    %89 = math.rsqrt %88 : vector<4x1xf32>
    %90 = arith.mulf %26, %89 : vector<4x1xf32>
    %91 = vector.broadcast %77 : vector<4x1xf32> to vector<4x648xf32>
    %92 = arith.subf %71, %91 : vector<4x648xf32>
    %93 = vector.broadcast %90 : vector<4x1xf32> to vector<4x648xf32>
    %94 = arith.mulf %92, %93 : vector<4x648xf32>
    %95 = vector.broadcast %27 : vector<4x1xf32> to vector<4x648xf32>
    %96 = arith.addf %94, %95 : vector<4x648xf32>
    %cst_78 = arith.constant 0.000000e+00 : f32
    %97 = vector.broadcast %cst_78 : f32 to vector<4x648xf32>
    %98 = arith.maximumf %96, %97 : vector<4x648xf32>
    %cst_79 = arith.constant 0.000000e+00 : f32
    %99 = vector.broadcast %cst_79 : f32 to vector<4x19xf32>
    %c0_80 = arith.constant 0 : index
    %c0_81 = arith.constant 0 : index
    %100 = vector.load %arg12[%c0_80, %c0_81] : memref<4x686xf32, #tpu.memory_space<vmem>>, vector<4x19xf32>
    tpu.vector_store %arg12[%c0_80, %c0_81], %99 {strides = array<i32>} : memref<4x686xf32, #tpu.memory_space<vmem>>, vector<4x19xf32>,
    %cst_82 = arith.constant 0.000000e+00 : f32
    %101 = vector.broadcast %cst_82 : f32 to vector<4x19xf32>
    %c0_83 = arith.constant 0 : index
    %c667_84 = arith.constant 667 : index
    %102 = vector.load %arg12[%c0_83, %c667_84] : memref<4x686xf32, #tpu.memory_space<vmem>>, vector<4x19xf32>
    tpu.vector_store %arg12[%c0_83, %c667_84], %101 {strides = array<i32>} : memref<4x686xf32, #tpu.memory_space<vmem>>, vector<4x19xf32>,
    %103 = vector.broadcast %0 : vector<1x648xf32> to vector<4x648xf32>
    %104 = arith.mulf %98, %103 : vector<4x648xf32>
    %c0_85 = arith.constant 0 : index
    %c19_86 = arith.constant 19 : index
    %105 = vector.load %arg12[%c0_85, %c19_86] : memref<4x686xf32, #tpu.memory_space<vmem>>, vector<4x648xf32>
    tpu.vector_store %arg12[%c0_85, %c19_86], %104 {strides = array<i32>} : memref<4x686xf32, #tpu.memory_space<vmem>>, vector<4x648xf32>,
    %c0_87 = arith.constant 0 : index
    %c0_88 = arith.constant 0 : index
    %106 = vector.load %arg8[%c0_87, %c0_88] : memref<4x1xf32, #tpu.memory_space<vmem>>, vector<4x1xf32>
    %c0_89 = arith.constant 0 : index
    %c0_90 = arith.constant 0 : index
    %107 = vector.load %arg9[%c0_89, %c0_90] : memref<4x1xf32, #tpu.memory_space<vmem>>, vector<4x1xf32>
    %c0_91 = arith.constant 0 : index
    %c0_92 = arith.constant 0 : index
    %108 = vector.load %arg12[%c0_91, %c0_92] : memref<4x686xf32, #tpu.memory_space<vmem>>, vector<4x648xf32>
    %c0_93 = arith.constant 0 : index
    %c0_94 = arith.constant 0 : index
    %c0_95 = arith.constant 0 : index
    %109 = vector.load %arg7[%c0_93, %c0_94, %c0_95] : memref<9x4x4xf32, #tpu.memory_space<vmem>>, vector<1x4x4xf32>
    %110 = vector.shape_cast %109 : vector<1x4x4xf32> to vector<4x4xf32>
    %cst_96 = arith.constant dense<0.000000e+00> : vector<4x648xf32>
    %111 = tpu.matmul %110, %108, %cst_96 {dimension_numbers = #tpu.dot_dimension_numbers<[1], [0], [0], [1], [0, 0, 1, 1], [], []>, precision = #tpu.contract_precision<fp32>} : vector<4x4xf32>, vector<4x648xf32>, vector<4x648xf32> -> vector<4x648xf32>
    %c0_97 = arith.constant 0 : index
    %c1_98 = arith.constant 1 : index
    %112 = vector.load %arg12[%c0_97, %c1_98] : memref<4x686xf32, #tpu.memory_space<vmem>>, vector<4x648xf32>
    %c1_99 = arith.constant 1 : index
    %c0_100 = arith.constant 0 : index
    %c0_101 = arith.constant 0 : index
    %113 = vector.load %arg7[%c1_99, %c0_100, %c0_101] : memref<9x4x4xf32, #tpu.memory_space<vmem>>, vector<1x4x4xf32>
    %114 = vector.shape_cast %113 : vector<1x4x4xf32> to vector<4x4xf32>
    %cst_102 = arith.constant dense<0.000000e+00> : vector<4x648xf32>
    %115 = tpu.matmul %114, %112, %cst_102 {dimension_numbers = #tpu.dot_dimension_numbers<[1], [0], [0], [1], [0, 0, 1, 1], [], []>, precision = #tpu.contract_precision<fp32>} : vector<4x4xf32>, vector<4x648xf32>, vector<4x648xf32> -> vector<4x648xf32>
    %116 = arith.addf %111, %115 : vector<4x648xf32>
    %c0_103 = arith.constant 0 : index
    %c2_104 = arith.constant 2 : index
    %117 = vector.load %arg12[%c0_103, %c2_104] : memref<4x686xf32, #tpu.memory_space<vmem>>, vector<4x648xf32>
    %c2_105 = arith.constant 2 : index
    %c0_106 = arith.constant 0 : index
    %c0_107 = arith.constant 0 : index
    %118 = vector.load %arg7[%c2_105, %c0_106, %c0_107] : memref<9x4x4xf32, #tpu.memory_space<vmem>>, vector<1x4x4xf32>
    %119 = vector.shape_cast %118 : vector<1x4x4xf32> to vector<4x4xf32>
    %cst_108 = arith.constant dense<0.000000e+00> : vector<4x648xf32>
    %120 = tpu.matmul %119, %117, %cst_108 {dimension_numbers = #tpu.dot_dimension_numbers<[1], [0], [0], [1], [0, 0, 1, 1], [], []>, precision = #tpu.contract_precision<fp32>} : vector<4x4xf32>, vector<4x648xf32>, vector<4x648xf32> -> vector<4x648xf32>
    %121 = arith.addf %116, %120 : vector<4x648xf32>
    %c0_109 = arith.constant 0 : index
    %c18_110 = arith.constant 18 : index
    %122 = vector.load %arg12[%c0_109, %c18_110] : memref<4x686xf32, #tpu.memory_space<vmem>>, vector<4x648xf32>
    %c3_111 = arith.constant 3 : index
    %c0_112 = arith.constant 0 : index
    %c0_113 = arith.constant 0 : index
    %123 = vector.load %arg7[%c3_111, %c0_112, %c0_113] : memref<9x4x4xf32, #tpu.memory_space<vmem>>, vector<1x4x4xf32>
    %124 = vector.shape_cast %123 : vector<1x4x4xf32> to vector<4x4xf32>
    %cst_114 = arith.constant dense<0.000000e+00> : vector<4x648xf32>
    %125 = tpu.matmul %124, %122, %cst_114 {dimension_numbers = #tpu.dot_dimension_numbers<[1], [0], [0], [1], [0, 0, 1, 1], [], []>, precision = #tpu.contract_precision<fp32>} : vector<4x4xf32>, vector<4x648xf32>, vector<4x648xf32> -> vector<4x648xf32>
    %126 = arith.addf %121, %125 : vector<4x648xf32>
    %c0_115 = arith.constant 0 : index
    %c19_116 = arith.constant 19 : index
    %127 = vector.load %arg12[%c0_115, %c19_116] : memref<4x686xf32, #tpu.memory_space<vmem>>, vector<4x648xf32>
    %c4_117 = arith.constant 4 : index
    %c0_118 = arith.constant 0 : index
    %c0_119 = arith.constant 0 : index
    %128 = vector.load %arg7[%c4_117, %c0_118, %c0_119] : memref<9x4x4xf32, #tpu.memory_space<vmem>>, vector<1x4x4xf32>
    %129 = vector.shape_cast %128 : vector<1x4x4xf32> to vector<4x4xf32>
    %cst_120 = arith.constant dense<0.000000e+00> : vector<4x648xf32>
    %130 = tpu.matmul %129, %127, %cst_120 {dimension_numbers = #tpu.dot_dimension_numbers<[1], [0], [0], [1], [0, 0, 1, 1], [], []>, precision = #tpu.contract_precision<fp32>} : vector<4x4xf32>, vector<4x648xf32>, vector<4x648xf32> -> vector<4x648xf32>
    %131 = arith.addf %126, %130 : vector<4x648xf32>
    %c0_121 = arith.constant 0 : index
    %c20_122 = arith.constant 20 : index
    %132 = vector.load %arg12[%c0_121, %c20_122] : memref<4x686xf32, #tpu.memory_space<vmem>>, vector<4x648xf32>
    %c5_123 = arith.constant 5 : index
    %c0_124 = arith.constant 0 : index
    %c0_125 = arith.constant 0 : index
    %133 = vector.load %arg7[%c5_123, %c0_124, %c0_125] : memref<9x4x4xf32, #tpu.memory_space<vmem>>, vector<1x4x4xf32>
    %134 = vector.shape_cast %133 : vector<1x4x4xf32> to vector<4x4xf32>
    %cst_126 = arith.constant dense<0.000000e+00> : vector<4x648xf32>
    %135 = tpu.matmul %134, %132, %cst_126 {dimension_numbers = #tpu.dot_dimension_numbers<[1], [0], [0], [1], [0, 0, 1, 1], [], []>, precision = #tpu.contract_precision<fp32>} : vector<4x4xf32>, vector<4x648xf32>, vector<4x648xf32> -> vector<4x648xf32>
    %136 = arith.addf %131, %135 : vector<4x648xf32>
    %c0_127 = arith.constant 0 : index
    %c36_128 = arith.constant 36 : index
    %137 = vector.load %arg12[%c0_127, %c36_128] : memref<4x686xf32, #tpu.memory_space<vmem>>, vector<4x648xf32>
    %c6_129 = arith.constant 6 : index
    %c0_130 = arith.constant 0 : index
    %c0_131 = arith.constant 0 : index
    %138 = vector.load %arg7[%c6_129, %c0_130, %c0_131] : memref<9x4x4xf32, #tpu.memory_space<vmem>>, vector<1x4x4xf32>
    %139 = vector.shape_cast %138 : vector<1x4x4xf32> to vector<4x4xf32>
    %cst_132 = arith.constant dense<0.000000e+00> : vector<4x648xf32>
    %140 = tpu.matmul %139, %137, %cst_132 {dimension_numbers = #tpu.dot_dimension_numbers<[1], [0], [0], [1], [0, 0, 1, 1], [], []>, precision = #tpu.contract_precision<fp32>} : vector<4x4xf32>, vector<4x648xf32>, vector<4x648xf32> -> vector<4x648xf32>
    %141 = arith.addf %136, %140 : vector<4x648xf32>
    %c0_133 = arith.constant 0 : index
    %c37_134 = arith.constant 37 : index
    %142 = vector.load %arg12[%c0_133, %c37_134] : memref<4x686xf32, #tpu.memory_space<vmem>>, vector<4x648xf32>
    %c7_135 = arith.constant 7 : index
    %c0_136 = arith.constant 0 : index
    %c0_137 = arith.constant 0 : index
    %143 = vector.load %arg7[%c7_135, %c0_136, %c0_137] : memref<9x4x4xf32, #tpu.memory_space<vmem>>, vector<1x4x4xf32>
    %144 = vector.shape_cast %143 : vector<1x4x4xf32> to vector<4x4xf32>
    %cst_138 = arith.constant dense<0.000000e+00> : vector<4x648xf32>
    %145 = tpu.matmul %144, %142, %cst_138 {dimension_numbers = #tpu.dot_dimension_numbers<[1], [0], [0], [1], [0, 0, 1, 1], [], []>, precision = #tpu.contract_precision<fp32>} : vector<4x4xf32>, vector<4x648xf32>, vector<4x648xf32> -> vector<4x648xf32>
    %146 = arith.addf %141, %145 : vector<4x648xf32>
    %c0_139 = arith.constant 0 : index
    %c38_140 = arith.constant 38 : index
    %147 = vector.load %arg12[%c0_139, %c38_140] : memref<4x686xf32, #tpu.memory_space<vmem>>, vector<4x648xf32>
    %c8_141 = arith.constant 8 : index
    %c0_142 = arith.constant 0 : index
    %c0_143 = arith.constant 0 : index
    %148 = vector.load %arg7[%c8_141, %c0_142, %c0_143] : memref<9x4x4xf32, #tpu.memory_space<vmem>>, vector<1x4x4xf32>
    %149 = vector.shape_cast %148 : vector<1x4x4xf32> to vector<4x4xf32>
    %cst_144 = arith.constant dense<0.000000e+00> : vector<4x648xf32>
    %150 = tpu.matmul %149, %147, %cst_144 {dimension_numbers = #tpu.dot_dimension_numbers<[1], [0], [0], [1], [0, 0, 1, 1], [], []>, precision = #tpu.contract_precision<fp32>} : vector<4x4xf32>, vector<4x648xf32>, vector<4x648xf32> -> vector<4x648xf32>
    %151 = arith.addf %146, %150 : vector<4x648xf32>
    %152 = vector.broadcast %0 : vector<1x648xf32> to vector<4x648xf32>
    %153 = arith.mulf %151, %152 : vector<4x648xf32>
    %cst_145 = arith.constant dense<0.000000e+00> : vector<4xf32>
    %154 = vector.multi_reduction <add>, %153, %cst_145 [1] : vector<4x648xf32> to vector<4xf32>
    %155 = vector.shape_cast %154 : vector<4xf32> to vector<4x1xf32>
    %cst_146 = arith.constant 0.001953125 : f32
    %156 = vector.broadcast %cst_146 : f32 to vector<4x1xf32>
    %157 = arith.mulf %155, %156 : vector<4x1xf32>
    %158 = vector.broadcast %157 : vector<4x1xf32> to vector<4x648xf32>
    %159 = arith.subf %151, %158 : vector<4x648xf32>
    %160 = vector.broadcast %0 : vector<1x648xf32> to vector<4x648xf32>
    %161 = arith.mulf %159, %160 : vector<4x648xf32>
    %162 = arith.mulf %161, %161 : vector<4x648xf32>
    %cst_147 = arith.constant dense<0.000000e+00> : vector<4xf32>
    %163 = vector.multi_reduction <add>, %162, %cst_147 [1] : vector<4x648xf32> to vector<4xf32>
    %164 = vector.shape_cast %163 : vector<4xf32> to vector<4x1xf32>
    %cst_148 = arith.constant 0.001953125 : f32
    %165 = vector.broadcast %cst_148 : f32 to vector<4x1xf32>
    %166 = arith.mulf %164, %165 : vector<4x1xf32>
    %cst_149 = arith.constant 9.99999974E-6 : f32
    %167 = vector.broadcast %cst_149 : f32 to vector<4x1xf32>
    %168 = arith.addf %166, %167 : vector<4x1xf32>
    %169 = math.rsqrt %168 : vector<4x1xf32>
    %170 = arith.mulf %106, %169 : vector<4x1xf32>
    %171 = vector.broadcast %157 : vector<4x1xf32> to vector<4x648xf32>
    %172 = arith.subf %151, %171 : vector<4x648xf32>
    %173 = vector.broadcast %170 : vector<4x1xf32> to vector<4x648xf32>
    %174 = arith.mulf %172, %173 : vector<4x648xf32>
    %175 = vector.broadcast %107 : vector<4x1xf32> to vector<4x648xf32>
    %176 = arith.addf %174, %175 : vector<4x648xf32>
    %cst_150 = arith.constant 0.000000e+00 : f32
    %177 = vector.broadcast %cst_150 : f32 to vector<4x648xf32>
    %178 = arith.maximumf %176, %177 : vector<4x648xf32>
    %c0_151 = arith.constant 0 : index
    %c0_152 = arith.constant 0 : index
    %179 = vector.load %arg10[%c0_151, %c0_152] : memref<4x648xf32, #tpu.memory_space<vmem>>, vector<4x648xf32>
    tpu.vector_store %arg10[%c0_151, %c0_152], %178 {strides = array<i32>} : memref<4x648xf32, #tpu.memory_space<vmem>>, vector<4x648xf32>,
    return
  }
}

</mosaic_0001>

<bundles_post_ra>
// kernel: up_forward.1
= control target key start
LH: loop header
LB: loop body
LE: loop exit
PB: predicated region body
PF: predicated region fallthrough
CT: control target
= control target key end

     0   :  { %v31016_v3 = vmov 0.0   ;;  %vm61_vm0 = vcmask 523264   ;;  %vm28625_vm1 = vmmov 0   ;;  %s28627_s23 = smov 19   ;;  %vm1249_vm2 = vcmask 152576   ;;  %s28629_s24 = smov 87   ;;  %s31001_s1 = inlined_call_operand.vmem [shape: f32[64,324], index: 1, kind: input, shape index: {}]   ;;  %s31002_s0 = inlined_call_operand.vmem [shape: f32[8,64], index: 0, kind: input, shape index: {}]   ;;  %s31003_s2 = inlined_call_operand.vmem [shape: f32[2,648], index: 2, kind: input, shape index: {}]   ;;  %s31004_s4 = inlined_call_operand.vmem [shape: f32[9,4,6], index: 4, kind: input, shape index: {}]   ;;  %s31005_s3 = inlined_call_operand.vmem [shape: f32[1,648], index: 3, kind: input, shape index: {}]   ;;  %s31006_s6 = inlined_call_operand.vmem [shape: f32[4,1], index: 6, kind: input, shape index: {}]   ;;  %s31007_s5 = inlined_call_operand.vmem [shape: f32[4,1], index: 5, kind: input, shape index: {}]   ;;  %s31008_s7 = inlined_call_operand.vmem [shape: f32[9,4,4], index: 7, kind: input, shape index: {}]   ;;  %s31009_s9 = inlined_call_operand.vmem [shape: f32[4,1], index: 9, kind: input, shape index: {}]   ;;  %s31010_s8 = inlined_call_operand.vmem [shape: f32[4,1], index: 8, kind: input, shape index: {}]   ;;  %s31011_s10 = inlined_call_operand.vmem [shape: f32[4,648], index: 10, kind: output, shape index: {}]  }
   0x1   :  { %v38_v0 = vld [vmem:[%s31001_s1 + $0x8] sm:$0xff]  ;;  %v41_v1 = vld [vmem:[%s31001_s1 + $0x20] sm:$0xff]  ;;  %145 = vmatprep.mubr.f32.mxu0 %v31016_v3  ;;  %9187 = vmatprep.mubr.f32.mxu1 %v31016_v3  ;;  %v40_v6 = vld [vmem:[%s31001_s1 + $0x18] sm:$0xff]  ;;  %1250 = vst.msk [vmem:[#allocation2] sm:$0x3f] %vm1249_vm2, %v31016_v3  ;;  %vm1306_vm3 = vcmask 1041560  }
   0x2   :  { %v37_v2 = vld [vmem:[%s31001_s1] sm:$0xff]  ;;  %v65_v4 = vand.u32 4294901760, %v38_v0  ;;  %v69_v5 = vand.u32 4294901760, %v41_v1  ;;  %v44_v8 = vld [vmem:[%s31001_s1 + $0x38] sm:$0xff]  ;;  %v47_v9 = vld [vmem:[%s31001_s1 + $0x50] sm:$0xff]  ;;  %v71_v10 = vand.u32 4294901760, %v40_v6 }
   0x3   :  { %v67_v7 = vand.u32 4294901760, %v37_v2  ;;  %v73_v11 = vand.u32 4294901760, %v44_v8  ;;  %v77_v12 = vand.u32 4294901760, %v47_v9  ;;  %v43_v13 = vld [vmem:[%s31001_s1 + $0x30] sm:$0xff]  ;;  %v46_v14 = vld [vmem:[%s31001_s1 + $0x48] sm:$0xff]  ;;  %v53_v20 = vld [vmem:[%s31001_s1 + $0x80] sm:$0xff] }
   0x4   :  { %v50_v15 = vld [vmem:[%s31001_s1 + $0x68] sm:$0xff]  ;;  %v28723_v16 = vpack.c.bf16 %v69_v5, %v65_v4  ;;  %v28725_v17 = vsub.f32 %v38_v0, %v65_v4  ;;  %v28727_v18 = vsub.f32 %v41_v1, %v69_v5  ;;  %v49_v21 = vld [vmem:[%s31001_s1 + $0x60] sm:$0xff]  ;;  %v52_v22 = vld [vmem:[%s31001_s1 + $0x78] sm:$0xff]  ;;  %v28742_v24 = vsub.f32 %v40_v6, %v71_v10  ;;  %s28632_s27 = smov 110   ;;  %s28633_s28 = smov 109  }
   0x5   :  { %v28729_v19 = vsub.f32 %v37_v2, %v67_v7  ;;  %v28740_v23 = vpack.c.bf16 %v71_v10, %v67_v7  ;;  %v28744_v25 = vpack.c.bf16 %v77_v12, %v73_v11  ;;  %v28746_v26 = vsub.f32 %v44_v8, %v73_v11  ;;  %v56_v27 = vld [vmem:[%s31001_s1 + $0x98] sm:$0xff]  ;;  %v59_v35 = vld [vmem:[%s31001_s1 + $0xb0] sm:$0xff]  ;;  %v58_v42 = vld [vmem:[%s31001_s1 + $0xa8] sm:$0xff]  ;;  %s28634_s29 = smov 108   ;;  %s28635_s12 = smov 92  }
   0x6   :  { %27775 = vmatprep.subr.bf16.mxu0 %v28723_v16  ;;  %v28752_v28 = vsub.f32 %v47_v9, %v77_v12  ;;  %v75_v29 = vand.u32 4294901760, %v43_v13  ;;  %v79_v30 = vand.u32 4294901760, %v46_v14  ;;  %v81_v31 = vand.u32 4294901760, %v50_v15  ;;  %v55_v37 = vld [vmem:[%s31001_s1 + $0x90] sm:$0xff]  ;;  %v36_v43 = vld [vmem:[%s31002_s0] sm:$0xff]  ;;  %s28631_s0 = smov 126  }
   0x7   :  { %27777 = vmatpush1.bf16.msra.mxu0 %v28740_v23  ;;  %v85_v32 = vand.u32 4294901760, %v53_v20  ;;  %v83_v33 = vand.u32 4294901760, %v49_v21  ;;  %v87_v34 = vand.u32 4294901760, %v52_v22  ;;  %v89_v36 = vand.u32 4294901760, %v56_v27  ;;  %s28636_s13 = smov 91   ;;  %s28637_s14 = smov 90  }
   0x8   :  { %27779 = vmatprep.subr.bf16.mxu0 %v28744_v25  ;;  %v28762_v38 = vpack.c.bf16 %v79_v30, %v75_v29  ;;  %v28764_v39 = vsub.f32 %v43_v13, %v75_v29  ;;  %v28766_v40 = vsub.f32 %v46_v14, %v79_v30  ;;  %v28768_v41 = vsub.f32 %v50_v15, %v81_v31 }
   0x9   :  { %v28776_v44 = vpack.c.bf16 %v85_v32, %v81_v31  ;;  %v28778_v45 = vsub.f32 %v53_v20, %v85_v32  ;;  %v28780_v46 = vpack.c.bf16 %v87_v34, %v83_v33  ;;  %v28782_v47 = vsub.f32 %v49_v21, %v83_v33 }
   0xa   :  { %v28784_v48 = vsub.f32 %v52_v22, %v87_v34  ;;  %v93_v49 = vand.u32 4294901760, %v59_v35  ;;  %v28786_v50 = vsub.f32 %v56_v27, %v89_v36  ;;  %v91_v51 = vand.u32 4294901760, %v55_v37 }
   0xb   :  { %27781 = vmatpush1.bf16.msra.mxu0 %v28762_v38  ;;  %v95_v52 = vand.u32 4294901760, %v58_v42  ;;  %v159_v53 = vand.u32 4294901760, %v28725_v17  ;;  %v171_v54 = vand.u32 4294901760, %v28727_v18  ;;  %v63_v55 = vsel %vm61_vm0, %v36_v43, 0 }
   0xc   :  { %27783 = vmatprep.subr.bf16.mxu0 %v28776_v44  ;;  %v28793_v56 = vpack.c.bf16 %v93_v49, %v89_v36  ;;  %v28795_v57 = vsub.f32 %v59_v35, %v93_v49  ;;  %v28797_v58 = vsub.f32 %v55_v37, %v91_v51  ;;  %v28799_v59 = vand.u32 4294901760, %v63_v55 }
   0xd   :  { %v28801_v60 = vpack.c.bf16 %v95_v52, %v91_v51  ;;  %v28803_v61 = vsub.f32 %v58_v42, %v95_v52  ;;  %v160_v62 = vsub.f32 %v28725_v17, %v159_v53  ;;  %v172_v63 = vsub.f32 %v28727_v18, %v171_v54 }
   0xe   :  { %v28812_v0 = vsub.f32 %v63_v55, %v28799_v59  ;;  %v165_v1 = vand.u32 4294901760, %v28729_v19  ;;  %v177_v2 = vand.u32 4294901760, %v28742_v24  ;;  %v183_v4 = vand.u32 4294901760, %v28746_v26 }
   0xf   :  { %27785 = vmatpush1.bf16.msra.mxu0 %v28780_v46  ;;  %v161_v5 = vand.u32 4294901760, %v160_v62  ;;  %v173_v6 = vand.u32 4294901760, %v172_v63  ;;  %v195_v7 = vand.u32 4294901760, %v28752_v28  ;;  %v189_v8 = vand.u32 4294901760, %v28764_v39 }
  0x10   :  { %27787 = vmatprep.subr.bf16.mxu0 %v28793_v56  ;;  %v28822_v9 = vand.u32 4294901760, %v28812_v0  ;;  %v166_v10 = vsub.f32 %v28729_v19, %v165_v1  ;;  %v178_v11 = vsub.f32 %v28742_v24, %v177_v2  ;;  %v184_v12 = vsub.f32 %v28746_v26, %v183_v4 }
  0x11   :  { %v27790_v13 = vpack.c.bf16 %v173_v6, %v161_v5  ;;  %v196_v14 = vsub.f32 %v28752_v28, %v195_v7  ;;  %v190_v15 = vsub.f32 %v28764_v39, %v189_v8  ;;  %v201_v20 = vand.u32 4294901760, %v28766_v40 }
  0x12   :  { %v149_v21 = vsub.f32 %v28812_v0, %v28822_v9  ;;  %v167_v22 = vand.u32 4294901760, %v166_v10  ;;  %v179_v27 = vand.u32 4294901760, %v178_v11  ;;  %v185_v29 = vand.u32 4294901760, %v184_v12 }
  0x13   :  { %27789 = vmatpush1.bf16.msra.mxu0 %v28801_v60  ;;  %v197_v30 = vand.u32 4294901760, %v196_v14  ;;  %v191_v31 = vand.u32 4294901760, %v190_v15  ;;  %v202_v32 = vsub.f32 %v28766_v40, %v201_v20  ;;  %v207_v33 = vand.u32 4294901760, %v28768_v41 }
  0x14   :  { %27791 = vmatprep.subr.bf16.mxu0 %v27790_v13  ;;  %v28847_v34 = vand.u32 4294901760, %v149_v21  ;;  %v27792_v35 = vpack.c.bf16 %v179_v27, %v167_v22  ;;  %v219_v36 = vand.u32 4294901760, %v28778_v45  ;;  %v213_v37 = vand.u32 4294901760, %v28782_v47 }
  0x15   :  { %v27794_v42 = vpack.c.bf16 %v197_v30, %v185_v29  ;;  %v203_v43 = vand.u32 4294901760, %v202_v32  ;;  %v208_v49 = vsub.f32 %v28768_v41, %v207_v33  ;;  %v225_v51 = vand.u32 4294901760, %v28784_v48 }
  0x16   :  { %151 = vmatmul.mubr.f32.vlgmr.msra.gmra.mrb[0].mxu0 %v28847_v34  ;;  %v220_v52 = vsub.f32 %v28778_v45, %v219_v36  ;;  %v214_v55 = vsub.f32 %v28782_v47, %v213_v37  ;;  %v231_v62 = vand.u32 4294901760, %v28786_v50  ;;  %v243_v63 = vand.u32 4294901760, %v28795_v57 }
  0x17   :  { %27793 = vmatpush1.bf16.msra.mxu0 %v27792_v35  ;;  %v27796_v5 = vpack.c.bf16 %v203_v43, %v191_v31  ;;  %v209_v6 = vand.u32 4294901760, %v208_v49  ;;  %v226_v10 = vsub.f32 %v28784_v48, %v225_v51  ;;  %v237_v11 = vand.u32 4294901760, %v28797_v58  ;;  %301 = vmatprep.mubr.f32.mxu0 %v31016_v3 }
  0x18   :  { %27795 = vmatprep.subr.bf16.mxu0 %v27794_v42  ;;  %v221_v12 = vand.u32 4294901760, %v220_v52  ;;  %v215_v13 = vand.u32 4294901760, %v214_v55  ;;  %v232_v14 = vsub.f32 %v28786_v50, %v231_v62  ;;  %v244_v15 = vsub.f32 %v28795_v57, %v243_v63 }
  0x19   :  { %v227_v21 = vand.u32 4294901760, %v226_v10  ;;  %v238_v22 = vsub.f32 %v28797_v58, %v237_v11  ;;  %v249_v27 = vand.u32 4294901760, %v28803_v61  ;;  %v27806_v55 = vpack.c.bf16 %v28727_v18, %v28725_v17 }
  0x1a   :  { %v27798_v29 = vpack.c.bf16 %v221_v12, %v209_v6  ;;  %v233_v30 = vand.u32 4294901760, %v232_v14  ;;  %v245_v31 = vand.u32 4294901760, %v244_v15  ;;  %v27808_v6 = vpack.c.bf16 %v28742_v24, %v28729_v19 }
  0x1b   :  { %27797 = vmatpush1.bf16.msra.mxu0 %v27796_v5  ;;  %v27800_v32 = vpack.c.bf16 %v227_v21, %v215_v13  ;;  %v239_v35 = vand.u32 4294901760, %v238_v22  ;;  %v250_v42 = vsub.f32 %v28803_v61, %v249_v27  ;;  %v27810_v5 = vpack.c.bf16 %v28752_v28, %v28746_v26  ;;  %v39_v28 = vld [vmem:[%s31001_s1 + $0x10] sm:$0xff] }
  0x1c   :  { %27799 = vmatprep.subr.bf16.mxu0 %v27798_v29  ;;  %v27802_v43 = vpack.c.bf16 %v245_v31, %v233_v30  ;;  %v27812_v10 = vpack.c.bf16 %v28766_v40, %v28764_v39  ;;  %v27814_v12 = vpack.c.bf16 %v28778_v45, %v28768_v41  ;;  %v27816_v13 = vpack.c.bf16 %v28784_v48, %v28782_v47  ;;  %v51_v47 = vld [vmem:[%s31001_s1 + $0x70] sm:$0xff]  ;;  %v54_v48 = vld [vmem:[%s31001_s1 + $0x88] sm:$0xff] }
  0x1d   :  { %v251_v49 = vand.u32 4294901760, %v250_v42  ;;  %v27818_v14 = vpack.c.bf16 %v28795_v57, %v28786_v50  ;;  %v27820_v15 = vpack.c.bf16 %v28803_v61, %v28797_v58  ;;  %v27838_v61 = vpack.c.bf16 %v171_v54, %v159_v53  ;;  %v57_v57 = vld [vmem:[%s31001_s1 + $0xa0] sm:$0xff]  ;;  %v60_v58 = vld [vmem:[%s31001_s1 + $0xb8] sm:$0xff] }
  0x1e   :  { %v27840_v21 = vpack.c.bf16 %v177_v2, %v165_v1  ;;  %v27842_v22 = vpack.c.bf16 %v195_v7, %v183_v4  ;;  %v27844_v17 = vpack.c.bf16 %v201_v20, %v189_v8  ;;  %v27846_v18 = vpack.c.bf16 %v219_v36, %v207_v33 }
  0x1f   :  { %27801 = vmatpush1.bf16.msra.mxu0 %v27800_v32  ;;  %v27804_v52 = vpack.c.bf16 %v251_v49, %v239_v35  ;;  %v27848_v19 = vpack.c.bf16 %v225_v51, %v213_v37  ;;  %v27850_v24 = vpack.c.bf16 %v243_v63, %v231_v62  ;;  %v27852_v26 = vpack.c.bf16 %v249_v27, %v237_v11 }
  0x20   :  { %27803 = vmatprep.subr.bf16.mxu0 %v27802_v43  ;;  %v713_v39 = vand.u32 4294901760, %v39_v28  ;;  %v28624_v50 = vmov 0.0|0.0   ;;  %v725_v54 = vand.u32 4294901760, %v51_v47  ;;  %v731_v7 = vand.u32 4294901760, %v57_v57 }
  0x21   :  { %v734_v8 = vand.u32 4294901760, %v60_v58  ;;  %vm1251_vm4 = vcmask 373976   ;;  %vm1294_vm7 = vcmask 154624   ;;  %vm1413_vm11 = vcmask 711680  }
  0x22   :  { %v28964_v45 = vsub.f32 %v39_v28, %v713_v39  ;;  %v28996_v33 = vsub.f32 %v51_v47, %v725_v54  ;;  %v29012_v27 = vsub.f32 %v57_v57, %v731_v7  ;;  %1252 = vst.msk [vmem:[#allocation2 + $0x28] sm:$0x3f] %vm1251_vm4, %v31016_v3  ;;  %vm1491_vm13 = vcmask 48128  }
  0x23   :  { %27805 = vmatpush1.bf16.msra.mxu0 %v27804_v52  ;;  %v29010_v11 = vpack.c.bf16 %v734_v8, %v731_v7  ;;  %v29014_v29 = vsub.f32 %v60_v58, %v734_v8  ;;  %vm1485_vm14 = vcmask 1039360   ;;  %vm1495_vm15 = vcmask 1045504  }
  0x24   :  { %27807 = vmatprep.subr.bf16.mxu0 %v27806_v55  ;;  %v798_v2 = vand.u32 4294901760, %v28964_v45  ;;  %v826_v30 = vand.u32 4294901760, %v28996_v33  ;;  %v840_v52 = vand.u32 4294901760, %v29012_v27  ;;  %vm1312_vm0 = vcmask 214016  }
  0x25   :  { %v847_v55 = vand.u32 4294901760, %v29014_v29  ;;  %v27904_v28 = vpack.c.bf16 %v29014_v29, %v29012_v27  ;;  %vm7199_vm2 = vcmask 891904   ;;  %vm10071_vm4 = vcmask 752640  }
  0x26   :  { %303 = vmatmul.mubr.f32.vlgmr.msra.gmra.mrb[0].mxu0 %v28799_v59  ;;  %v799_v37 = vsub.f32 %v28964_v45, %v798_v2  ;;  %v827_v49 = vsub.f32 %v28996_v33, %v826_v30 }
  0x27   :  { %27809 = vmatpush1.bf16.msra.mxu0 %v27808_v6  ;;  %405 = vmatprep.mubr.f32.mxu0 %v31016_v3 }
  0x28   :  { %27811 = vmatprep.subr.bf16.mxu0 %v27810_v5  ;;  %v800_v32 = vand.u32 4294901760, %v799_v37 }
  0x2b   :  { %27813 = vmatpush1.bf16.msra.mxu0 %v27812_v10 }
  0x2c   :  { %27815 = vmatprep.subr.bf16.mxu0 %v27814_v12 }
  0x2f   :  { %27817 = vmatpush1.bf16.msra.mxu0 %v27816_v13  ;;  %v841_v13 = vsub.f32 %v29012_v27, %v840_v52 }
  0x30   :  { %27819 = vmatprep.subr.bf16.mxu0 %v27818_v14 }
  0x33   :  { %27821 = vmatpush1.bf16.msra.mxu0 %v27820_v15  ;;  %v828_v15 = vand.u32 4294901760, %v827_v49  ;;  %v29124_v49 = vld.sshfl [vmem:[%s31003_s2 + $0x8] sm:$0x33 pattern:$0x76325410] }
  0x34   :  { %27823 = vmatprep.subr.bf16.mxu0 %v28723_v16 }
  0x36   :  { %408 = vmatmul.mubr.f32.vlgmr.msra.gmra.mrb[0].mxu0 %v28812_v0 }
  0x37   :  { %27825 = vmatpush1.bf16.msra.mxu0 %v28740_v23  ;;  %494 = vmatprep.mubr.f32.mxu0 %v31016_v3 }
  0x38   :  { %27827 = vmatprep.subr.bf16.mxu0 %v28744_v25 }
  0x3b   :  { %27829 = vmatpush1.bf16.msra.mxu0 %v28762_v38 }
  0x3c   :  { %27831 = vmatprep.subr.bf16.mxu0 %v28776_v44 }
  0x3f   :  { %27833 = vmatpush1.bf16.msra.mxu0 %v28780_v46 }
  0x40   :  { %27835 = vmatprep.subr.bf16.mxu0 %v28793_v56 }
  0x43   :  { %27837 = vmatpush1.bf16.msra.mxu0 %v28801_v60 }
  0x44   :  { %27839 = vmatprep.subr.bf16.mxu0 %v27838_v61 }
  0x46   :  { %498 = vmatmul.mubr.f32.vlgmr.msra.gmra.mrb[0].mxu0 %v28822_v9 }
  0x47   :  { %27841 = vmatpush1.bf16.msra.mxu0 %v27840_v21  ;;  %616 = vmatprep.mubr.f32.mxu0 %v31016_v3  ;;  %v848_v21 = vsub.f32 %v29014_v29, %v847_v55 }
  0x48   :  { %27843 = vmatprep.subr.bf16.mxu0 %v27842_v22 }
  0x4b   :  { %27845 = vmatpush1.bf16.msra.mxu0 %v27844_v17  ;;  %v842_v17 = vand.u32 4294901760, %v841_v13 }
  0x4c   :  { %27847 = vmatprep.subr.bf16.mxu0 %v27846_v18  ;;  %v849_v18 = vand.u32 4294901760, %v848_v21 }
  0x4f   :  { %27849 = vmatpush1.bf16.msra.mxu0 %v27848_v19 }
  0x50   :  { %27851 = vmatprep.subr.bf16.mxu0 %v27850_v24 }
  0x53   :  { %27853 = vmatpush1.bf16.msra.mxu0 %v27852_v26 }
  0x54   :  { %27855 = vmatprep.subr.bf16.mxu0 %v28723_v16  ;;  %v42_v16 = vld [vmem:[%s31001_s1 + $0x28] sm:$0xff] }
  0x56   :  { %618 = vmatmul.mubr.f32.vlgmr.msra.gmra.mrb[0].mxu0 %v28799_v59 }
  0x57   :  { %27857 = vmatpush1.bf16.msra.mxu0 %v28740_v23  ;;  %704 = vmatprep.mubr.f32.mxu0 %v31016_v3  ;;  %v716_v23 = vand.u32 4294901760, %v42_v16 }
  0x58   :  { %27859 = vmatprep.subr.bf16.mxu0 %v28744_v25  ;;  %v45_v25 = vld [vmem:[%s31001_s1 + $0x40] sm:$0xff] }
  0x59   :  { %v719_v40 = vand.u32 4294901760, %v45_v25 }
  0x5b   :  { %27861 = vmatpush1.bf16.msra.mxu0 %v28762_v38  ;;  %v48_v38 = vld [vmem:[%s31001_s1 + $0x58] sm:$0xff] }
  0x5c   :  { %27863 = vmatprep.subr.bf16.mxu0 %v28776_v44  ;;  %v722_v41 = vand.u32 4294901760, %v48_v38  ;;  %v28962_v44 = vpack.c.bf16 %v716_v23, %v713_v39 }
  0x5e   :  { %v28976_v53 = vpack.c.bf16 %v722_v41, %v719_v40  ;;  %v28987_v1 = vsub.f32 %v48_v38, %v722_v41 }
  0x5f   :  { %27865 = vmatpush1.bf16.msra.mxu0 %v28780_v46  ;;  %v28966_v46 = vsub.f32 %v42_v16, %v716_v23  ;;  %v1261_v23 = vlaneseq }
  0x60   :  { %27867 = vmatprep.subr.bf16.mxu0 %v28793_v56  ;;  %v728_v56 = vand.u32 4294901760, %v54_v48  ;;  %v819_v63 = vand.u32 4294901760, %v28987_v1 }
  0x61   :  { %v805_v4 = vand.u32 4294901760, %v28966_v46  ;;  %v27895_v19 = vpack.c.bf16 %v28966_v46, %v28964_v45  ;;  %v1253_v45 = vld [vmem:[%s31003_s2] sm:$0xff]  ;;  %vm1346_vm5 = vcmp.ge.s32.totalorder %v1261_v23, 19  ;;  %vm1347_vm6 = vcmp.lt.s32.totalorder %v1261_v23, 343  ;;  %s28630_s2 = smov 127  }
  0x62   :  { %v28994_v20 = vpack.c.bf16 %v728_v56, %v725_v54  ;;  %v28998_v36 = vsub.f32 %v54_v48, %v728_v56  ;;  %v820_v43 = vsub.f32 %v28987_v1, %v819_v63  ;;  %v28628_v56 = vmov 1966171168   ;;  %vm29132_vm8 = vmand %vm1346_vm5, %vm1347_vm6 }
  0x63   :  { %27869 = vmatpush1.bf16.msra.mxu0 %v28801_v60  ;;  %v28985_v60 = vsub.f32 %v45_v25, %v719_v40  ;;  %v806_v51 = vsub.f32 %v28966_v46, %v805_v4  ;;  %v28626_v25 = vmov 1983009808   ;;  %v29103_v40 = vshrl.u32 %v1261_v23, 7 }
  0x64   :  { %27870 = vmatprep.subr.bf16.mxu0 %v28624_v50  ;;  %v833_v31 = vand.u32 4294901760, %v28998_v36  ;;  %v821_v10 = vand.u32 4294901760, %v820_v43  ;;  %v27901_v26 = vpack.c.bf16 %v28998_v36, %v28996_v33  ;;  %v1259_v38 = vunpack.c.l.s4 %v28626_v25 }
  0x65   :  { %v812_v62 = vand.u32 4294901760, %v28985_v60  ;;  %v807_v35 = vand.u32 4294901760, %v806_v51  ;;  %v27898_v24 = vpack.c.bf16 %v28987_v1, %v28985_v60  ;;  %31020 = vst [vmem:[#allocation4_spill] sm:$0xff] %v29103_v40  ;;  %v1319_v57 = vunpack.c.l.s4 %v28628_v56 }
  0x66   :  { %706 = vmatmul.mubr.f32.vlgmr.msra.gmra.mrb[0].mxu0 %v28799_v59  ;;  %v834_v12 = vsub.f32 %v28998_v36, %v833_v31  ;;  %v27925_v39 = vpack.c.bf16 %v833_v31, %v826_v30  ;;  %v1260_v41 = vunpack.c.0.s8 %v1259_v38  ;;  %vm1416_vm9 = vcmp.ge.s32.totalorder %v1261_v23, 87 }
  0x67   :  { %27872 = vmatpush3.bf16.msra.mxu0 %v28962_v44  ;;  %27676 = vmatprep.mubr.msk.f32.mxu0 %vm28625_vm1, %v31016_v3  ;;  %v813_v42 = vsub.f32 %v28985_v60, %v812_v62  ;;  %v27883_v6 = vpack.c.bf16 %v807_v35, %v800_v32  ;;  %v27922_v16 = vpack.c.bf16 %v819_v63, %v812_v62  ;;  %v1320_v60 = vunpack.c.0.s8 %v1319_v57 }
  0x68   :  { %27873 = vmatprep.subr.bf16.mxu0 %v28624_v50  ;;  %v835_v61 = vand.u32 4294901760, %v834_v12  ;;  %vm1417_vm10 = vcmp.lt.s32.totalorder %v1261_v23, 411  ;;  %v1281_v57 = vcombine.high %v29124_v49, %v29124_v49  ;;  %vm11507_vm5 = vcmask 744448  }
  0x69   :  { %v814_v5 = vand.u32 4294901760, %v813_v42  ;;  %v1323_v1 = vsub.s32 %v1320_v60, %v29103_v40  ;;  %vm29148_vm12 = vmand %vm1416_vm9, %vm1417_vm10  ;;  %vm4327_vm6 = vcmask 1031168   ;;  %vm14402_vm9 = vcmask 1043456  }
  0x6a   :  { %v27889_v22 = vpack.c.bf16 %v835_v61, %v828_v15  ;;  %vm14412_vm10 = vcmask 60416  }
  0x6b   :  { %27875 = vmatpush3.bf16.msra.mxu0 %v28976_v53  ;;  %v27886_v14 = vpack.c.bf16 %v821_v10, %v814_v5 }
  0x6c   :  { %27876 = vmatprep.subr.bf16.mxu0 %v28624_v50 }
  0x6f   :  { %27878 = vmatpush3.bf16.msra.mxu0 %v28994_v20 }
  0x70   :  { %27879 = vmatprep.subr.bf16.mxu0 %v28624_v50 }
  0x73   :  { %27881 = vmatpush3.bf16.msra.mxu0 %v29010_v11 }
  0x74   :  { %27882 = vmatprep.subr.bf16.mxu0 %v28624_v50 }
  0x76   :  { %27677 = vmatmul.mubr.f32.vlgmr.msra.gmra.mrb[2].mxu0 %v28847_v34  ;;  %v27892_v34 = vpack.c.bf16 %v849_v18, %v842_v17 }
  0x77   :  { %27884 = vmatpush3.bf16.msra.mxu0 %v27883_v6  ;;  %27695 = vmatprep.mubr.msk.f32.mxu0 %vm28625_vm1, %v31016_v3 }
  0x78   :  { %27885 = vmatprep.subr.bf16.mxu0 %v28624_v50 }
  0x7b   :  { %27887 = vmatpush3.bf16.msra.mxu0 %v27886_v14 }
  0x7c   :  { %27888 = vmatprep.subr.bf16.mxu0 %v28624_v50 }
  0x7f   :  { %27890 = vmatpush3.bf16.msra.mxu0 %v27889_v22 }
  0x80   :  { %27891 = vmatprep.subr.bf16.mxu0 %v28624_v50 }
  0x83   :  { %27893 = vmatpush3.bf16.msra.mxu0 %v27892_v34 }
  0x84   :  { %27894 = vmatprep.subr.bf16.mxu0 %v28624_v50 }
  0x86   :  { %27696 = vmatmul.mubr.f32.vlgmr.msra.gmra.mrb[2].mxu0 %v28799_v59 }
  0x87   :  { %27896 = vmatpush3.bf16.msra.mxu0 %v27895_v19  ;;  %27714 = vmatprep.mubr.msk.f32.mxu0 %vm28625_vm1, %v31016_v3 }
  0x88   :  { %27897 = vmatprep.subr.bf16.mxu0 %v28624_v50 }
  0x8b   :  { %27899 = vmatpush3.bf16.msra.mxu0 %v27898_v24 }
  0x8c   :  { %27900 = vmatprep.subr.bf16.mxu0 %v28624_v50 }
  0x8f   :  { %27902 = vmatpush3.bf16.msra.mxu0 %v27901_v26 }
  0x90   :  { %27903 = vmatprep.subr.bf16.mxu0 %v28624_v50 }
  0x93   :  { %27905 = vmatpush3.bf16.msra.mxu0 %v27904_v28 }
  0x94   :  { %27906 = vmatprep.subr.bf16.mxu0 %v28624_v50 }
  0x96   :  { %27715 = vmatmul.mubr.f32.vlgmr.msra.gmra.mrb[2].mxu0 %v28812_v0  ;;  %v27919_v0 = vpack.c.bf16 %v805_v4, %v798_v2 }
  0x97   :  { %27908 = vmatpush3.bf16.msra.mxu0 %v28962_v44  ;;  %27733 = vmatprep.mubr.msk.f32.mxu0 %vm28625_vm1, %v31016_v3 }
  0x98   :  { %27909 = vmatprep.subr.bf16.mxu0 %v28624_v50 }
  0x9b   :  { %27911 = vmatpush3.bf16.msra.mxu0 %v28976_v53 }
  0x9c   :  { %27912 = vmatprep.subr.bf16.mxu0 %v28624_v50 }
  0x9f   :  { %27914 = vmatpush3.bf16.msra.mxu0 %v28994_v20 }
  0xa0   :  { %27915 = vmatprep.subr.bf16.mxu0 %v28624_v50 }
  0xa3   :  { %27917 = vmatpush3.bf16.msra.mxu0 %v29010_v11 }
  0xa4   :  { %27918 = vmatprep.subr.bf16.mxu0 %v28624_v50 }
  0xa6   :  { %27734 = vmatmul.mubr.f32.vlgmr.msra.gmra.mrb[2].mxu0 %v28822_v9  ;;  %v27928_v9 = vpack.c.bf16 %v847_v55, %v840_v52 }
  0xa7   :  { %27920 = vmatpush3.bf16.msra.mxu0 %v27919_v0  ;;  %27752 = vmatprep.mubr.msk.f32.mxu0 %vm28625_vm1, %v31016_v3 }
  0xa8   :  { %27921 = vmatprep.subr.bf16.mxu0 %v28624_v50 }
  0xab   :  { %27923 = vmatpush3.bf16.msra.mxu0 %v27922_v16 }
  0xac   :  { %27924 = vmatprep.subr.bf16.mxu0 %v28624_v50 }
  0xaf   :  { %27926 = vmatpush3.bf16.msra.mxu0 %v27925_v39 }
  0xb0   :  { %27927 = vmatprep.subr.bf16.mxu0 %v28624_v50 }
  0xb3   :  { %27929 = vmatpush3.bf16.msra.mxu0 %v27928_v9 }
  0xb4   :  { %27930 = vmatprep.subr.bf16.mxu0 %v28624_v50 }
  0xb6   :  { %27753 = vmatmul.mubr.f32.vlgmr.msra.gmra.mrb[2].mxu0 %v28799_v59 }
  0xb7   :  { %27932 = vmatpush3.bf16.msra.mxu0 %v28962_v44  ;;  %27771 = vmatprep.mubr.msk.f32.mxu0 %vm28625_vm1, %v31016_v3  ;;  %v1263_v44 = vsub.s32 %v1260_v41, %v29103_v40  ;;  %vm12943_vm1 = vcmask 736256  }
  0xb8   :  { %27933 = vmatprep.subr.bf16.mxu0 %v28624_v50 }
  0xb9   :  { %v1264_v46 = vrot.slane %v1253_v45, %v1263_v44 }
  0xbb   :  { %27935 = vmatpush3.bf16.msra.mxu0 %v28976_v53  ;;  %1282 = vrot.lane.b32.xlu0 %v1264_v46, %s28627_s23  ;;  %v1272_v43 = vcombine.high %v1264_v46, %v1264_v46 }
  0xbc   :  { %27936 = vmatprep.subr.bf16.mxu0 %v28624_v50 }
  0xbf   :  { %27938 = vmatpush3.bf16.msra.mxu0 %v28994_v20 }
  0xc0   :  { %27939 = vmatprep.subr.bf16.mxu0 %v28624_v50 }
  0xc3   :  { %27941 = vmatpush3.bf16.msra.mxu0 %v29010_v11 }
  0xc6   :  { %27772 = vmatmul.mubr.f32.vlgmr.msra.gmra.mrb[2].mxu0 %v28799_v59  ;;  %v1257_v59 = vcombine.high %v1253_v45, %v1253_v45 }
  0xc7   :  { %1574 = vmatprep.mubr.f32.mxu0 %v31016_v3 }
  0xc8   :  { %v1271_v47 = vrot.slane %v1257_v59, %v1263_v44 }
  0xca   :  { %v1273_v52 = vcombine.high %v1271_v47, %v1271_v47 }
 0x12d   :  { %v29111_v58 = vpop.permute.xlu0 %1282 }
 0x12e   :  { %1307 = vst.msk [vmem:[#allocation2] sm:$0x3] %vm1306_vm3, %v29111_v58  ;;  %vm8635_vm3 = vcmask 883712  }
 0x139   :  { %v707_v48 = vpop.f32.mrb[0].mxu0 }
 0x13a   :  { %v709_v50 = vpop.f32.mrb[1].mxu0 }
 0x13b   :  { %v1317_v53 = vcombine.low %v707_v48, %v709_v50  ;;  %v1386_v54 = vcombine.high %v707_v48, %v709_v50 }
 0x13d   :  { %v1324_v4 = vrot.slane %v1317_v53, %v1323_v1  ;;  %v1394_v33 = vrot.slane %v1386_v54, %v1323_v1 }
 0x199   :  { %v1245_v2 = vpop.f32.mrb[2].mxu0 }
 0x19a   :  { %v1331_v7 = vrot.slane %v1245_v2, %v1323_v1  ;;  %v1387_v8 = vcombine.high %v1245_v2, %v1245_v2  ;;  %v27773_v20 = vpop.f32.mrb[3].mxu0  ;;  %v27590_v2 = vld [vmem:[%s31004_s4 + $0x4] sm:$0xf] }
 0x19c   :  { %v1332_v36 = vcombine.low %v1324_v4, %v1331_v7  ;;  %v1352_v37 = vcombine.high %v1324_v4, %v1331_v7  ;;  %v1401_v51 = vrot.slane %v1387_v8, %v1323_v1  ;;  %v1493_v4 = vsel %vm1491_vm13, %v27590_v2, 0 }
 0x19d   :  { %v29220_v7 = vand.u32 4294901760, %v1493_v4 }
 0x19e   :  { %v1402_v62 = vcombine.low %v1394_v33, %v1401_v51  ;;  %v1422_v63 = vcombine.high %v1394_v33, %v1401_v51  ;;  %v1339_v11 = vrot.slane %v1332_v36, %v1323_v1  ;;  %v1359_v29 = vrot.slane %v1352_v37, %v1323_v1 }
 0x19f   :  { %v29223_v8 = vsub.f32 %v1493_v4, %v29220_v7 }
 0x1a0   :  { %1340 = vrot.lane.b32.xlu0 %v1339_v11, %s28627_s23  ;;  %v1368_v27 = vcombine.high %v1339_v11, %v1339_v11  ;;  %v1377_v30 = vcombine.high %v1359_v29, %v1359_v29  ;;  %v1409_v31 = vrot.slane %v1402_v62, %v1323_v1  ;;  %v1429_v32 = vrot.slane %v1422_v63, %v1323_v1 }
 0x1a1   :  { %v29226_v20 = vand.u32 4294901760, %v29223_v8 }
 0x1a2   :  { %1369 = vrot.lane.b32.xlu1 %v1368_v27, %s28627_s23  ;;  %v1438_v35 = vcombine.high %v1409_v31, %v1409_v31  ;;  %v1447_v42 = vcombine.high %v1429_v32, %v1429_v32 }
 0x1a3   :  { %v1578_v62 = vsub.f32 %v29223_v8, %v29226_v20 }
 0x1a4   :  { %1360 = vrot.lane.b32.xlu0 %v1359_v29, %s28627_s23 }
 0x1a6   :  { %1378 = vrot.lane.b32.xlu1 %v1377_v30, %s28627_s23 }
 0x1a8   :  { %1410 = vrot.lane.b32.xlu0 %v1409_v31, %s28629_s24 }
 0x1aa   :  { %1430 = vrot.lane.b32.xlu1 %v1429_v32, %s28629_s24 }
 0x1ac   :  { %1439 = vrot.lane.b32.xlu0 %v1438_v35, %s28629_s24  ;;  %v29235_v35 = vand.u32 4294901760, %v1578_v62 }
 0x1ae   :  { %1448 = vrot.lane.b32.xlu1 %v1447_v42, %s28629_s24 }
 0x1b0   :  { %1286 = vrot.lane.b32.xlu0 %v1271_v47, %s28627_s23 }
 0x1b2   :  { %1284 = vrot.lane.b32.xlu1 %v1272_v43, %s28627_s23 }
 0x1b4   :  { %1290 = vrot.lane.b32.xlu0 %v29124_v49, %s28627_s23 }
 0x1b6   :  { %1288 = vrot.lane.b32.xlu1 %v1273_v52, %s28627_s23 }
 0x212   :  { %v1341_v55 = vpop.permute.xlu0 %1340 }
 0x213   :  { %v1342_v5 = vrot.slane %v1341_v55, 7 }
 0x214   :  { %v1370_v10 = vpop.permute.xlu1 %1369 }
 0x215   :  { %v1343_v12 = vsel %vm1294_vm7, %v1342_v5, %v1341_v55  ;;  %v1371_v13 = vrot.slane %v1370_v10, 7 }
 0x216   :  { %1350 = vst.msk [vmem:[#allocation2 + $0x2] ss:$8 sm:$0x7] %vm29132_vm8, %v1343_v12  ;;  %v1361_v14 = vpop.permute.xlu0 %1360 }
 0x217   :  { %v1372_v15 = vsel %vm1294_vm7, %v1371_v13, %v1370_v10  ;;  %v1362_v61 = vrot.slane %v1361_v14, 7 }
 0x218   :  { %1375 = vst.msk [vmem:[#allocation2 + $0x4] ss:$8 sm:$0x7] %vm29132_vm8, %v1372_v15  ;;  %v1379_v21 = vpop.permute.xlu1 %1378 }
 0x219   :  { %v1363_v22 = vsel %vm1294_vm7, %v1362_v61, %v1361_v14  ;;  %v1380_v17 = vrot.slane %v1379_v21, 7 }
 0x21a   :  { %1366 = vst.msk [vmem:[#allocation2 + $0x3] ss:$8 sm:$0x7] %vm29132_vm8, %v1363_v22  ;;  %v1411_v18 = vpop.permute.xlu0 %1410 }
 0x21b   :  { %v1381_v34 = vsel %vm1294_vm7, %v1380_v17, %v1379_v21  ;;  %v1412_v24 = vrot.slane %v1411_v18, 7 }
 0x21c   :  { %1384 = vst.msk [vmem:[#allocation2 + $0x5] ss:$8 sm:$0x7] %vm29132_vm8, %v1381_v34  ;;  %v1431_v26 = vpop.permute.xlu1 %1430  ;;  %vm5763_vm8 = vcmask 900096  }
 0x21d   :  { %v1414_v28 = vsel %vm1413_vm11, %v1412_v24, %v1411_v18  ;;  %v1432_v0 = vrot.slane %v1431_v26, 7 }
 0x21e   :  { %1420 = vst.msk [vmem:[#allocation2 + $0x12] ss:$8 sm:$0xf] %vm29148_vm12, %v1414_v28  ;;  %v1440_v16 = vpop.permute.xlu0 %1439 }
 0x21f   :  { %v1433_v39 = vsel %vm1413_vm11, %v1432_v0, %v1431_v26  ;;  %v1441_v9 = vrot.slane %v1440_v16, 7 }
 0x220   :  { %1436 = vst.msk [vmem:[#allocation2 + $0x13] ss:$8 sm:$0xf] %vm29148_vm12, %v1433_v39  ;;  %v1449_v23 = vpop.permute.xlu1 %1448 }
 0x221   :  { %v1442_v25 = vsel %vm1413_vm11, %v1441_v9, %v1440_v16  ;;  %v1450_v38 = vrot.slane %v1449_v23, 7 }
 0x222   :  { %1445 = vst.msk [vmem:[#allocation2 + $0x14] ss:$8 sm:$0xf] %vm29148_vm12, %v1442_v25  ;;  %v1287_v41 = vpop.permute.xlu0 %1286 }
 0x223   :  { %v1451_v44 = vsel %vm1413_vm11, %v1450_v38, %v1449_v23  ;;  %vm14481_vm11 = vcmask 150528  }
 0x224   :  { %1454 = vst.msk [vmem:[#allocation2 + $0x15] ss:$8 sm:$0xf] %vm29148_vm12, %v1451_v44  ;;  %v1285_v45 = vpop.permute.xlu1 %1284  ;;  %vm14483_vm12 = vcmask 371928  }
 0x225   :  { %v1295_v46 = vsel %vm1294_vm7, %v29111_v58, %v1285_v45  ;;  %v1296_v59 = vsel %vm1294_vm7, %v1285_v45, %v1287_v41  ;;  %v29181_v58 = vld [vmem:[#allocation2] sm:$0x3f] }
 0x226   :  { %1308 = vst [vmem:[#allocation2 + $0x8] sm:$0x3] %v1295_v46  ;;  %1309 = vst [vmem:[#allocation2 + $0x10] sm:$0x3] %v1296_v59  ;;  %v1291_v47 = vpop.permute.xlu0 %1290 }
 0x228   :  { %v1289_v48 = vpop.permute.xlu1 %1288 }
 0x229   :  { %v1297_v50 = vsel %vm1294_vm7, %v1287_v41, %v1289_v48  ;;  %v1298_v53 = vsel %vm1294_vm7, %v1289_v48, %v1291_v47 }
 0x22a   :  { %1310 = vst [vmem:[#allocation2 + $0x18] sm:$0x3] %v1297_v50  ;;  %1311 = vst [vmem:[#allocation2 + $0x20] sm:$0x3] %v1298_v53 }
 0x22d   :  { %v29171_v54 = vld [vmem:[#allocation2 + $0x10] sm:$0x3f]  ;;  %v29173_v56 = vld [vmem:[#allocation2 + $0x8] sm:$0x3f] }
 0x22e   :  { %1477 = vrot.lane.b32.xlu0 %v29171_v54, %s28630_s2  ;;  %1475 = vrot.lane.b32.xlu1 %v29173_v56, %s28630_s2 }
 0x231   :  { %v29186_v60 = vld [vmem:[#allocation2 + $0x20] sm:$0x3f]  ;;  %v29188_v1 = vld [vmem:[#allocation2 + $0x18] sm:$0x3f] }
 0x232   :  { %1292 = vrot.lane.b32.xlu0 %v1281_v57, %s28627_s23  ;;  %1473 = vrot.lane.b32.xlu1 %v29181_v58, %s28630_s2 }
 0x236   :  { %1481 = vrot.lane.b32.xlu0 %v29186_v60, %s28630_s2  ;;  %1479 = vrot.lane.b32.xlu1 %v29188_v1, %s28630_s2 }
 0x23a   :  { %4317 = vrot.lane.b32.xlu0 %v29173_v56, %s28631_s0 }
 0x23e   :  { %4315 = vrot.lane.b32.xlu0 %v29181_v58, %s28631_s0 }
 0x242   :  { %4323 = vrot.lane.b32.xlu0 %v29186_v60, %s28631_s0 }
 0x246   :  { %5753 = vrot.lane.b32.xlu0 %v29173_v56, %s28632_s27 }
 0x24a   :  { %5751 = vrot.lane.b32.xlu0 %v29181_v58, %s28632_s27 }
 0x24e   :  { %5759 = vrot.lane.b32.xlu0 %v29186_v60, %s28632_s27 }
 0x252   :  { %7189 = vrot.lane.b32.xlu0 %v29173_v56, %s28633_s28 }
 0x256   :  { %7187 = vrot.lane.b32.xlu0 %v29181_v58, %s28633_s28 }
 0x25a   :  { %7195 = vrot.lane.b32.xlu0 %v29186_v60, %s28633_s28 }
 0x25e   :  { %8625 = vrot.lane.b32.xlu0 %v29173_v56, %s28634_s29 }
 0x262   :  { %8623 = vrot.lane.b32.xlu0 %v29181_v58, %s28634_s29 }
 0x2a0   :  { %v1478_v33 = vpop.permute.xlu0 %1477  ;;  %v1476_v36 = vpop.permute.xlu1 %1475 }
 0x2a1   :  { %v1487_v37 = vsel %vm1485_vm14, %v1476_v36, %v1478_v33 }
 0x2a2   :  { %v1498_v51 = vsel %vm1495_vm15, %v1487_v37, 0 }
 0x2a3   :  { %v1508_v63 = vand.u32 4294901760, %v1498_v51 }
 0x2a4   :  { %v1293_v11 = vpop.permute.xlu0 %1292  ;;  %v1474_v27 = vpop.permute.xlu1 %1473 }
 0x2a5   :  { %v1587_v29 = vsub.f32 %v1498_v51, %v1508_v63  ;;  %v1299_v30 = vsel %vm1294_vm7, %v1291_v47, %v1293_v11  ;;  %v1486_v31 = vsel %vm1485_vm14, %v1474_v27, %v1476_v36  ;;  %1509 = vmatprep.subr.mxu0 %v1508_v63 }
 0x2a6   :  { %1313 = vst.msk [vmem:[#allocation2 + $0x28] sm:$0x3] %vm1312_vm0, %v1299_v30  ;;  %v1496_v32 = vsel %vm1495_vm15, %v1486_v31, 0 }
 0x2a7   :  { %v1510_v42 = vand.u32 4294901760, %v1496_v32  ;;  %v1588_v43 = vand.u32 4294901760, %v1587_v29 }
 0x2a8   :  { %v29255_v13 = vpop.permute.xlu0 %1481  ;;  %v1480_v14 = vpop.permute.xlu1 %1479 }
 0x2a9   :  { %v1593_v49 = vsub.f32 %v1496_v32, %v1510_v42  ;;  %1511 = vmatpush1.msra.mxu0 %v1510_v42  ;;  %v1589_v52 = vsub.f32 %v1587_v29, %v1588_v43  ;;  %v1489_v15 = vsel %vm1485_vm14, %v1480_v14, %v29255_v13  ;;  %v1488_v61 = vsel %vm1485_vm14, %v1478_v33, %v1480_v14  ;;  %v1464_v14 = vld [vmem:[%s31004_s4] sm:$0xf] }
 0x2aa   :  { %1580 = vmatmul.mubr.f32.vlgmr.msra.gmra.mrb[4].mxu0 %v29235_v35  ;;  %v1502_v21 = vsel %vm1495_vm15, %v1489_v15, 0  ;;  %v1500_v22 = vsel %vm1495_vm15, %v1488_v61, 0  ;;  %v27594_v15 = vld [vmem:[%s31004_s4 + $0x14] sm:$0xf]  ;;  %v2904_v61 = vsel %vm1491_vm13, %v1464_v14, 0 }
 0x2ab   :  { %v1594_v55 = vand.u32 4294901760, %v1593_v49  ;;  %v1590_v6 = vand.u32 4294901760, %v1589_v52  ;;  %1660 = vmatprep.mubr.f32.mxu0 %v31016_v3  ;;  %v1973_v17 = vand.u32 4294901760, %v1502_v21  ;;  %v1975_v18 = vand.u32 4294901760, %v1500_v22 }
 0x2ac   :  { %v29307_v9 = vpop.permute.xlu0 %4317 }
 0x2ad   :  { %1591 = vmatprep.subr.mxu0 %v1590_v6  ;;  %v29239_v5 = vld [vmem:[#allocation2 + $0x28] sm:$0x3f]  ;;  %v1595_v10 = vsub.f32 %v1593_v49, %v1594_v55  ;;  %v2052_v34 = vsub.f32 %v1502_v21, %v1973_v17  ;;  %v2058_v19 = vsub.f32 %v1500_v22, %v1975_v18 }
 0x2ae   :  { %8633 = vrot.lane.b32.xlu0 %v29239_v5, %s28634_s29  ;;  %1483 = vrot.lane.b32.xlu1 %v29239_v5, %s28630_s2 }
 0x2af   :  { %v1596_v12 = vand.u32 4294901760, %v1595_v10  ;;  %v2053_v24 = vand.u32 4294901760, %v2052_v34  ;;  %v2059_v26 = vand.u32 4294901760, %v2058_v19 }
 0x2b0   :  { %v29312_v23 = vpop.permute.xlu0 %4315 }
 0x2b1   :  { %1597 = vmatpush1.msra.mxu0 %v1596_v12  ;;  %v2054_v28 = vsub.f32 %v2052_v34, %v2053_v24  ;;  %v2060_v0 = vsub.f32 %v2058_v19, %v2059_v26 }
 0x2b2   :  { %10063 = vrot.lane.b32.xlu0 %v29171_v54, %s28635_s12  ;;  %4319 = vrot.lane.b32.xlu1 %v29171_v54, %s28631_s0 }
 0x2b3   :  { %1662 = vmatmul.mubr.f32.vlgmr.msra.gmra.mrb[4].mxu0 %v29220_v7  ;;  %1670 = vmatprep.subr.mxu0 %v1587_v29  ;;  %v2055_v16 = vand.u32 4294901760, %v2054_v28  ;;  %v2061_v39 = vand.u32 4294901760, %v2060_v0 }
 0x2b4   :  { %1673 = vmatpush1.msra.mxu0 %v1593_v49  ;;  %1736 = vmatprep.mubr.f32.mxu0 %v31016_v3  ;;  %v29320_v25 = vpop.permute.xlu0 %4323 }
 0x2b5   :  { %1746 = vmatprep.subr.mxu0 %v1508_v63 }
 0x2b6   :  { %10067 = vrot.lane.b32.xlu0 %v29186_v60, %s28635_s12  ;;  %4321 = vrot.lane.b32.xlu1 %v29188_v1, %s28631_s0 }
 0x2b8   :  { %v29326_v38 = vpop.permute.xlu0 %5753 }
 0x2ba   :  { %8629 = vrot.lane.b32.xlu0 %v29188_v1, %s28634_s29  ;;  %4325 = vrot.lane.b32.xlu1 %v29239_v5, %s28631_s0 }
 0x2bb   :  { %1739 = vmatmul.mubr.f32.vlgmr.msra.gmra.mrb[4].mxu0 %v29223_v8 }
 0x2bc   :  { %1748 = vmatpush1.msra.mxu0 %v1510_v42  ;;  %1811 = vmatprep.mubr.f32.mxu0 %v31016_v3  ;;  %v29333_v41 = vpop.permute.xlu0 %5751 }
 0x2bd   :  { %1824 = vmatprep.subr.mxu0 %v1588_v43 }
 0x2be   :  { %11499 = vrot.lane.b32.xlu0 %v29171_v54, %s28636_s13  ;;  %5755 = vrot.lane.b32.xlu1 %v29171_v54, %s28632_s27 }
 0x2c0   :  { %v29338_v44 = vpop.permute.xlu0 %5759 }
 0x2c2   :  { %10065 = vrot.lane.b32.xlu0 %v29188_v1, %s28635_s12  ;;  %5757 = vrot.lane.b32.xlu1 %v29188_v1, %s28632_s27 }
 0x2c3   :  { %1815 = vmatmul.mubr.f32.vlgmr.msra.gmra.mrb[4].mxu0 %v29226_v20 }
 0x2c4   :  { %1828 = vmatpush1.msra.mxu0 %v1594_v55  ;;  %1891 = vmatprep.mubr.f32.mxu0 %v31016_v3  ;;  %v29346_v45 = vpop.permute.xlu0 %7189 }
 0x2c5   :  { %1900 = vmatprep.subr.mxu0 %v1508_v63 }
 0x2c6   :  { %11505 = vrot.lane.b32.xlu0 %v29239_v5, %s28636_s13  ;;  %5761 = vrot.lane.b32.xlu1 %v29239_v5, %s28632_s27 }
 0x2c8   :  { %v29348_v46 = vpop.permute.xlu0 %7187 }
 0x2ca   :  { %12933 = vrot.lane.b32.xlu0 %v29173_v56, %s28637_s14  ;;  %7191 = vrot.lane.b32.xlu1 %v29171_v54, %s28633_s28 }
 0x2cb   :  { %1893 = vmatmul.mubr.f32.vlgmr.msra.gmra.mrb[4].mxu0 %v29220_v7 }
 0x2cc   :  { %1902 = vmatpush1.msra.mxu0 %v1510_v42  ;;  %1965 = vmatprep.mubr.f32.mxu0 %v31016_v3  ;;  %v29350_v59 = vpop.permute.xlu0 %7195 }
 0x2cd   :  { %1974 = vmatprep.subr.mxu0 %v1973_v17 }
 0x2ce   :  { %12931 = vrot.lane.b32.xlu0 %v29181_v58, %s28637_s14  ;;  %7193 = vrot.lane.b32.xlu1 %v29188_v1, %s28633_s28 }
 0x2d0   :  { %v29352_v47 = vpop.permute.xlu0 %8625 }
 0x2d2   :  { %12939 = vrot.lane.b32.xlu0 %v29186_v60, %s28637_s14  ;;  %7197 = vrot.lane.b32.xlu1 %v29239_v5, %s28633_s28 }
 0x2d3   :  { %1967 = vmatmul.mubr.f32.vlgmr.msra.gmra.mrb[4].mxu0 %v29220_v7 }
 0x2d4   :  { %1976 = vmatpush1.msra.mxu0 %v1975_v18  ;;  %2039 = vmatprep.mubr.f32.mxu0 %v31016_v3  ;;  %v29354_v48 = vpop.permute.xlu0 %8623 }
 0x2d5   :  { %2056 = vmatprep.subr.mxu0 %v2055_v16 }
 0x2d6   :  { %8627 = vrot.lane.b32.xlu1 %v29171_v54, %s28634_s29 }
 0x2d7   :  { %2045 = vmatmul.mubr.f32.vlgmr.msra.gmra.mrb[6].mxu0 %v29235_v35 }
 0x2d8   :  { %2062 = vmatpush1.msra.mxu0 %v2061_v39  ;;  %2125 = vmatprep.mubr.f32.mxu0 %v31016_v3 }
 0x2d9   :  { %2135 = vmatprep.subr.mxu0 %v2052_v34  ;;  %v2906_v34 = vsel %vm1495_vm15, %v29181_v58, 0 }
 0x2da   :  { %8631 = vrot.lane.b32.xlu1 %v29186_v60, %s28634_s29  ;;  %v29432_v28 = vand.u32 4294901760, %v2906_v34 }
 0x2de   :  { %10061 = vrot.lane.b32.xlu1 %v29173_v56, %s28635_s12 }
 0x2df   :  { %2127 = vmatmul.mubr.f32.vlgmr.msra.gmra.mrb[6].mxu0 %v29220_v7 }
 0x2e0   :  { %2138 = vmatpush1.msra.mxu0 %v2058_v19  ;;  %2201 = vmatprep.mubr.f32.mxu0 %v31016_v3  ;;  %v29416_v19 = vand.u32 4294901760, %v2904_v61 }
 0x2e1   :  { %2211 = vmatprep.subr.mxu0 %v1973_v17 }
 0x2e2   :  { %10059 = vrot.lane.b32.xlu1 %v29181_v58, %s28635_s12  ;;  %v29438_v16 = vsub.f32 %v2904_v61, %v29416_v19 }
 0x2e6   :  { %10069 = vrot.lane.b32.xlu1 %v29239_v5, %s28635_s12 }
 0x2e7   :  { %2204 = vmatmul.mubr.f32.vlgmr.msra.gmra.mrb[6].mxu0 %v29223_v8 }
 0x2e8   :  { %2213 = vmatpush1.msra.mxu0 %v1975_v18  ;;  %2276 = vmatprep.mubr.f32.mxu0 %v31016_v3 }
 0x2e9   :  { %2289 = vmatprep.subr.mxu0 %v2053_v24 }
 0x2ea   :  { %11497 = vrot.lane.b32.xlu1 %v29173_v56, %s28636_s13 }
 0x2ee   :  { %11495 = vrot.lane.b32.xlu1 %v29181_v58, %s28636_s13 }
 0x2ef   :  { %2280 = vmatmul.mubr.f32.vlgmr.msra.gmra.mrb[6].mxu0 %v29226_v20 }
 0x2f0   :  { %2293 = vmatpush1.msra.mxu0 %v2059_v26  ;;  %2356 = vmatprep.mubr.f32.mxu0 %v31016_v3 }
 0x2f1   :  { %2365 = vmatprep.subr.mxu0 %v1973_v17  ;;  %v8642_v17 = vsel %vm1491_vm13, %v27594_v15, 0 }
 0x2f2   :  { %11503 = vrot.lane.b32.xlu1 %v29186_v60, %s28636_s13 }
 0x2f6   :  { %11501 = vrot.lane.b32.xlu1 %v29188_v1, %s28636_s13 }
 0x2f7   :  { %2358 = vmatmul.mubr.f32.vlgmr.msra.gmra.mrb[6].mxu0 %v29220_v7 }
 0x2f8   :  { %2367 = vmatpush1.msra.mxu0 %v1975_v18  ;;  %2430 = vmatprep.mubr.f32.mxu0 %v31016_v3 }
 0x2fa   :  { %12935 = vrot.lane.b32.xlu1 %v29171_v54, %s28637_s14 }
 0x2fe   :  { %12937 = vrot.lane.b32.xlu1 %v29188_v1, %s28637_s14 }
 0x2ff   :  { %2432 = vmatmul.mubr.f32.vlgmr.msra.gmra.mrb[6].mxu0 %v29220_v7 }
 0x300   :  { %2504 = vmatprep.mubr.f32.mxu0 %v31016_v3 }
 0x302   :  { %12941 = vrot.lane.b32.xlu1 %v29239_v5, %s28637_s14 }
 0x320   :  { %v29356_v50 = vpop.permute.xlu0 %8633  ;;  %v1484_v53 = vpop.permute.xlu1 %1483 }
 0x321   :  { %v1490_v57 = vsel %vm1485_vm14, %v29255_v13, %v1484_v53  ;;  %v1506_v2 = vsel %vm1495_vm15, %v1484_v53, 0 }
 0x322   :  { %v1504_v4 = vsel %vm1495_vm15, %v1490_v57, 0  ;;  %v2438_v33 = vand.u32 4294901760, %v1506_v2  ;;  %v29446_v57 = vsub.f32 %v2906_v34, %v29432_v28 }
 0x323   :  { %v29362_v36 = vand.u32 4294901760, %v1504_v4 }
 0x324   :  { %v2517_v37 = vsub.f32 %v1506_v2, %v2438_v33  ;;  %v29364_v51 = vpop.permute.xlu0 %10063  ;;  %2439 = vmatprep.subr.mxu0 %v2438_v33  ;;  %v29366_v62 = vpop.permute.xlu1 %4319 }
 0x325   :  { %v2523_v63 = vsub.f32 %v1504_v4, %v29362_v36  ;;  %2441 = vmatpush1.msra.mxu0 %v29362_v36  ;;  %v29451_v4 = vand.u32 4294901760, %v29438_v16 }
 0x326   :  { %2510 = vmatmul.mubr.f32.vlgmr.msra.gmra.mrb[8].mxu0 %v29235_v35  ;;  %v2518_v11 = vand.u32 4294901760, %v2517_v37 }
 0x327   :  { %v2524_v27 = vand.u32 4294901760, %v2523_v63  ;;  %2590 = vmatprep.mubr.f32.mxu0 %v31016_v3 }
 0x328   :  { %v29372_v29 = vpop.permute.xlu0 %10067  ;;  %v29374_v30 = vpop.permute.xlu1 %4321  ;;  %v2519_v31 = vsub.f32 %v2517_v37, %v2518_v11 }
 0x329   :  { %v2525_v32 = vsub.f32 %v2523_v63, %v2524_v27 }
 0x32a   :  { %v2520_v42 = vand.u32 4294901760, %v2519_v31  ;;  %v2988_v31 = vsub.f32 %v29438_v16, %v29451_v4 }
 0x32b   :  { %v2526_v43 = vand.u32 4294901760, %v2525_v32 }
 0x32c   :  { %v29376_v49 = vpop.permute.xlu0 %8629  ;;  %2521 = vmatprep.subr.mxu0 %v2520_v42  ;;  %v29378_v52 = vpop.permute.xlu1 %4325 }
 0x32d   :  { %2527 = vmatpush1.msra.mxu0 %v2526_v43 }
 0x32e   :  { %2592 = vmatmul.mubr.f32.vlgmr.msra.gmra.mrb[8].mxu0 %v29220_v7  ;;  %2600 = vmatprep.subr.mxu0 %v2517_v37 }
 0x32f   :  { %2603 = vmatpush1.msra.mxu0 %v2523_v63  ;;  %2666 = vmatprep.mubr.f32.mxu0 %v31016_v3 }
 0x330   :  { %v29382_v35 = vpop.permute.xlu0 %11499  ;;  %2676 = vmatprep.subr.mxu0 %v2438_v33  ;;  %v29384_v55 = vpop.permute.xlu1 %5755 }
 0x334   :  { %v29386_v6 = vpop.permute.xlu0 %10065  ;;  %v29388_v10 = vpop.permute.xlu1 %5757 }
 0x336   :  { %2669 = vmatmul.mubr.f32.vlgmr.msra.gmra.mrb[8].mxu0 %v29223_v8  ;;  %v2908_v8 = vsel %vm1495_vm15, %v29173_v56, 0  ;;  %v29419_v56 = vand.u32 4294901760, %v8642_v17 }
 0x337   :  { %2678 = vmatpush1.msra.mxu0 %v29362_v36  ;;  %2741 = vmatprep.mubr.f32.mxu0 %v31016_v3  ;;  %v29412_v18 = vand.u32 4294901760, %v2908_v8 }
 0x338   :  { %2754 = vmatprep.subr.mxu0 %v2518_v11  ;;  %v29393_v12 = vpop.permute.xlu0 %11505  ;;  %v29395_v13 = vpop.permute.xlu1 %5761  ;;  %v29441_v39 = vsub.f32 %v8642_v17, %v29419_v56  ;;  %v31012_v11 = vand.u32 4294901760, %v29446_v57 }
 0x339   :  { %31025 = vst [vmem:[#allocation5_spill] sm:$0xff] %v29393_v12  ;;  %v29435_v0 = vsub.f32 %v2908_v8, %v29412_v18 }
 0x33a   :  { %v3005_v61 = vsub.f32 %v29446_v57, %v31012_v11 }
 0x33b   :  { %v31013_v2 = vand.u32 4294901760, %v29435_v0 }
 0x33c   :  { %v29406_v21 = vpop.permute.xlu0 %12933  ;;  %v29408_v22 = vpop.permute.xlu1 %7191 }
 0x33e   :  { %2745 = vmatmul.mubr.f32.vlgmr.msra.gmra.mrb[8].mxu0 %v29226_v20 }
 0x33f   :  { %2758 = vmatpush1.msra.mxu0 %v2524_v27  ;;  %2821 = vmatprep.mubr.f32.mxu0 %v31016_v3 }
 0x340   :  { %2830 = vmatprep.subr.mxu0 %v2438_v33  ;;  %v12932_v24 = vpop.permute.xlu0 %12931  ;;  %v29421_v26 = vpop.permute.xlu1 %7193  ;;  %v29456_v33 = vand.u32 4294901760, %v29441_v39 }
 0x341   :  { %v29425_v20 = vsel %vm12943_vm1, %v12932_v24, %v29406_v21  ;;  %v29430_v58 = vsel %vm7199_vm2, %v29408_v22, %v29421_v26  ;;  %v29489_v24 = vand.u32 4294901760, %v2988_v31 }
 0x342   :  { %31026 = vst [vmem:[#allocation6_spill] sm:$0xff] %v29425_v20  ;;  %v8726_v42 = vsub.f32 %v29441_v39, %v29456_v33 }
 0x344   :  { %v29443_v53 = vpop.permute.xlu1 %7197 }
 0x346   :  { %2823 = vmatmul.mubr.f32.vlgmr.msra.gmra.mrb[8].mxu0 %v29220_v7 }
 0x347   :  { %2832 = vmatpush1.msra.mxu0 %v29362_v36  ;;  %2895 = vmatprep.mubr.f32.mxu0 %v31016_v3  ;;  %v2999_v36 = vsub.f32 %v29435_v0, %v31013_v2 }
 0x348   :  { %2919 = vmatprep.subr.mxu0 %v29412_v18  ;;  %v29459_v37 = vpop.permute.xlu1 %8627 }
 0x349   :  { %v8638_v63 = vsel %vm8635_vm3, %v29459_v37, %v29376_v49  ;;  %v3000_v34 = vand.u32 4294901760, %v2999_v36  ;;  %v3006_v36 = vand.u32 4294901760, %v3005_v61 }
 0x34a   :  { %v8648_v27 = vsel %vm1495_vm15, %v8638_v63, 0 }
 0x34b   :  { %v29471_v32 = vand.u32 4294901760, %v8648_v27 }
 0x34c   :  { %v8632_v43 = vpop.permute.xlu1 %8631 }
 0x34d   :  { %v29476_v14 = vsub.f32 %v8648_v27, %v29471_v32  ;;  %v8639_v15 = vsel %vm8635_vm3, %v29376_v49, %v8632_v43  ;;  %v29482_v8 = vsel %vm8635_vm3, %v8632_v43, %v29356_v50  ;;  %v29495_v49 = vand.u32 4294901760, %v8726_v42 }
 0x34e   :  { %v8650_v17 = vsel %vm1495_vm15, %v8639_v15, 0  ;;  %2897 = vmatmul.mubr.f32.vlgmr.msra.gmra.mrb[8].mxu0 %v29220_v7 }
 0x34f   :  { %v29491_v63 = vand.u32 4294901760, %v8650_v17  ;;  %2921 = vmatpush1.msra.mxu0 %v29432_v28  ;;  %2984 = vmatprep.mubr.f32.mxu0 %v31016_v3  ;;  %v9207_v27 = vand.u32 4294901760, %v29476_v14 }
 0x350   :  { %3001 = vmatprep.subr.mxu0 %v3000_v34  ;;  %v10062_v43 = vpop.permute.xlu1 %10061 }
 0x351   :  { %v9200_v15 = vsub.f32 %v8650_v17, %v29491_v63  ;;  %v29501_v7 = vsel %vm10071_vm4, %v10062_v43, %v29364_v51  ;;  %9122 = vmatprep.subr.mxu1 %v29491_v63  ;;  %v9208_v17 = vsub.f32 %v29476_v14, %v9207_v27 }
 0x352   :  { %2990 = vmatmul.mubr.f32.vlgmr.msra.gmra.mrb[4].mxu0 %v29489_v24  ;;  %9124 = vmatpush1.msra.mxu1 %v29471_v32 }
 0x353   :  { %3007 = vmatpush1.msra.mxu0 %v3006_v36  ;;  %9193 = vmatmul.mubr.f32.vlgmr.msra.gmra.mrb[0].mxu1 %v29495_v49  ;;  %v9201_v31 = vand.u32 4294901760, %v9200_v15  ;;  %v9209_v36 = vand.u32 4294901760, %v9208_v17 }
 0x354   :  { %3080 = vmatprep.subr.mxu0 %v29435_v0  ;;  %v10060_v42 = vpop.permute.xlu1 %10059  ;;  %3070 = vmatprep.mubr.f32.mxu0 %v31016_v3 }
 0x355   :  { %v29511_v34 = vsel %vm10071_vm4, %v10060_v42, %v10062_v43  ;;  %v9202_v11 = vsub.f32 %v9200_v15, %v9201_v31  ;;  %9273 = vmatprep.mubr.f32.mxu1 %v31016_v3 }
 0x357   :  { %v9203_v61 = vand.u32 4294901760, %v9202_v11 }
 0x358   :  { %v29514_v2 = vpop.permute.xlu1 %10069 }
 0x359   :  { %31027 = vst [vmem:[#allocation7_spill] sm:$0xff] %v29514_v2  ;;  %v29519_v40 = vsel %vm10071_vm4, %v29372_v29, %v29514_v2  ;;  %9204 = vmatprep.subr.mxu1 %v9203_v61  ;;  %v10075_v61 = vsel %vm10071_vm4, %v29386_v6, %v29372_v29  ;;  %v27595_v29 = vld [vmem:[%s31004_s4 + $0x18] sm:$0xf] }
 0x35a   :  { %31028 = vst [vmem:[#allocation8_spill] sm:$0xff] %v29519_v40  ;;  %3072 = vmatmul.mubr.f32.vlgmr.msra.gmra.mrb[4].mxu0 %v29416_v19  ;;  %9210 = vmatpush1.msra.mxu1 %v9209_v36 }
 0x35b   :  { %3083 = vmatpush1.msra.mxu0 %v29446_v57  ;;  %9275 = vmatmul.mubr.f32.vlgmr.msra.gmra.mrb[0].mxu1 %v29419_v56 }
 0x35c   :  { %3156 = vmatprep.subr.mxu0 %v29412_v18  ;;  %9283 = vmatprep.subr.mxu1 %v9200_v15  ;;  %v11498_v11 = vpop.permute.xlu1 %11497 }
 0x35d   :  { %9286 = vmatpush1.msra.mxu1 %v29476_v14  ;;  %v29528_v43 = vsel %vm11507_vm5, %v11498_v11, %v29382_v35  ;;  %3146 = vmatprep.mubr.f32.mxu0 %v31016_v3  ;;  %v31031_v14 = vand.u32 4294901760, %v29435_v0  ;;  %v2912_v0 = vsel %vm1495_vm15, %v29188_v1, 0  ;;  %v10074_v1 = vsel %vm10071_vm4, %v29364_v51, %v29386_v6 }
 0x35e   :  { %31029 = vst [vmem:[#allocation9_spill] sm:$0xff] %v29528_v43  ;;  %9359 = vmatprep.subr.mxu1 %v29491_v63  ;;  %9349 = vmatprep.mubr.f32.mxu1 %v31016_v3  ;;  %v10084_v6 = vsel %vm1495_vm15, %v10074_v1, 0 }
 0x360   :  { %v11496_v42 = vpop.permute.xlu1 %11495 }
 0x361   :  { %v29534_v17 = vsel %vm11507_vm5, %v11496_v42, %v11498_v11  ;;  %v10086_v11 = vsel %vm1495_vm15, %v10075_v61, 0 }
 0x362   :  { %31030 = vst [vmem:[#allocation10_spill] sm:$0xff] %v29534_v17  ;;  %3149 = vmatmul.mubr.f32.vlgmr.msra.gmra.mrb[4].mxu0 %v29438_v16  ;;  %v29567_v20 = vand.u32 4294901760, %v10086_v11 }
 0x363   :  { %3158 = vmatpush1.msra.mxu0 %v29432_v28  ;;  %9352 = vmatmul.mubr.f32.vlgmr.msra.gmra.mrb[0].mxu1 %v29441_v39 }
 0x364   :  { %3234 = vmatprep.subr.mxu0 %v31031_v14  ;;  %9361 = vmatpush1.msra.mxu1 %v29471_v32  ;;  %v29542_v15 = vpop.permute.xlu1 %11503  ;;  %v2910_v14 = vsel %vm1495_vm15, %v29171_v54, 0 }
 0x365   :  { %9437 = vmatprep.subr.mxu1 %v9201_v31  ;;  %v29550_v36 = vsel %vm11507_vm5, %v29542_v15, %v29393_v12  ;;  %3221 = vmatprep.mubr.f32.mxu0 %v31016_v3  ;;  %v29563_v31 = vand.u32 4294901760, %v2912_v0 }
 0x366   :  { %31032 = vst [vmem:[#allocation11_spill] sm:$0xff] %v29550_v36  ;;  %9424 = vmatprep.mubr.f32.mxu1 %v31016_v3  ;;  %v31033_v3 = vand.u32 4294901760, %v29446_v57  ;;  %v10078_v36 = vsel %vm1491_vm13, %v27595_v29, 0  ;;  %v29586_v57 = vand.u32 4294901760, %v2910_v14 }
 0x367   :  { %v3462_v51 = vsub.f32 %v2912_v0, %v29563_v31 }
 0x368   :  { %v29557_v42 = vpop.permute.xlu1 %11501 }
 0x369   :  { %v3463_v29 = vand.u32 4294901760, %v3462_v51 }
 0x36a   :  { %3225 = vmatmul.mubr.f32.vlgmr.msra.gmra.mrb[4].mxu0 %v29451_v4 }
 0x36b   :  { %3238 = vmatpush1.msra.mxu0 %v31033_v3  ;;  %9428 = vmatmul.mubr.f32.vlgmr.msra.gmra.mrb[0].mxu1 %v29456_v33  ;;  %v31035_v3 = vmov 0.0  }
 0x36c   :  { %3310 = vmatprep.subr.mxu0 %v29412_v18  ;;  %9441 = vmatpush1.msra.mxu1 %v9207_v27  ;;  %v29576_v61 = vpop.permute.xlu1 %12935  ;;  %v29592_v18 = vsub.f32 %v10086_v11, %v29567_v20  ;;  %v29594_v27 = vand.u32 4294901760, %v10078_v36  ;;  %14482 = vst.msk [vmem:[#allocation3] sm:$0xf] %vm14481_vm11, %v31035_v3  ;;  %vm14522_vm11 = vcmask 220164  }
 0x36d   :  { %9513 = vmatprep.subr.mxu1 %v29491_v63  ;;  %v29583_v54 = vsel %vm12943_vm1, %v29406_v21, %v29576_v61  ;;  %3301 = vmatprep.mubr.f32.mxu0 %v31035_v3  ;;  %v29597_v63 = vsub.f32 %v2910_v14, %v29586_v57  ;;  %v29599_v21 = vand.u32 4294901760, %v10084_v6  ;;  %14484 = vst.msk [vmem:[#allocation3 + $0x14] sm:$0xf] %vm14483_vm12, %v31035_v3  ;;  %vm14523_vm12 = vmor %vm14522_vm11, %vm14402_vm9 }
 0x36e   :  { %31034 = vst [vmem:[#allocation12_spill] sm:$0xff] %v29583_v54  ;;  %9504 = vmatprep.mubr.f32.mxu1 %v31035_v3  ;;  %v10637_v0 = vand.u32 4294901760, %v29592_v18  ;;  %v29606_v1 = vsub.f32 %v10078_v36, %v29594_v27 }
 0x36f   :  { %v3469_v11 = vand.u32 4294901760, %v29597_v63  ;;  %v10642_v14 = vsub.f32 %v10084_v6, %v29599_v21 }
 0x370   :  { %v10638_v54 = vsub.f32 %v29592_v18, %v10637_v0  ;;  %v29617_v36 = vand.u32 4294901760, %v29606_v1 }
 0x371   :  { %v3470_v12 = vsub.f32 %v29597_v63, %v3469_v11  ;;  %v10643_v17 = vand.u32 4294901760, %v10642_v14 }
 0x372   :  { %3303 = vmatmul.mubr.f32.vlgmr.msra.gmra.mrb[4].mxu0 %v29416_v19  ;;  %v10639_v43 = vand.u32 4294901760, %v10638_v54  ;;  %v10162_v6 = vsub.f32 %v29606_v1, %v29617_v36 }
 0x373   :  { %3312 = vmatpush1.msra.mxu0 %v29432_v28  ;;  %9506 = vmatmul.mubr.f32.vlgmr.msra.gmra.mrb[0].mxu1 %v29419_v56  ;;  %v3464_v28 = vsub.f32 %v3462_v51, %v3463_v29  ;;  %v3471_v40 = vand.u32 4294901760, %v3470_v12  ;;  %v11511_v12 = vsel %vm11507_vm5, %v29557_v42, %v29542_v15  ;;  %v27596_v15 = vld [vmem:[%s31004_s4 + $0x1c] sm:$0xf] }
 0x374   :  { %3384 = vmatprep.subr.mxu0 %v29563_v31  ;;  %9515 = vmatpush1.msra.mxu1 %v29471_v32  ;;  %v29629_v2 = vand.u32 4294901760, %v10162_v6 }
 0x375   :  { %10558 = vmatprep.subr.mxu1 %v29567_v20  ;;  %3375 = vmatprep.mubr.f32.mxu0 %v31035_v3  ;;  %v3465_v32 = vand.u32 4294901760, %v3464_v28  ;;  %v10644_v28 = vsub.f32 %v10642_v14, %v10643_v17 }
 0x376   :  { %9578 = vmatprep.mubr.f32.mxu1 %v31035_v3 }
 0x377   :  { %v10645_v54 = vand.u32 4294901760, %v10644_v28 }
 0x37a   :  { %3377 = vmatmul.mubr.f32.vlgmr.msra.gmra.mrb[4].mxu0 %v29416_v19 }
 0x37b   :  { %3386 = vmatpush1.msra.mxu0 %v29586_v57  ;;  %9580 = vmatmul.mubr.f32.vlgmr.msra.gmra.mrb[0].mxu1 %v29419_v56 }
 0x37c   :  { %3466 = vmatprep.subr.mxu0 %v3465_v32  ;;  %10560 = vmatpush1.msra.mxu1 %v29599_v21 }
 0x37d   :  { %10640 = vmatprep.subr.mxu1 %v10639_v43  ;;  %3449 = vmatprep.mubr.f32.mxu0 %v31035_v3 }
 0x37e   :  { %3455 = vmatmul.mubr.f32.vlgmr.msra.gmra.mrb[6].mxu0 %v29489_v24  ;;  %10623 = vmatprep.mubr.f32.mxu1 %v31035_v3 }
 0x37f   :  { %3472 = vmatpush1.msra.mxu0 %v3471_v40  ;;  %3535 = vmatprep.mubr.f32.mxu0 %v31035_v3  ;;  %v2916_v40 = vsel %vm1495_vm15, %v29239_v5, 0  ;;  %v11522_v5 = vsel %vm1495_vm15, %v11511_v12, 0 }
 0x380   :  { %3545 = vmatprep.subr.mxu0 %v3462_v51  ;;  %v29654_v43 = vand.u32 4294901760, %v2916_v40  ;;  %v2914_v51 = vsel %vm1495_vm15, %v29186_v60, 0  ;;  %v11510_v60 = vsel %vm11507_vm5, %v29382_v35, %v29557_v42 }
 0x383   :  { %10629 = vmatmul.mubr.f32.vlgmr.msra.gmra.mrb[0].mxu1 %v29629_v2 }
 0x384   :  { %10646 = vmatpush1.msra.mxu1 %v10645_v54  ;;  %10709 = vmatprep.mubr.f32.mxu1 %v31035_v3 }
 0x385   :  { %10719 = vmatprep.subr.mxu1 %v29592_v18  ;;  %v29661_v18 = vand.u32 4294901760, %v2914_v51 }
 0x386   :  { %3537 = vmatmul.mubr.f32.vlgmr.msra.gmra.mrb[6].mxu0 %v29416_v19 }
 0x387   :  { %3548 = vmatpush1.msra.mxu0 %v29597_v63  ;;  %3611 = vmatprep.mubr.f32.mxu0 %v31035_v3  ;;  %v29667_v63 = vsub.f32 %v2916_v40, %v29654_v43 }
 0x388   :  { %3621 = vmatprep.subr.mxu0 %v29563_v31 }
 0x38b   :  { %10711 = vmatmul.mubr.f32.vlgmr.msra.gmra.mrb[0].mxu1 %v29594_v27 }
 0x38c   :  { %10722 = vmatpush1.msra.mxu1 %v10642_v14  ;;  %10785 = vmatprep.mubr.f32.mxu1 %v31035_v3  ;;  %v11520_v14 = vsel %vm1495_vm15, %v11510_v60, 0 }
 0x38d   :  { %10795 = vmatprep.subr.mxu1 %v29567_v20 }
 0x38e   :  { %3614 = vmatmul.mubr.f32.vlgmr.msra.gmra.mrb[6].mxu0 %v29438_v16 }
 0x38f   :  { %3623 = vmatpush1.msra.mxu0 %v29586_v57  ;;  %3686 = vmatprep.mubr.f32.mxu0 %v31035_v3 }
 0x390   :  { %3699 = vmatprep.subr.mxu0 %v3463_v29  ;;  %v29669_v29 = vand.u32 4294901760, %v11522_v5 }
 0x392   :  { %v29685_v32 = vsub.f32 %v11522_v5, %v29669_v29 }
 0x393   :  { %10788 = vmatmul.mubr.f32.vlgmr.msra.gmra.mrb[0].mxu1 %v29606_v1 }
 0x394   :  { %10797 = vmatpush1.msra.mxu1 %v29599_v21  ;;  %10860 = vmatprep.mubr.f32.mxu1 %v31035_v3  ;;  %v12073_v6 = vand.u32 4294901760, %v29685_v32 }
 0x395   :  { %10873 = vmatprep.subr.mxu1 %v10637_v0  ;;  %v29679_v0 = vsub.f32 %v2914_v51, %v29661_v18 }
 0x396   :  { %3690 = vmatmul.mubr.f32.vlgmr.msra.gmra.mrb[6].mxu0 %v29451_v4 }
 0x397   :  { %3703 = vmatpush1.msra.mxu0 %v3469_v11  ;;  %3766 = vmatprep.mubr.f32.mxu0 %v31035_v3  ;;  %v3928_v11 = vand.u32 4294901760, %v29667_v63 }
 0x398   :  { %3775 = vmatprep.subr.mxu0 %v29563_v31  ;;  %v11514_v31 = vsel %vm1491_vm13, %v27596_v15, 0 }
 0x399   :  { %v29689_v35 = vand.u32 4294901760, %v11514_v31  ;;  %v3929_v42 = vsub.f32 %v29667_v63, %v3928_v11 }
 0x39b   :  { %10864 = vmatmul.mubr.f32.vlgmr.msra.gmra.mrb[0].mxu1 %v29617_v36  ;;  %v29699_v28 = vsub.f32 %v11514_v31, %v29689_v35  ;;  %v3930_v40 = vand.u32 4294901760, %v3929_v42 }
 0x39c   :  { %10877 = vmatpush1.msra.mxu1 %v10643_v17  ;;  %10940 = vmatprep.mubr.f32.mxu1 %v31035_v3  ;;  %v29693_v17 = vand.u32 4294901760, %v11520_v14 }
 0x39d   :  { %10949 = vmatprep.subr.mxu1 %v29567_v20  ;;  %v3934_v20 = vand.u32 4294901760, %v29679_v0  ;;  %v29715_v12 = vand.u32 4294901760, %v29699_v28 }
 0x39e   :  { %3768 = vmatmul.mubr.f32.vlgmr.msra.gmra.mrb[6].mxu0 %v29416_v19  ;;  %v29706_v54 = vsub.f32 %v11520_v14, %v29693_v17 }
 0x39f   :  { %3777 = vmatpush1.msra.mxu0 %v29586_v57  ;;  %3840 = vmatprep.mubr.f32.mxu0 %v31035_v3  ;;  %v3935_v57 = vsub.f32 %v29679_v0, %v3934_v20  ;;  %v11598_v60 = vsub.f32 %v29699_v28, %v29715_v12 }
 0x3a0   :  { %3849 = vmatprep.subr.mxu0 %v29654_v43  ;;  %v12079_v5 = vand.u32 4294901760, %v29706_v54 }
 0x3a1   :  { %v3936_v51 = vand.u32 4294901760, %v3935_v57  ;;  %v29729_v31 = vand.u32 4294901760, %v11598_v60 }
 0x3a3   :  { %10942 = vmatmul.mubr.f32.vlgmr.msra.gmra.mrb[0].mxu1 %v29594_v27 }
 0x3a4   :  { %10951 = vmatpush1.msra.mxu1 %v29599_v21  ;;  %11014 = vmatprep.mubr.f32.mxu1 %v31035_v3  ;;  %v12074_v21 = vsub.f32 %v29685_v32, %v12073_v6 }
 0x3a5   :  { %11994 = vmatprep.subr.mxu1 %v29669_v29 }
 0x3a6   :  { %3842 = vmatmul.mubr.f32.vlgmr.msra.gmra.mrb[6].mxu0 %v29416_v19  ;;  %v12075_v15 = vand.u32 4294901760, %v12074_v21  ;;  %v12938_v21 = vpop.permute.xlu1 %12937 }
 0x3a7   :  { %3851 = vmatpush1.msra.mxu0 %v29661_v18  ;;  %3914 = vmatprep.mubr.f32.mxu0 %v31035_v3 }
 0x3a8   :  { %3931 = vmatprep.subr.mxu0 %v3930_v40 }
 0x3aa   :  { %3920 = vmatmul.mubr.f32.vlgmr.msra.gmra.mrb[8].mxu0 %v29489_v24  ;;  %v12080_v24 = vsub.f32 %v29706_v54, %v12079_v5 }
 0x3ab   :  { %3937 = vmatpush1.msra.mxu0 %v3936_v51  ;;  %11016 = vmatmul.mubr.f32.vlgmr.msra.gmra.mrb[0].mxu1 %v29594_v27 }
 0x3ac   :  { %4010 = vmatprep.subr.mxu0 %v29667_v63  ;;  %11996 = vmatpush1.msra.mxu1 %v29693_v17  ;;  %v12081_v14 = vand.u32 4294901760, %v12080_v24  ;;  %v4329_v63 = vsel %vm4327_vm6, %v29307_v9, %v29366_v62 }
 0x3ad   :  { %12076 = vmatprep.subr.mxu1 %v12075_v15  ;;  %4000 = vmatprep.mubr.f32.mxu0 %v31035_v3  ;;  %v4338_v42 = vsel %vm1495_vm15, %v4329_v63, 0  ;;  %v29763_v15 = vpop.permute.xlu0 %12939  ;;  %v12946_v63 = vsel %vm12943_vm1, %v29576_v61, %v12938_v21 }
 0x3ae   :  { %12059 = vmatprep.mubr.f32.mxu1 %v31035_v3  ;;  %v29757_v40 = vand.u32 4294901760, %v4338_v42 }
 0x3b2   :  { %4002 = vmatmul.mubr.f32.vlgmr.msra.gmra.mrb[8].mxu0 %v29416_v19 }
 0x3b3   :  { %4013 = vmatpush1.msra.mxu0 %v29679_v0  ;;  %12065 = vmatmul.mubr.f32.vlgmr.msra.gmra.mrb[0].mxu1 %v29729_v31  ;;  %v27591_v0 = vld [vmem:[%s31004_s4 + $0x8] sm:$0xf] }
 0x3b4   :  { %4086 = vmatprep.subr.mxu0 %v29654_v43  ;;  %12082 = vmatpush1.msra.mxu1 %v12081_v14 }
 0x3b5   :  { %12155 = vmatprep.subr.mxu1 %v29685_v32  ;;  %4076 = vmatprep.mubr.f32.mxu0 %v31035_v3  ;;  %v27597_v32 = vld [vmem:[%s31004_s4 + $0x20] sm:$0xf] }
 0x3b6   :  { %12145 = vmatprep.mubr.f32.mxu1 %v31035_v3 }
 0x3ba   :  { %4079 = vmatmul.mubr.f32.vlgmr.msra.gmra.mrb[8].mxu0 %v29438_v16  ;;  %v4328_v16 = vsel %vm4327_vm6, %v29312_v23, %v29307_v9  ;;  %v12947_v23 = vsel %vm12943_vm1, %v12938_v21, %v29763_v15 }
 0x3bb   :  { %4088 = vmatpush1.msra.mxu0 %v29661_v18  ;;  %12147 = vmatmul.mubr.f32.vlgmr.msra.gmra.mrb[0].mxu1 %v29689_v35  ;;  %v4336_v57 = vsel %vm1495_vm15, %v4328_v16, 0 }
 0x3bc   :  { %4164 = vmatprep.subr.mxu0 %v3928_v11  ;;  %12158 = vmatpush1.msra.mxu1 %v29706_v54  ;;  %v4334_v11 = vsel %vm1491_vm13, %v27591_v0, 0  ;;  %v29767_v9 = vand.u32 4294901760, %v4336_v57  ;;  %v12950_v0 = vsel %vm1491_vm13, %v27597_v32, 0  ;;  %v12956_v54 = vsel %vm1495_vm15, %v12946_v63, 0 }
 0x3bd   :  { %12231 = vmatprep.subr.mxu1 %v29669_v29  ;;  %4151 = vmatprep.mubr.f32.mxu0 %v31035_v3  ;;  %v29760_v51 = vand.u32 4294901760, %v4334_v11 }
 0x3be   :  { %12221 = vmatprep.mubr.f32.mxu1 %v31035_v3  ;;  %v29783_v60 = vsub.f32 %v4336_v57, %v29767_v9 }
 0x3c0   :  { %v4434_v16 = vand.u32 4294901760, %v29783_v60 }
 0x3c2   :  { %4155 = vmatmul.mubr.f32.vlgmr.msra.gmra.mrb[8].mxu0 %v29451_v4  ;;  %v29775_v4 = vsub.f32 %v4338_v42, %v29757_v40  ;;  %v29816_v42 = vand.u32 4294901760, %v12950_v0 }
 0x3c3   :  { %4168 = vmatpush1.msra.mxu0 %v3934_v20  ;;  %12224 = vmatmul.mubr.f32.vlgmr.msra.gmra.mrb[0].mxu1 %v29699_v28  ;;  %v29779_v20 = vsub.f32 %v4334_v11, %v29760_v51  ;;  %v29819_v11 = vand.u32 4294901760, %v12956_v54 }
 0x3c4   :  { %4240 = vmatprep.subr.mxu0 %v29654_v43  ;;  %12233 = vmatpush1.msra.mxu1 %v29693_v17  ;;  %v12958_v43 = vsel %vm1495_vm15, %v12947_v23, 0 }
 0x3c5   :  { %12309 = vmatprep.subr.mxu1 %v12073_v6  ;;  %4231 = vmatprep.mubr.f32.mxu0 %v31035_v3  ;;  %v4428_v6 = vand.u32 4294901760, %v29775_v4  ;;  %v29791_v24 = vand.u32 4294901760, %v29779_v20  ;;  %v29793_v14 = vand.u32 4294901760, %v12958_v43  ;;  %v13514_v32 = vsub.f32 %v12956_v54, %v29819_v11 }
 0x3c6   :  { %12296 = vmatprep.mubr.f32.mxu1 %v31035_v3 }
 0x3c7   :  { %v4418_v61 = vsub.f32 %v29779_v20, %v29791_v24 }
 0x3c9   :  { %v29822_v21 = vand.u32 4294901760, %v4418_v61 }
 0x3ca   :  { %4233 = vmatmul.mubr.f32.vlgmr.msra.gmra.mrb[8].mxu0 %v29416_v19 }
 0x3cb   :  { %4242 = vmatpush1.msra.mxu0 %v29661_v18  ;;  %12300 = vmatmul.mubr.f32.vlgmr.msra.gmra.mrb[0].mxu1 %v29715_v12  ;;  %v4429_v18 = vsub.f32 %v29775_v4, %v4428_v6 }
 0x3cc   :  { %4349 = vmatprep.subr.mxu0 %v29757_v40  ;;  %12313 = vmatpush1.msra.mxu1 %v12079_v5  ;;  %v29814_v5 = vsub.f32 %v12958_v43, %v29793_v14  ;;  %v29828_v43 = vsub.f32 %v12950_v0, %v29816_v42 }
 0x3cd   :  { %12385 = vmatprep.subr.mxu1 %v29669_v29  ;;  %4305 = vmatprep.mubr.f32.mxu0 %v31035_v3  ;;  %v4435_v29 = vsub.f32 %v29783_v60, %v4434_v16  ;;  %v4430_v57 = vand.u32 4294901760, %v4429_v18 }
 0x3ce   :  { %12376 = vmatprep.mubr.f32.mxu1 %v31035_v3  ;;  %v13509_v23 = vand.u32 4294901760, %v29814_v5  ;;  %v29839_v0 = vand.u32 4294901760, %v29828_v43 }
 0x3d0   :  { %v13510_v63 = vsub.f32 %v29814_v5, %v13509_v23  ;;  %v13034_v61 = vsub.f32 %v29828_v43, %v29839_v0 }
 0x3d2   :  { %4307 = vmatmul.mubr.f32.vlgmr.msra.gmra.mrb[8].mxu0 %v29416_v19  ;;  %v4436_v19 = vand.u32 4294901760, %v4435_v29  ;;  %v13511_v18 = vand.u32 4294901760, %v13510_v63  ;;  %v29849_v29 = vand.u32 4294901760, %v13034_v61 }
 0x3d3   :  { %4351 = vmatpush1.msra.mxu0 %v29767_v9  ;;  %12378 = vmatmul.mubr.f32.vlgmr.msra.gmra.mrb[0].mxu1 %v29689_v35 }
 0x3d4   :  { %4431 = vmatprep.subr.mxu0 %v4430_v57  ;;  %12387 = vmatpush1.msra.mxu1 %v29693_v17  ;;  %v13515_v17 = vand.u32 4294901760, %v13514_v32 }
 0x3d5   :  { %13430 = vmatprep.subr.mxu1 %v29793_v14  ;;  %4414 = vmatprep.mubr.f32.mxu0 %v31035_v3 }
 0x3d6   :  { %4420 = vmatmul.mubr.f32.vlgmr.msra.gmra.mrb[4].mxu0 %v29822_v21  ;;  %12450 = vmatprep.mubr.f32.mxu1 %v31035_v3  ;;  %v13516_v54 = vsub.f32 %v13514_v32, %v13515_v17 }
 0x3d7   :  { %4437 = vmatpush1.msra.mxu0 %v4436_v19  ;;  %4500 = vmatprep.mubr.f32.mxu0 %v31035_v3  ;;  %v4330_v19 = vsel %vm4327_vm6, %v29366_v62, %v29374_v30 }
 0x3d8   :  { %4510 = vmatprep.subr.mxu0 %v29775_v4  ;;  %v13517_v57 = vand.u32 4294901760, %v13516_v54 }
 0x3db   :  { %12452 = vmatmul.mubr.f32.vlgmr.msra.gmra.mrb[0].mxu1 %v29689_v35 }
 0x3dc   :  { %13432 = vmatpush1.msra.mxu1 %v29819_v11  ;;  %13495 = vmatprep.mubr.f32.mxu1 %v31035_v3 }
 0x3dd   :  { %13512 = vmatprep.subr.mxu1 %v13511_v18 }
 0x3de   :  { %4502 = vmatmul.mubr.f32.vlgmr.msra.gmra.mrb[4].mxu0 %v29760_v51 }
 0x3df   :  { %4513 = vmatpush1.msra.mxu0 %v29783_v60  ;;  %4576 = vmatprep.mubr.f32.mxu0 %v31035_v3  ;;  %v4331_v60 = vsel %vm4327_vm6, %v29374_v30, %v29320_v25 }
 0x3e0   :  { %4586 = vmatprep.subr.mxu0 %v29757_v40  ;;  %v4342_v63 = vsel %vm1495_vm15, %v4331_v60, 0 }
 0x3e1   :  { %v4813_v18 = vand.u32 4294901760, %v4342_v63 }
 0x3e3   :  { %13501 = vmatmul.mubr.f32.vlgmr.msra.gmra.mrb[0].mxu1 %v29849_v29  ;;  %v4892_v30 = vsub.f32 %v4342_v63, %v4813_v18 }
 0x3e4   :  { %13518 = vmatpush1.msra.mxu1 %v13517_v57  ;;  %13581 = vmatprep.mubr.f32.mxu1 %v31035_v3 }
 0x3e5   :  { %13591 = vmatprep.subr.mxu1 %v29814_v5  ;;  %v4340_v5 = vsel %vm1495_vm15, %v4330_v19, 0 }
 0x3e6   :  { %4579 = vmatmul.mubr.f32.vlgmr.msra.gmra.mrb[4].mxu0 %v29779_v20  ;;  %v4815_v62 = vand.u32 4294901760, %v4340_v5 }
 0x3e7   :  { %4588 = vmatpush1.msra.mxu0 %v29767_v9  ;;  %4651 = vmatprep.mubr.f32.mxu0 %v31035_v3 }
 0x3e8   :  { %4664 = vmatprep.subr.mxu0 %v4428_v6  ;;  %v4898_v4 = vsub.f32 %v4340_v5, %v4815_v62  ;;  %v4893_v6 = vand.u32 4294901760, %v4892_v30 }
 0x3eb   :  { %13583 = vmatmul.mubr.f32.vlgmr.msra.gmra.mrb[0].mxu1 %v29816_v42 }
 0x3ec   :  { %13594 = vmatpush1.msra.mxu1 %v13514_v32  ;;  %13657 = vmatprep.mubr.f32.mxu1 %v31035_v3 }
 0x3ed   :  { %13667 = vmatprep.subr.mxu1 %v29793_v14 }
 0x3ee   :  { %4655 = vmatmul.mubr.f32.vlgmr.msra.gmra.mrb[4].mxu0 %v29791_v24 }
 0x3ef   :  { %4668 = vmatpush1.msra.mxu0 %v4434_v16  ;;  %4731 = vmatprep.mubr.f32.mxu0 %v31035_v3  ;;  %v4899_v16 = vand.u32 4294901760, %v4898_v4 }
 0x3f0   :  { %4740 = vmatprep.subr.mxu0 %v29757_v40  ;;  %v4894_v40 = vsub.f32 %v4892_v30, %v4893_v6 }
 0x3f1   :  { %v4900_v32 = vsub.f32 %v4898_v4, %v4899_v16 }
 0x3f3   :  { %13660 = vmatmul.mubr.f32.vlgmr.msra.gmra.mrb[0].mxu1 %v29828_v43 }
 0x3f4   :  { %13669 = vmatpush1.msra.mxu1 %v29819_v11  ;;  %13732 = vmatprep.mubr.f32.mxu1 %v31035_v3 }
 0x3f5   :  { %13745 = vmatprep.subr.mxu1 %v13509_v23  ;;  %v4895_v23 = vand.u32 4294901760, %v4894_v40 }
 0x3f6   :  { %4733 = vmatmul.mubr.f32.vlgmr.msra.gmra.mrb[4].mxu0 %v29760_v51 }
 0x3f7   :  { %4742 = vmatpush1.msra.mxu0 %v29767_v9  ;;  %4805 = vmatprep.mubr.f32.mxu0 %v31035_v3  ;;  %v4901_v9 = vand.u32 4294901760, %v4900_v32 }
 0x3f8   :  { %4814 = vmatprep.subr.mxu0 %v4813_v18 }
 0x3fb   :  { %13736 = vmatmul.mubr.f32.vlgmr.msra.gmra.mrb[0].mxu1 %v29839_v0 }
 0x3fc   :  { %13749 = vmatpush1.msra.mxu1 %v13515_v17  ;;  %13812 = vmatprep.mubr.f32.mxu1 %v31035_v3 }
 0x3fd   :  { %13821 = vmatprep.subr.mxu1 %v29793_v14  ;;  %v4332_v14 = vsel %vm4327_vm6, %v29320_v25, %v29378_v52 }
 0x3fe   :  { %4807 = vmatmul.mubr.f32.vlgmr.msra.gmra.mrb[4].mxu0 %v29760_v51  ;;  %v4344_v17 = vsel %vm1495_vm15, %v4332_v14, 0 }
 0x3ff   :  { %4816 = vmatpush1.msra.mxu0 %v4815_v62  ;;  %4879 = vmatprep.mubr.f32.mxu0 %v31035_v3  ;;  %v5280_v54 = vand.u32 4294901760, %v4344_v17 }
 0x400   :  { %4896 = vmatprep.subr.mxu0 %v4895_v23 }
 0x401   :  { %v5363_v60 = vsub.f32 %v4344_v17, %v5280_v54 }
 0x402   :  { %4885 = vmatmul.mubr.f32.vlgmr.msra.gmra.mrb[6].mxu0 %v29822_v21 }
 0x403   :  { %4902 = vmatpush1.msra.mxu0 %v4901_v9  ;;  %13814 = vmatmul.mubr.f32.vlgmr.msra.gmra.mrb[0].mxu1 %v29816_v42  ;;  %v5364_v25 = vand.u32 4294901760, %v5363_v60 }
 0x404   :  { %4975 = vmatprep.subr.mxu0 %v4892_v30  ;;  %13823 = vmatpush1.msra.mxu1 %v29819_v11  ;;  %v4346_v11 = vsel %vm1495_vm15, %v29378_v52, 0  ;;  %v5764_v30 = vsel %vm5763_vm8, %v29333_v41, %v29326_v38 }
 0x405   :  { %4965 = vmatprep.mubr.f32.mxu0 %v31035_v3  ;;  %13886 = vmatprep.mubr.f32.mxu1 %v31035_v3  ;;  %v5278_v61 = vand.u32 4294901760, %v4346_v11  ;;  %v5365_v63 = vsub.f32 %v5363_v60, %v5364_v25 }
 0x407   :  { %v5357_v57 = vsub.f32 %v4346_v11, %v5278_v61 }
 0x409   :  { %v5358_v19 = vand.u32 4294901760, %v5357_v57 }
 0x40a   :  { %4967 = vmatmul.mubr.f32.vlgmr.msra.gmra.mrb[6].mxu0 %v29760_v51 }
 0x40b   :  { %4978 = vmatpush1.msra.mxu0 %v4898_v4  ;;  %5041 = vmatprep.mubr.f32.mxu0 %v31035_v3  ;;  %v5359_v52 = vsub.f32 %v5357_v57, %v5358_v19 }
 0x40c   :  { %5051 = vmatprep.subr.mxu0 %v4813_v18  ;;  %13888 = vmatmul.mubr.f32.vlgmr.msra.gmra.mrb[0].mxu1 %v29816_v42 }
 0x40d   :  { %14638 = vmatprep.mubr.f32.mxu1 %v31035_v3  ;;  %v5360_v5 = vand.u32 4294901760, %v5359_v52 }
 0x412   :  { %5044 = vmatmul.mubr.f32.vlgmr.msra.gmra.mrb[6].mxu0 %v29779_v20 }
 0x413   :  { %5053 = vmatpush1.msra.mxu0 %v4815_v62  ;;  %5116 = vmatprep.mubr.f32.mxu0 %v31035_v3 }
 0x414   :  { %5129 = vmatprep.subr.mxu0 %v4893_v6  ;;  %v5772_v6 = vsel %vm1495_vm15, %v5764_v30, 0 }
 0x415   :  { %v5786_v32 = vand.u32 4294901760, %v5772_v6 }
 0x41a   :  { %5120 = vmatmul.mubr.f32.vlgmr.msra.gmra.mrb[6].mxu0 %v29791_v24 }
 0x41b   :  { %5133 = vmatpush1.msra.mxu0 %v4899_v16  ;;  %5196 = vmatprep.mubr.f32.mxu0 %v31035_v3 }
 0x41c   :  { %5205 = vmatprep.subr.mxu0 %v4813_v18  ;;  %v5366_v18 = vand.u32 4294901760, %v5365_v63 }
 0x422   :  { %5198 = vmatmul.mubr.f32.vlgmr.msra.gmra.mrb[6].mxu0 %v29760_v51 }
 0x423   :  { %5207 = vmatpush1.msra.mxu0 %v4815_v62  ;;  %5270 = vmatprep.mubr.f32.mxu0 %v31035_v3  ;;  %v27592_v62 = vld [vmem:[%s31004_s4 + $0xc] sm:$0xf] }
 0x424   :  { %5279 = vmatprep.subr.mxu0 %v5278_v61 }
 0x42a   :  { %5272 = vmatmul.mubr.f32.vlgmr.msra.gmra.mrb[6].mxu0 %v29760_v51 }
 0x42b   :  { %5281 = vmatpush1.msra.mxu0 %v5280_v54  ;;  %5344 = vmatprep.mubr.f32.mxu0 %v31035_v3 }
 0x42c   :  { %5361 = vmatprep.subr.mxu0 %v5360_v5 }
 0x42e   :  { %5350 = vmatmul.mubr.f32.vlgmr.msra.gmra.mrb[8].mxu0 %v29822_v21  ;;  %v5765_v21 = vsel %vm5763_vm8, %v29326_v38, %v29384_v55  ;;  %v5869_v38 = vsub.f32 %v5772_v6, %v5786_v32  ;;  %v5768_v6 = vsel %vm5763_vm8, %v29338_v44, %v29395_v13 }
 0x42f   :  { %5367 = vmatpush1.msra.mxu0 %v5366_v18  ;;  %5430 = vmatprep.mubr.f32.mxu0 %v31035_v3  ;;  %v5774_v4 = vsel %vm1495_vm15, %v5765_v21, 0 }
 0x430   :  { %5440 = vmatprep.subr.mxu0 %v5357_v57  ;;  %v5784_v16 = vand.u32 4294901760, %v5774_v4 }
 0x432   :  { %v5863_v23 = vsub.f32 %v5774_v4, %v5784_v16 }
 0x434   :  { %v5864_v41 = vand.u32 4294901760, %v5863_v23 }
 0x436   :  { %5432 = vmatmul.mubr.f32.vlgmr.msra.gmra.mrb[8].mxu0 %v29760_v51  ;;  %v5865_v11 = vsub.f32 %v5863_v23, %v5864_v41 }
 0x437   :  { %5443 = vmatpush1.msra.mxu0 %v5363_v60  ;;  %5506 = vmatprep.mubr.f32.mxu0 %v31035_v3 }
 0x438   :  { %5516 = vmatprep.subr.mxu0 %v5278_v61  ;;  %v5866_v57 = vand.u32 4294901760, %v5865_v11 }
 0x43e   :  { %5509 = vmatmul.mubr.f32.vlgmr.msra.gmra.mrb[8].mxu0 %v29779_v20  ;;  %v5770_v20 = vsel %vm1491_vm13, %v27592_v62, 0 }
 0x43f   :  { %5518 = vmatpush1.msra.mxu0 %v5280_v54  ;;  %5581 = vmatprep.mubr.f32.mxu0 %v31035_v3  ;;  %v29928_v40 = vand.u32 4294901760, %v5770_v20 }
 0x440   :  { %5594 = vmatprep.subr.mxu0 %v5358_v19 }
 0x441   :  { %v29932_v9 = vsub.f32 %v5770_v20, %v29928_v40 }
 0x443   :  { %v29936_v14 = vand.u32 4294901760, %v29932_v9 }
 0x445   :  { %v5854_v17 = vsub.f32 %v29932_v9, %v29936_v14 }
 0x446   :  { %5585 = vmatmul.mubr.f32.vlgmr.msra.gmra.mrb[8].mxu0 %v29791_v24  ;;  %v5870_v24 = vand.u32 4294901760, %v5869_v38 }
 0x447   :  { %5598 = vmatpush1.msra.mxu0 %v5364_v25  ;;  %5661 = vmatprep.mubr.f32.mxu0 %v31035_v3  ;;  %v29942_v60 = vand.u32 4294901760, %v5854_v17 }
 0x448   :  { %5670 = vmatprep.subr.mxu0 %v5278_v61  ;;  %v5871_v61 = vsub.f32 %v5869_v38, %v5870_v24 }
 0x44a   :  { %v5872_v19 = vand.u32 4294901760, %v5871_v61 }
 0x44e   :  { %5663 = vmatmul.mubr.f32.vlgmr.msra.gmra.mrb[8].mxu0 %v29760_v51 }
 0x44f   :  { %5672 = vmatpush1.msra.mxu0 %v5280_v54  ;;  %5735 = vmatprep.mubr.f32.mxu0 %v31035_v3  ;;  %v5766_v54 = vsel %vm5763_vm8, %v29384_v55, %v29388_v10 }
 0x450   :  { %5785 = vmatprep.subr.mxu0 %v5784_v16  ;;  %v5776_v52 = vsel %vm1495_vm15, %v5766_v54, 0 }
 0x451   :  { %v6251_v5 = vand.u32 4294901760, %v5776_v52 }
 0x453   :  { %v6334_v21 = vsub.f32 %v5776_v52, %v6251_v5 }
 0x455   :  { %v6335_v55 = vand.u32 4294901760, %v6334_v21 }
 0x456   :  { %5737 = vmatmul.mubr.f32.vlgmr.msra.gmra.mrb[8].mxu0 %v29760_v51  ;;  %v5767_v51 = vsel %vm5763_vm8, %v29388_v10, %v29338_v44 }
 0x457   :  { %5787 = vmatpush1.msra.mxu0 %v5786_v32  ;;  %5850 = vmatprep.mubr.f32.mxu0 %v31035_v3  ;;  %v5778_v25 = vsel %vm1495_vm15, %v5767_v51, 0  ;;  %v6336_v30 = vsub.f32 %v6334_v21, %v6335_v55  ;;  %v7200_v51 = vsel %vm7199_vm2, %v29348_v46, %v29346_v45 }
 0x458   :  { %5867 = vmatprep.subr.mxu0 %v5866_v57  ;;  %v6249_v63 = vand.u32 4294901760, %v5778_v25 }
 0x459   :  { %v6337_v20 = vand.u32 4294901760, %v6336_v30 }
 0x45a   :  { %5856 = vmatmul.mubr.f32.vlgmr.msra.gmra.mrb[4].mxu0 %v29942_v60  ;;  %v6328_v18 = vsub.f32 %v5778_v25, %v6249_v63  ;;  %v7208_v25 = vsel %vm1495_vm15, %v7200_v51, 0 }
 0x45b   :  { %5873 = vmatpush1.msra.mxu0 %v5872_v19  ;;  %5936 = vmatprep.mubr.f32.mxu0 %v31035_v3  ;;  %v7201_v19 = vsel %vm7199_vm2, %v29346_v45, %v29408_v22  ;;  %v7222_v22 = vand.u32 4294901760, %v7208_v25 }
 0x45c   :  { %5946 = vmatprep.subr.mxu0 %v5863_v23  ;;  %v6329_v62 = vand.u32 4294901760, %v6328_v18  ;;  %v7210_v54 = vsel %vm1495_vm15, %v7201_v19, 0 }
 0x45d   :  { %v7220_v52 = vand.u32 4294901760, %v7210_v54  ;;  %v7305_v45 = vsub.f32 %v7208_v25, %v7222_v22 }
 0x45e   :  { %v6330_v10 = vsub.f32 %v6328_v18, %v6329_v62 }
 0x460   :  { %v6331_v4 = vand.u32 4294901760, %v6330_v10 }
 0x462   :  { %5938 = vmatmul.mubr.f32.vlgmr.msra.gmra.mrb[4].mxu0 %v29928_v40 }
 0x463   :  { %5949 = vmatpush1.msra.mxu0 %v5869_v38  ;;  %6012 = vmatprep.mubr.f32.mxu0 %v31035_v3 }
 0x464   :  { %6022 = vmatprep.subr.mxu0 %v5784_v16 }
 0x46a   :  { %6015 = vmatmul.mubr.f32.vlgmr.msra.gmra.mrb[4].mxu0 %v29932_v9 }
 0x46b   :  { %6024 = vmatpush1.msra.mxu0 %v5786_v32  ;;  %6087 = vmatprep.mubr.f32.mxu0 %v31035_v3 }
 0x46c   :  { %6100 = vmatprep.subr.mxu0 %v5864_v41 }
 0x472   :  { %6091 = vmatmul.mubr.f32.vlgmr.msra.gmra.mrb[4].mxu0 %v29936_v14 }
 0x473   :  { %6104 = vmatpush1.msra.mxu0 %v5870_v24  ;;  %6167 = vmatprep.mubr.f32.mxu0 %v31035_v3 }
 0x474   :  { %6176 = vmatprep.subr.mxu0 %v5784_v16  ;;  %v5782_v16 = vsel %vm1495_vm15, %v29395_v13, 0 }
 0x475   :  { %v6714_v23 = vand.u32 4294901760, %v5782_v16 }
 0x477   :  { %v6793_v41 = vsub.f32 %v5782_v16, %v6714_v23  ;;  %v7212_v16 = vsel %vm1495_vm15, %v29430_v58, 0 }
 0x479   :  { %v6794_v11 = vand.u32 4294901760, %v6793_v41 }
 0x47a   :  { %6169 = vmatmul.mubr.f32.vlgmr.msra.gmra.mrb[4].mxu0 %v29928_v40 }
 0x47b   :  { %6178 = vmatpush1.msra.mxu0 %v5786_v32  ;;  %6241 = vmatprep.mubr.f32.mxu0 %v31035_v3  ;;  %v5780_v32 = vsel %vm1495_vm15, %v5768_v6, 0  ;;  %v6795_v13 = vsub.f32 %v6793_v41, %v6794_v11 }
 0x47c   :  { %6250 = vmatprep.subr.mxu0 %v6249_v63  ;;  %v6716_v38 = vand.u32 4294901760, %v5780_v32 }
 0x47d   :  { %v6796_v61 = vand.u32 4294901760, %v6795_v13 }
 0x47e   :  { %v6799_v24 = vsub.f32 %v5780_v32, %v6716_v38 }
 0x480   :  { %v6800_v44 = vand.u32 4294901760, %v6799_v24 }
 0x482   :  { %6243 = vmatmul.mubr.f32.vlgmr.msra.gmra.mrb[4].mxu0 %v29928_v40  ;;  %v6801_v17 = vsub.f32 %v6799_v24, %v6800_v44 }
 0x483   :  { %6252 = vmatpush1.msra.mxu0 %v6251_v5  ;;  %6315 = vmatprep.mubr.f32.mxu0 %v31035_v3 }
 0x484   :  { %6332 = vmatprep.subr.mxu0 %v6331_v4  ;;  %v6802_v57 = vand.u32 4294901760, %v6801_v17  ;;  %v7204_v17 = vsel %vm7199_vm2, %v29350_v59, %v29443_v53 }
 0x486   :  { %6321 = vmatmul.mubr.f32.vlgmr.msra.gmra.mrb[6].mxu0 %v29942_v60 }
 0x487   :  { %6338 = vmatpush1.msra.mxu0 %v6337_v20  ;;  %6401 = vmatprep.mubr.f32.mxu0 %v31035_v3 }
 0x488   :  { %6411 = vmatprep.subr.mxu0 %v6328_v18 }
 0x48e   :  { %6403 = vmatmul.mubr.f32.vlgmr.msra.gmra.mrb[6].mxu0 %v29928_v40 }
 0x48f   :  { %6414 = vmatpush1.msra.mxu0 %v6334_v21  ;;  %6477 = vmatprep.mubr.f32.mxu0 %v31035_v3 }
 0x490   :  { %6487 = vmatprep.subr.mxu0 %v6249_v63 }
 0x496   :  { %6480 = vmatmul.mubr.f32.vlgmr.msra.gmra.mrb[6].mxu0 %v29932_v9 }
 0x497   :  { %6489 = vmatpush1.msra.mxu0 %v6251_v5  ;;  %6552 = vmatprep.mubr.f32.mxu0 %v31035_v3 }
 0x498   :  { %6565 = vmatprep.subr.mxu0 %v6329_v62 }
 0x49e   :  { %6556 = vmatmul.mubr.f32.vlgmr.msra.gmra.mrb[6].mxu0 %v29936_v14 }
 0x49f   :  { %6569 = vmatpush1.msra.mxu0 %v6335_v55  ;;  %6632 = vmatprep.mubr.f32.mxu0 %v31035_v3 }
 0x4a0   :  { %6641 = vmatprep.subr.mxu0 %v6249_v63 }
 0x4a6   :  { %6634 = vmatmul.mubr.f32.vlgmr.msra.gmra.mrb[6].mxu0 %v29928_v40 }
 0x4a7   :  { %6643 = vmatpush1.msra.mxu0 %v6251_v5  ;;  %6706 = vmatprep.mubr.f32.mxu0 %v31035_v3  ;;  %v7299_v5 = vsub.f32 %v7210_v54, %v7220_v52 }
 0x4a8   :  { %6715 = vmatprep.subr.mxu0 %v6714_v23 }
 0x4a9   :  { %v7300_v46 = vand.u32 4294901760, %v7299_v5 }
 0x4ab   :  { %v7301_v62 = vsub.f32 %v7299_v5, %v7300_v46 }
 0x4ad   :  { %v7302_v30 = vand.u32 4294901760, %v7301_v62 }
 0x4ae   :  { %6708 = vmatmul.mubr.f32.vlgmr.msra.gmra.mrb[6].mxu0 %v29928_v40 }
 0x4af   :  { %6717 = vmatpush1.msra.mxu0 %v6716_v38  ;;  %6780 = vmatprep.mubr.f32.mxu0 %v31035_v3 }
 0x4b0   :  { %6797 = vmatprep.subr.mxu0 %v6796_v61  ;;  %v7218_v61 = vsel %vm1495_vm15, %v29443_v53, 0 }
 0x4b1   :  { %v8150_v19 = vand.u32 4294901760, %v7218_v61 }
 0x4b2   :  { %6786 = vmatmul.mubr.f32.vlgmr.msra.gmra.mrb[8].mxu0 %v29942_v60  ;;  %v27593_v60 = vld [vmem:[%s31004_s4 + $0x10] sm:$0xf] }
 0x4b3   :  { %6803 = vmatpush1.msra.mxu0 %v6802_v57  ;;  %6866 = vmatprep.mubr.f32.mxu0 %v31035_v3  ;;  %v7216_v57 = vsel %vm1495_vm15, %v7204_v17, 0  ;;  %v8229_v51 = vsub.f32 %v7218_v61, %v8150_v19 }
 0x4b4   :  { %6876 = vmatprep.subr.mxu0 %v6793_v41 }
 0x4ba   :  { %6868 = vmatmul.mubr.f32.vlgmr.msra.gmra.mrb[8].mxu0 %v29928_v40 }
 0x4bb   :  { %6879 = vmatpush1.msra.mxu0 %v6799_v24  ;;  %6942 = vmatprep.mubr.f32.mxu0 %v31035_v3 }
 0x4bc   :  { %6952 = vmatprep.subr.mxu0 %v6714_v23 }
 0x4c2   :  { %6945 = vmatmul.mubr.f32.vlgmr.msra.gmra.mrb[8].mxu0 %v29932_v9  ;;  %v7206_v9 = vsel %vm1491_vm13, %v27593_v60, 0  ;;  %v8152_v60 = vand.u32 4294901760, %v7216_v57  ;;  %vm14517_vm13 = vcmask 1043608  }
 0x4c3   :  { %6954 = vmatpush1.msra.mxu0 %v6716_v38  ;;  %7017 = vmatprep.mubr.f32.mxu0 %v31035_v3  ;;  %v30002_v63 = vand.u32 4294901760, %v7206_v9 }
 0x4c4   :  { %7030 = vmatprep.subr.mxu0 %v6794_v11  ;;  %v8235_v54 = vsub.f32 %v7216_v57, %v8152_v60 }
 0x4c5   :  { %v30006_v18 = vsub.f32 %v7206_v9, %v30002_v63  ;;  %v8230_v9 = vand.u32 4294901760, %v8229_v51 }
 0x4c7   :  { %v30010_v21 = vand.u32 4294901760, %v30006_v18  ;;  %v8231_v53 = vsub.f32 %v8229_v51, %v8230_v9 }
 0x4c9   :  { %v7290_v55 = vsub.f32 %v30006_v18, %v30010_v21 }
 0x4ca   :  { %7021 = vmatmul.mubr.f32.vlgmr.msra.gmra.mrb[8].mxu0 %v29936_v14  ;;  %v7306_v14 = vand.u32 4294901760, %v7305_v45 }
 0x4cb   :  { %7034 = vmatpush1.msra.mxu0 %v6800_v44  ;;  %7097 = vmatprep.mubr.f32.mxu0 %v31035_v3  ;;  %v30016_v4 = vand.u32 4294901760, %v7290_v55 }
 0x4cc   :  { %7106 = vmatprep.subr.mxu0 %v6714_v23  ;;  %v7307_v10 = vsub.f32 %v7305_v45, %v7306_v14  ;;  %v7687_v23 = vand.u32 4294901760, %v7212_v16 }
 0x4ce   :  { %v7308_v20 = vand.u32 4294901760, %v7307_v10  ;;  %v7770_v41 = vsub.f32 %v7212_v16, %v7687_v23 }
 0x4d2   :  { %7099 = vmatmul.mubr.f32.vlgmr.msra.gmra.mrb[8].mxu0 %v29928_v40 }
 0x4d3   :  { %7108 = vmatpush1.msra.mxu0 %v6716_v38  ;;  %7171 = vmatprep.mubr.f32.mxu0 %v31035_v3 }
 0x4d4   :  { %7221 = vmatprep.subr.mxu0 %v7220_v52 }
 0x4da   :  { %7173 = vmatmul.mubr.f32.vlgmr.msra.gmra.mrb[8].mxu0 %v29928_v40  ;;  %v7203_v40 = vsel %vm7199_vm2, %v29421_v26, %v29350_v59  ;;  %v7771_v26 = vand.u32 4294901760, %v7770_v41  ;;  %v8236_v59 = vand.u32 4294901760, %v8235_v54 }
 0x4db   :  { %7223 = vmatpush1.msra.mxu0 %v7222_v22  ;;  %7286 = vmatprep.mubr.f32.mxu0 %v31035_v3  ;;  %v7214_v6 = vsel %vm1495_vm15, %v7203_v40, 0  ;;  %v8652_v40 = vsel %vm1495_vm15, %v29482_v8, 0 }
 0x4dc   :  { %7303 = vmatprep.subr.mxu0 %v7302_v30  ;;  %v7685_v32 = vand.u32 4294901760, %v7214_v6  ;;  %v7772_v58 = vsub.f32 %v7770_v41, %v7771_v26  ;;  %v8237_v25 = vsub.f32 %v8235_v54, %v8236_v59 }
 0x4de   :  { %7292 = vmatmul.mubr.f32.vlgmr.msra.gmra.mrb[4].mxu0 %v30016_v4  ;;  %v7764_v38 = vsub.f32 %v7214_v6, %v7685_v32  ;;  %v7773_v13 = vand.u32 4294901760, %v7772_v58  ;;  %v9588_v6 = vand.u32 4294901760, %v8652_v40  ;;  %v10082_v58 = vsel %vm1495_vm15, %v29501_v7, 0 }
 0x4df   :  { %7309 = vmatpush1.msra.mxu0 %v7308_v20  ;;  %7372 = vmatprep.mubr.f32.mxu0 %v31035_v3 }
 0x4e0   :  { %7382 = vmatprep.subr.mxu0 %v7299_v5  ;;  %v7765_v24 = vand.u32 4294901760, %v7764_v38  ;;  %v8637_v5 = vsel %vm8635_vm3, %v29352_v47, %v29459_v37 }
 0x4e2   :  { %v7766_v11 = vsub.f32 %v7764_v38, %v7765_v24 }
 0x4e4   :  { %v7767_v44 = vand.u32 4294901760, %v7766_v11 }
 0x4e6   :  { %7374 = vmatmul.mubr.f32.vlgmr.msra.gmra.mrb[4].mxu0 %v30002_v63 }
 0x4e7   :  { %7385 = vmatpush1.msra.mxu0 %v7305_v45  ;;  %7448 = vmatprep.mubr.f32.mxu0 %v31035_v3  ;;  %v8636_v45 = vsel %vm8635_vm3, %v29354_v48, %v29352_v47 }
 0x4e8   :  { %7458 = vmatprep.subr.mxu0 %v7220_v52 }
 0x4ee   :  { %7451 = vmatmul.mubr.f32.vlgmr.msra.gmra.mrb[4].mxu0 %v30006_v18 }
 0x4ef   :  { %7460 = vmatpush1.msra.mxu0 %v7222_v22  ;;  %7523 = vmatprep.mubr.f32.mxu0 %v31035_v3 }
 0x4f0   :  { %7536 = vmatprep.subr.mxu0 %v7300_v46  ;;  %v8646_v46 = vsel %vm1495_vm15, %v8637_v5, 0 }
 0x4f1   :  { %v8656_v62 = vand.u32 4294901760, %v8646_v46 }
 0x4f3   :  { %v8735_v55 = vsub.f32 %v8646_v46, %v8656_v62 }
 0x4f5   :  { %v8736_v37 = vand.u32 4294901760, %v8735_v55 }
 0x4f6   :  { %7527 = vmatmul.mubr.f32.vlgmr.msra.gmra.mrb[4].mxu0 %v30010_v21 }
 0x4f7   :  { %7540 = vmatpush1.msra.mxu0 %v7306_v14  ;;  %7603 = vmatprep.mubr.f32.mxu0 %v31035_v3  ;;  %v8644_v14 = vsel %vm1495_vm15, %v8636_v45, 0  ;;  %v8737_v48 = vsub.f32 %v8735_v55, %v8736_v37 }
 0x4f8   :  { %7612 = vmatprep.subr.mxu0 %v7220_v52  ;;  %v8232_v52 = vand.u32 4294901760, %v8231_v53 }
 0x4fe   :  { %7605 = vmatmul.mubr.f32.vlgmr.msra.gmra.mrb[4].mxu0 %v30002_v63 }
 0x4ff   :  { %7614 = vmatpush1.msra.mxu0 %v7222_v22  ;;  %7677 = vmatprep.mubr.f32.mxu0 %v31035_v3  ;;  %v8238_v22 = vand.u32 4294901760, %v8237_v25 }
 0x500   :  { %7686 = vmatprep.subr.mxu0 %v7685_v32 }
 0x506   :  { %7679 = vmatmul.mubr.f32.vlgmr.msra.gmra.mrb[4].mxu0 %v30002_v63 }
 0x507   :  { %7688 = vmatpush1.msra.mxu0 %v7687_v23  ;;  %7751 = vmatprep.mubr.f32.mxu0 %v31035_v3 }
 0x508   :  { %7768 = vmatprep.subr.mxu0 %v7767_v44  ;;  %v10080_v44 = vsel %vm1495_vm15, %v29511_v34, 0 }
 0x50a   :  { %7757 = vmatmul.mubr.f32.vlgmr.msra.gmra.mrb[6].mxu0 %v30016_v4 }
 0x50b   :  { %7774 = vmatpush1.msra.mxu0 %v7773_v13  ;;  %7837 = vmatprep.mubr.f32.mxu0 %v31035_v3  ;;  %v10094_v13 = vand.u32 4294901760, %v10080_v44 }
 0x50c   :  { %7847 = vmatprep.subr.mxu0 %v7764_v38  ;;  %v30089_v38 = vpop.f32.mrb[0].mxu1 }
 0x512   :  { %7839 = vmatmul.mubr.f32.vlgmr.msra.gmra.mrb[6].mxu0 %v30002_v63 }
 0x513   :  { %7850 = vmatpush1.msra.mxu0 %v7770_v41  ;;  %7913 = vmatprep.mubr.f32.mxu0 %v31035_v3 }
 0x514   :  { %7923 = vmatprep.subr.mxu0 %v7685_v32 }
 0x51a   :  { %7916 = vmatmul.mubr.f32.vlgmr.msra.gmra.mrb[6].mxu0 %v30006_v18 }
 0x51b   :  { %7925 = vmatpush1.msra.mxu0 %v7687_v23  ;;  %7988 = vmatprep.mubr.f32.mxu0 %v31035_v3 }
 0x51c   :  { %8001 = vmatprep.subr.mxu0 %v7765_v24 }
 0x522   :  { %7992 = vmatmul.mubr.f32.vlgmr.msra.gmra.mrb[6].mxu0 %v30010_v21 }
 0x523   :  { %8005 = vmatpush1.msra.mxu0 %v7771_v26  ;;  %8068 = vmatprep.mubr.f32.mxu0 %v31035_v3  ;;  %v30092_v26 = vpop.f32.mrb[1].mxu1 }
 0x524   :  { %8077 = vmatprep.subr.mxu0 %v7685_v32  ;;  %v9671_v32 = vsub.f32 %v8652_v40, %v9588_v6 }
 0x52a   :  { %8070 = vmatmul.mubr.f32.vlgmr.msra.gmra.mrb[6].mxu0 %v30002_v63 }
 0x52b   :  { %8079 = vmatpush1.msra.mxu0 %v7687_v23  ;;  %8142 = vmatprep.mubr.f32.mxu0 %v31035_v3 }
 0x52c   :  { %8151 = vmatprep.subr.mxu0 %v8150_v19 }
 0x532   :  { %8144 = vmatmul.mubr.f32.vlgmr.msra.gmra.mrb[6].mxu0 %v30002_v63 }
 0x533   :  { %8153 = vmatpush1.msra.mxu0 %v8152_v60  ;;  %8216 = vmatprep.mubr.f32.mxu0 %v31035_v3 }
 0x534   :  { %8233 = vmatprep.subr.mxu0 %v8232_v52 }
 0x536   :  { %8222 = vmatmul.mubr.f32.vlgmr.msra.gmra.mrb[8].mxu0 %v30016_v4 }
 0x537   :  { %8239 = vmatpush1.msra.mxu0 %v8238_v22  ;;  %8302 = vmatprep.mubr.f32.mxu0 %v31035_v3 }
 0x538   :  { %8312 = vmatprep.subr.mxu0 %v8229_v51  ;;  %v31037_v51 = vld [vmem:[#allocation8_spill] sm:$0xff] }
 0x53e   :  { %8304 = vmatmul.mubr.f32.vlgmr.msra.gmra.mrb[8].mxu0 %v30002_v63 }
 0x53f   :  { %8315 = vmatpush1.msra.mxu0 %v8235_v54  ;;  %8378 = vmatprep.mubr.f32.mxu0 %v31035_v3  ;;  %v10088_v54 = vsel %vm1495_vm15, %v31037_v51, 0 }
 0x540   :  { %8388 = vmatprep.subr.mxu0 %v8150_v19 }
 0x546   :  { %8381 = vmatmul.mubr.f32.vlgmr.msra.gmra.mrb[8].mxu0 %v30006_v18  ;;  %v8658_v18 = vand.u32 4294901760, %v8644_v14 }
 0x547   :  { %8390 = vmatpush1.msra.mxu0 %v8152_v60  ;;  %8453 = vmatprep.mubr.f32.mxu0 %v31035_v3 }
 0x548   :  { %8466 = vmatprep.subr.mxu0 %v8230_v9  ;;  %v8741_v10 = vsub.f32 %v8644_v14, %v8658_v18 }
 0x54a   :  { %v8742_v47 = vand.u32 4294901760, %v8741_v10 }
 0x54c   :  { %v8743_v30 = vsub.f32 %v8741_v10, %v8742_v47 }
 0x54e   :  { %8457 = vmatmul.mubr.f32.vlgmr.msra.gmra.mrb[8].mxu0 %v30010_v21  ;;  %v8738_v21 = vand.u32 4294901760, %v8737_v48  ;;  %v8744_v4 = vand.u32 4294901760, %v8743_v30 }
 0x54f   :  { %8470 = vmatpush1.msra.mxu0 %v8236_v59  ;;  %8533 = vmatprep.mubr.f32.mxu0 %v31035_v3  ;;  %v11024_v59 = vand.u32 4294901760, %v10088_v54 }
 0x550   :  { %8542 = vmatprep.subr.mxu0 %v8150_v19 }
 0x551   :  { %v11107_v25 = vsub.f32 %v10088_v54, %v11024_v59 }
 0x553   :  { %v11108_v22 = vand.u32 4294901760, %v11107_v25 }
 0x555   :  { %v11109_v45 = vsub.f32 %v11107_v25, %v11108_v22 }
 0x556   :  { %8535 = vmatmul.mubr.f32.vlgmr.msra.gmra.mrb[8].mxu0 %v30002_v63 }
 0x557   :  { %8544 = vmatpush1.msra.mxu0 %v8152_v60  ;;  %8607 = vmatprep.mubr.f32.mxu0 %v31035_v3  ;;  %v11110_v14 = vand.u32 4294901760, %v11109_v45 }
 0x558   :  { %8657 = vmatprep.subr.mxu0 %v8656_v62 }
 0x55e   :  { %8609 = vmatmul.mubr.f32.vlgmr.msra.gmra.mrb[8].mxu0 %v30002_v63  ;;  %v8654_v63 = vsel %vm1495_vm15, %v29356_v50, 0  ;;  %v9672_v50 = vand.u32 4294901760, %v9671_v32 }
 0x55f   :  { %8659 = vmatpush1.msra.mxu0 %v8658_v18  ;;  %8722 = vmatprep.mubr.f32.mxu0 %v31035_v3  ;;  %v9586_v20 = vand.u32 4294901760, %v8654_v63 }
 0x560   :  { %8739 = vmatprep.subr.mxu0 %v8738_v21  ;;  %v9673_v41 = vsub.f32 %v9671_v32, %v9672_v50 }
 0x561   :  { %v9665_v16 = vsub.f32 %v8654_v63, %v9586_v20 }
 0x562   :  { %8728 = vmatmul.mubr.f32.vlgmr.msra.gmra.mrb[4].mxu0 %v29495_v49  ;;  %v9674_v11 = vand.u32 4294901760, %v9673_v41 }
 0x563   :  { %8745 = vmatpush1.msra.mxu0 %v8744_v4  ;;  %8808 = vmatprep.mubr.f32.mxu0 %v31035_v3  ;;  %v9666_v23 = vand.u32 4294901760, %v9665_v16 }
 0x564   :  { %8818 = vmatprep.subr.mxu0 %v8735_v55  ;;  %v31039_v55 = vld [vmem:[#allocation10_spill] sm:$0xff] }
 0x565   :  { %v9667_v8 = vsub.f32 %v9665_v16, %v9666_v23 }
 0x567   :  { %v9668_v24 = vand.u32 4294901760, %v9667_v8 }
 0x56a   :  { %8810 = vmatmul.mubr.f32.vlgmr.msra.gmra.mrb[4].mxu0 %v29419_v56 }
 0x56b   :  { %8821 = vmatpush1.msra.mxu0 %v8741_v10  ;;  %8884 = vmatprep.mubr.f32.mxu0 %v31035_v3  ;;  %v11516_v10 = vsel %vm1495_vm15, %v31039_v55, 0 }
 0x56c   :  { %8894 = vmatprep.subr.mxu0 %v8656_v62 }
 0x572   :  { %8887 = vmatmul.mubr.f32.vlgmr.msra.gmra.mrb[4].mxu0 %v29441_v39 }
 0x573   :  { %8896 = vmatpush1.msra.mxu0 %v8658_v18  ;;  %8959 = vmatprep.mubr.f32.mxu0 %v31035_v3 }
 0x574   :  { %8972 = vmatprep.subr.mxu0 %v8736_v37  ;;  %v11530_v37 = vand.u32 4294901760, %v11516_v10 }
 0x57a   :  { %8963 = vmatmul.mubr.f32.vlgmr.msra.gmra.mrb[4].mxu0 %v29456_v33 }
 0x57b   :  { %8976 = vmatpush1.msra.mxu0 %v8742_v47  ;;  %9039 = vmatprep.mubr.f32.mxu0 %v31035_v3 }
 0x57c   :  { %9048 = vmatprep.subr.mxu0 %v8656_v62  ;;  %v31038_v62 = vld [vmem:[#allocation9_spill] sm:$0xff] }
 0x582   :  { %9041 = vmatmul.mubr.f32.vlgmr.msra.gmra.mrb[4].mxu0 %v29419_v56 }
 0x583   :  { %9050 = vmatpush1.msra.mxu0 %v8658_v18  ;;  %9113 = vmatprep.mubr.f32.mxu0 %v31035_v3  ;;  %v11518_v18 = vsel %vm1495_vm15, %v31038_v62, 0 }
 0x584   :  { %9587 = vmatprep.subr.mxu0 %v9586_v20 }
 0x58a   :  { %9115 = vmatmul.mubr.f32.vlgmr.msra.gmra.mrb[4].mxu0 %v29419_v56 }
 0x58b   :  { %9589 = vmatpush1.msra.mxu0 %v9588_v6  ;;  %9652 = vmatprep.mubr.f32.mxu0 %v31035_v3 }
 0x58c   :  { %9669 = vmatprep.subr.mxu0 %v9668_v24 }
 0x58e   :  { %9658 = vmatmul.mubr.f32.vlgmr.msra.gmra.mrb[8].mxu0 %v29495_v49  ;;  %v10092_v49 = vand.u32 4294901760, %v10082_v58 }
 0x58f   :  { %9675 = vmatpush1.msra.mxu0 %v9674_v11  ;;  %9738 = vmatprep.mubr.f32.mxu0 %v31035_v3 }
 0x590   :  { %9748 = vmatprep.subr.mxu0 %v9665_v16  ;;  %v10171_v17 = vsub.f32 %v10082_v58, %v10092_v49 }
 0x592   :  { %v10172_v61 = vand.u32 4294901760, %v10171_v17 }
 0x594   :  { %v10173_v57 = vsub.f32 %v10171_v17, %v10172_v61 }
 0x596   :  { %9740 = vmatmul.mubr.f32.vlgmr.msra.gmra.mrb[8].mxu0 %v29419_v56 }
 0x597   :  { %9751 = vmatpush1.msra.mxu0 %v9671_v32  ;;  %9814 = vmatprep.mubr.f32.mxu0 %v31035_v3 }
 0x598   :  { %9824 = vmatprep.subr.mxu0 %v9586_v20 }
 0x59e   :  { %9817 = vmatmul.mubr.f32.vlgmr.msra.gmra.mrb[8].mxu0 %v29441_v39  ;;  %v10177_v39 = vsub.f32 %v10080_v44, %v10094_v13 }
 0x59f   :  { %9826 = vmatpush1.msra.mxu0 %v9588_v6  ;;  %9889 = vmatprep.mubr.f32.mxu0 %v31035_v3 }
 0x5a0   :  { %9902 = vmatprep.subr.mxu0 %v9666_v23  ;;  %v10178_v7 = vand.u32 4294901760, %v10177_v39 }
 0x5a2   :  { %v10179_v19 = vsub.f32 %v10177_v39, %v10178_v7 }
 0x5a4   :  { %v10180_v34 = vand.u32 4294901760, %v10179_v19 }
 0x5a6   :  { %9893 = vmatmul.mubr.f32.vlgmr.msra.gmra.mrb[8].mxu0 %v29456_v33  ;;  %v10174_v33 = vand.u32 4294901760, %v10173_v57 }
 0x5a7   :  { %9906 = vmatpush1.msra.mxu0 %v9672_v50  ;;  %9969 = vmatprep.mubr.f32.mxu0 %v31035_v3  ;;  %v31041_v50 = vld [vmem:[#allocation11_spill] sm:$0xff] }
 0x5a8   :  { %9978 = vmatprep.subr.mxu0 %v9586_v20 }
 0x5ae   :  { %9971 = vmatmul.mubr.f32.vlgmr.msra.gmra.mrb[8].mxu0 %v29419_v56 }
 0x5af   :  { %9980 = vmatpush1.msra.mxu0 %v9588_v6  ;;  %10043 = vmatprep.mubr.f32.mxu0 %v31035_v3 }
 0x5b0   :  { %10093 = vmatprep.subr.mxu0 %v10092_v49 }
 0x5b6   :  { %10045 = vmatmul.mubr.f32.vlgmr.msra.gmra.mrb[8].mxu0 %v29419_v56  ;;  %v31036_v56 = vld [vmem:[#allocation7_spill] sm:$0xff] }
 0x5b7   :  { %10095 = vmatpush1.msra.mxu0 %v10094_v13  ;;  %10158 = vmatprep.mubr.f32.mxu0 %v31035_v3  ;;  %v10090_v60 = vsel %vm1495_vm15, %v31036_v56, 0 }
 0x5b8   :  { %10175 = vmatprep.subr.mxu0 %v10174_v33  ;;  %v11022_v9 = vand.u32 4294901760, %v10090_v60 }
 0x5ba   :  { %10164 = vmatmul.mubr.f32.vlgmr.msra.gmra.mrb[4].mxu0 %v29629_v2  ;;  %v11101_v53 = vsub.f32 %v10090_v60, %v11022_v9 }
 0x5bb   :  { %10181 = vmatpush1.msra.mxu0 %v10180_v34  ;;  %10244 = vmatprep.mubr.f32.mxu0 %v31035_v3 }
 0x5bc   :  { %10254 = vmatprep.subr.mxu0 %v10171_v17  ;;  %v11102_v52 = vand.u32 4294901760, %v11101_v53  ;;  %v31042_v17 = vld [vmem:[#allocation12_spill] sm:$0xff] }
 0x5be   :  { %v11103_v5 = vsub.f32 %v11101_v53, %v11102_v52 }
 0x5c0   :  { %v11104_v46 = vand.u32 4294901760, %v11103_v5 }
 0x5c2   :  { %10246 = vmatmul.mubr.f32.vlgmr.msra.gmra.mrb[4].mxu0 %v29594_v27 }
 0x5c3   :  { %10257 = vmatpush1.msra.mxu0 %v10177_v39  ;;  %10320 = vmatprep.mubr.f32.mxu0 %v31035_v3  ;;  %v12954_v39 = vsel %vm1495_vm15, %v31042_v17, 0 }
 0x5c4   :  { %10330 = vmatprep.subr.mxu0 %v10092_v49 }
 0x5ca   :  { %10323 = vmatmul.mubr.f32.vlgmr.msra.gmra.mrb[4].mxu0 %v29606_v1 }
 0x5cb   :  { %10332 = vmatpush1.msra.mxu0 %v10094_v13  ;;  %10395 = vmatprep.mubr.f32.mxu0 %v31035_v3 }
 0x5cc   :  { %10408 = vmatprep.subr.mxu0 %v10172_v61 }
 0x5d2   :  { %10399 = vmatmul.mubr.f32.vlgmr.msra.gmra.mrb[4].mxu0 %v29617_v36 }
 0x5d3   :  { %10412 = vmatpush1.msra.mxu0 %v10178_v7  ;;  %10475 = vmatprep.mubr.f32.mxu0 %v31035_v3  ;;  %v12964_v7 = vand.u32 4294901760, %v12954_v39 }
 0x5d4   :  { %10484 = vmatprep.subr.mxu0 %v10092_v49 }
 0x5d5   :  { %v13043_v19 = vsub.f32 %v12954_v39, %v12964_v7 }
 0x5d7   :  { %v13044_v33 = vand.u32 4294901760, %v13043_v19 }
 0x5d9   :  { %v13045_v56 = vsub.f32 %v13043_v19, %v13044_v33 }
 0x5da   :  { %10477 = vmatmul.mubr.f32.vlgmr.msra.gmra.mrb[4].mxu0 %v29594_v27 }
 0x5db   :  { %10486 = vmatpush1.msra.mxu0 %v10094_v13  ;;  %10549 = vmatprep.mubr.f32.mxu0 %v31035_v3 }
 0x5dc   :  { %11023 = vmatprep.subr.mxu0 %v11022_v9 }
 0x5e2   :  { %10551 = vmatmul.mubr.f32.vlgmr.msra.gmra.mrb[4].mxu0 %v29594_v27 }
 0x5e3   :  { %11025 = vmatpush1.msra.mxu0 %v11024_v59  ;;  %11088 = vmatprep.mubr.f32.mxu0 %v31035_v3 }
 0x5e4   :  { %11105 = vmatprep.subr.mxu0 %v11104_v46 }
 0x5e6   :  { %11094 = vmatmul.mubr.f32.vlgmr.msra.gmra.mrb[8].mxu0 %v29629_v2  ;;  %v11528_v2 = vand.u32 4294901760, %v11518_v18 }
 0x5e7   :  { %11111 = vmatpush1.msra.mxu0 %v11110_v14  ;;  %11174 = vmatprep.mubr.f32.mxu0 %v31035_v3 }
 0x5e8   :  { %11184 = vmatprep.subr.mxu0 %v11101_v53  ;;  %v11607_v47 = vsub.f32 %v11518_v18, %v11528_v2 }
 0x5ea   :  { %v11608_v4 = vand.u32 4294901760, %v11607_v47 }
 0x5ec   :  { %v11609_v20 = vsub.f32 %v11607_v47, %v11608_v4 }
 0x5ee   :  { %11176 = vmatmul.mubr.f32.vlgmr.msra.gmra.mrb[8].mxu0 %v29594_v27  ;;  %v11610_v6 = vand.u32 4294901760, %v11609_v20 }
 0x5ef   :  { %11187 = vmatpush1.msra.mxu0 %v11107_v25  ;;  %11250 = vmatprep.mubr.f32.mxu0 %v31035_v3 }
 0x5f0   :  { %11260 = vmatprep.subr.mxu0 %v11022_v9 }
 0x5f6   :  { %11253 = vmatmul.mubr.f32.vlgmr.msra.gmra.mrb[8].mxu0 %v29606_v1  ;;  %v11613_v1 = vsub.f32 %v11516_v10, %v11530_v37 }
 0x5f7   :  { %11262 = vmatpush1.msra.mxu0 %v11024_v59  ;;  %11325 = vmatprep.mubr.f32.mxu0 %v31035_v3 }
 0x5f8   :  { %11338 = vmatprep.subr.mxu0 %v11102_v52 }
 0x5fe   :  { %11329 = vmatmul.mubr.f32.vlgmr.msra.gmra.mrb[8].mxu0 %v29617_v36  ;;  %v11614_v36 = vand.u32 4294901760, %v11613_v1 }
 0x5ff   :  { %11342 = vmatpush1.msra.mxu0 %v11108_v22  ;;  %11405 = vmatprep.mubr.f32.mxu0 %v31035_v3 }
 0x600   :  { %11414 = vmatprep.subr.mxu0 %v11022_v9  ;;  %v11615_v40 = vsub.f32 %v11613_v1, %v11614_v36 }
 0x602   :  { %v11616_v16 = vand.u32 4294901760, %v11615_v40 }
 0x605   :  { %v8145_v48 = vpop.f32.mrb[6].mxu0 }
 0x606   :  { %v30140_v30 = vadd.f32 %v30089_v38, %v8145_v48  ;;  %v8147_v21 = vpop.f32.mrb[7].mxu0  ;;  %11407 = vmatmul.mubr.f32.vlgmr.msra.gmra.mrb[8].mxu0 %v29594_v27  ;;  %v11524_v38 = vsel %vm1495_vm15, %v31041_v50, 0 }
 0x607   :  { %11416 = vmatpush1.msra.mxu0 %v11024_v59  ;;  %v30144_v63 = vadd.f32 %v30092_v26, %v8147_v21  ;;  %11479 = vmatprep.mubr.f32.mxu0 %v31035_v3  ;;  %v12460_v8 = vand.u32 4294901760, %v11524_v38 }
 0x608   :  { %11529 = vmatprep.subr.mxu0 %v11528_v2 }
 0x609   :  { %v12543_v24 = vsub.f32 %v11524_v38, %v12460_v8 }
 0x60b   :  { %v12544_v11 = vand.u32 4294901760, %v12543_v24 }
 0x60d   :  { %v12545_v49 = vsub.f32 %v12543_v24, %v12544_v11 }
 0x60e   :  { %11481 = vmatmul.mubr.f32.vlgmr.msra.gmra.mrb[8].mxu0 %v29594_v27  ;;  %v31040_v27 = vld [vmem:[#allocation5_spill] sm:$0xff] }
 0x60f   :  { %11531 = vmatpush1.msra.mxu0 %v11530_v37  ;;  %11594 = vmatprep.mubr.f32.mxu0 %v31035_v3  ;;  %v11526_v32 = vsel %vm1495_vm15, %v31040_v27, 0  ;;  %v12546_v13 = vand.u32 4294901760, %v12545_v49 }
 0x610   :  { %11611 = vmatprep.subr.mxu0 %v11610_v6  ;;  %v12458_v23 = vand.u32 4294901760, %v11526_v32 }
 0x612   :  { %11600 = vmatmul.mubr.f32.vlgmr.msra.gmra.mrb[4].mxu0 %v29729_v31  ;;  %v12537_v41 = vsub.f32 %v11526_v32, %v12458_v23 }
 0x613   :  { %11617 = vmatpush1.msra.mxu0 %v11616_v16  ;;  %11680 = vmatprep.mubr.f32.mxu0 %v31035_v3 }
 0x614   :  { %11690 = vmatprep.subr.mxu0 %v11607_v47  ;;  %v12538_v26 = vand.u32 4294901760, %v12537_v41 }
 0x616   :  { %v12539_v58 = vsub.f32 %v12537_v41, %v12538_v26 }
 0x618   :  { %v12540_v44 = vand.u32 4294901760, %v12539_v58 }
 0x61a   :  { %11682 = vmatmul.mubr.f32.vlgmr.msra.gmra.mrb[4].mxu0 %v29689_v35 }
 0x61b   :  { %11693 = vmatpush1.msra.mxu0 %v11613_v1  ;;  %11756 = vmatprep.mubr.f32.mxu0 %v31035_v3 }
 0x61c   :  { %11766 = vmatprep.subr.mxu0 %v11528_v2 }
 0x622   :  { %11759 = vmatmul.mubr.f32.vlgmr.msra.gmra.mrb[4].mxu0 %v29699_v28 }
 0x623   :  { %11768 = vmatpush1.msra.mxu0 %v11530_v37  ;;  %11831 = vmatprep.mubr.f32.mxu0 %v31035_v3 }
 0x624   :  { %11844 = vmatprep.subr.mxu0 %v11608_v4 }
 0x62a   :  { %11835 = vmatmul.mubr.f32.vlgmr.msra.gmra.mrb[4].mxu0 %v29715_v12 }
 0x62b   :  { %11848 = vmatpush1.msra.mxu0 %v11614_v36  ;;  %11911 = vmatprep.mubr.f32.mxu0 %v31035_v3 }
 0x62c   :  { %11920 = vmatprep.subr.mxu0 %v11528_v2  ;;  %v35_v2 = vld [vmem:[%s31005_s3] sm:$0x3f] }
 0x632   :  { %11913 = vmatmul.mubr.f32.vlgmr.msra.gmra.mrb[4].mxu0 %v29689_v35 }
 0x633   :  { %11922 = vmatpush1.msra.mxu0 %v11530_v37  ;;  %11985 = vmatprep.mubr.f32.mxu0 %v31035_v3 }
 0x634   :  { %12459 = vmatprep.subr.mxu0 %v12458_v23 }
 0x63a   :  { %11987 = vmatmul.mubr.f32.vlgmr.msra.gmra.mrb[4].mxu0 %v29689_v35 }
 0x63b   :  { %12461 = vmatpush1.msra.mxu0 %v12460_v8  ;;  %12524 = vmatprep.mubr.f32.mxu0 %v31035_v3 }
 0x63c   :  { %12541 = vmatprep.subr.mxu0 %v12540_v44 }
 0x63e   :  { %12530 = vmatmul.mubr.f32.vlgmr.msra.gmra.mrb[8].mxu0 %v29729_v31  ;;  %v31043_v31 = vld [vmem:[#allocation6_spill] sm:$0xff] }
 0x63f   :  { %12547 = vmatpush1.msra.mxu0 %v12546_v13  ;;  %12610 = vmatprep.mubr.f32.mxu0 %v31035_v3  ;;  %v12952_v61 = vsel %vm1495_vm15, %v31043_v31, 0 }
 0x640   :  { %12620 = vmatprep.subr.mxu0 %v12537_v41  ;;  %v12966_v57 = vand.u32 4294901760, %v12952_v61 }
 0x646   :  { %12612 = vmatmul.mubr.f32.vlgmr.msra.gmra.mrb[8].mxu0 %v29689_v35 }
 0x647   :  { %12623 = vmatpush1.msra.mxu0 %v12543_v24  ;;  %12686 = vmatprep.mubr.f32.mxu0 %v31035_v3 }
 0x648   :  { %12696 = vmatprep.subr.mxu0 %v12458_v23 }
 0x64e   :  { %12689 = vmatmul.mubr.f32.vlgmr.msra.gmra.mrb[8].mxu0 %v29699_v28  ;;  %v13049_v28 = vsub.f32 %v12952_v61, %v12966_v57 }
 0x64f   :  { %12698 = vmatpush1.msra.mxu0 %v12460_v8  ;;  %12761 = vmatprep.mubr.f32.mxu0 %v31035_v3 }
 0x650   :  { %12774 = vmatprep.subr.mxu0 %v12538_v26  ;;  %v13050_v34 = vand.u32 4294901760, %v13049_v28 }
 0x652   :  { %v13051_v60 = vsub.f32 %v13049_v28, %v13050_v34 }
 0x654   :  { %v13052_v51 = vand.u32 4294901760, %v13051_v60 }
 0x656   :  { %12765 = vmatmul.mubr.f32.vlgmr.msra.gmra.mrb[8].mxu0 %v29715_v12  ;;  %v13046_v12 = vand.u32 4294901760, %v13045_v56 }
 0x657   :  { %12778 = vmatpush1.msra.mxu0 %v12544_v11  ;;  %12841 = vmatprep.mubr.f32.mxu0 %v31035_v3 }
 0x658   :  { %12850 = vmatprep.subr.mxu0 %v12458_v23 }
 0x65e   :  { %12843 = vmatmul.mubr.f32.vlgmr.msra.gmra.mrb[8].mxu0 %v29689_v35 }
 0x65f   :  { %12852 = vmatpush1.msra.mxu0 %v12460_v8  ;;  %12915 = vmatprep.mubr.f32.mxu0 %v31035_v3 }
 0x660   :  { %12965 = vmatprep.subr.mxu0 %v12964_v7 }
 0x666   :  { %12917 = vmatmul.mubr.f32.vlgmr.msra.gmra.mrb[8].mxu0 %v29689_v35  ;;  %v12942_v35 = vpop.permute.xlu1 %12941 }
 0x667   :  { %12967 = vmatpush1.msra.mxu0 %v12966_v57  ;;  %13030 = vmatprep.mubr.f32.mxu0 %v31035_v3  ;;  %v12948_v54 = vsel %vm12943_vm1, %v29763_v15, %v12942_v35  ;;  %v12962_v9 = vsel %vm1495_vm15, %v12942_v35, 0 }
 0x668   :  { %13047 = vmatprep.subr.mxu0 %v13046_v12  ;;  %v12960_v59 = vsel %vm1495_vm15, %v12948_v54, 0  ;;  %v13894_v53 = vand.u32 4294901760, %v12962_v9  ;;  %vm14518_vm15 = vcmask 1047556  }
 0x669   :  { %v13896_v25 = vand.u32 4294901760, %v12960_v59  ;;  %vm14519_vm0 = vmor %vm14518_vm15, %vm14517_vm13 }
 0x66a   :  { %13036 = vmatmul.mubr.f32.vlgmr.msra.gmra.mrb[4].mxu0 %v29849_v29  ;;  %v13973_v52 = vsub.f32 %v12962_v9, %v13894_v53 }
 0x66b   :  { %13053 = vmatpush1.msra.mxu0 %v13052_v51  ;;  %13116 = vmatprep.mubr.f32.mxu0 %v31035_v3  ;;  %v13979_v22 = vsub.f32 %v12960_v59, %v13896_v25 }
 0x66c   :  { %13126 = vmatprep.subr.mxu0 %v13043_v19  ;;  %v13974_v5 = vand.u32 4294901760, %v13973_v52 }
 0x66d   :  { %v13980_v15 = vand.u32 4294901760, %v13979_v22 }
 0x66e   :  { %v13975_v45 = vsub.f32 %v13973_v52, %v13974_v5 }
 0x66f   :  { %v13981_v46 = vsub.f32 %v13979_v22, %v13980_v15 }
 0x670   :  { %v13976_v14 = vand.u32 4294901760, %v13975_v45 }
 0x671   :  { %v13982_v62 = vand.u32 4294901760, %v13981_v46 }
 0x672   :  { %13118 = vmatmul.mubr.f32.vlgmr.msra.gmra.mrb[4].mxu0 %v29816_v42 }
 0x673   :  { %13129 = vmatpush1.msra.mxu0 %v13049_v28  ;;  %13192 = vmatprep.mubr.f32.mxu0 %v31035_v3 }
 0x674   :  { %13202 = vmatprep.subr.mxu0 %v12964_v7 }
 0x67a   :  { %13195 = vmatmul.mubr.f32.vlgmr.msra.gmra.mrb[4].mxu0 %v29828_v43 }
 0x67b   :  { %13204 = vmatpush1.msra.mxu0 %v12966_v57  ;;  %13267 = vmatprep.mubr.f32.mxu0 %v31035_v3 }
 0x67c   :  { %13280 = vmatprep.subr.mxu0 %v13044_v33 }
 0x682   :  { %13271 = vmatmul.mubr.f32.vlgmr.msra.gmra.mrb[4].mxu0 %v29839_v0 }
 0x683   :  { %13284 = vmatpush1.msra.mxu0 %v13050_v34  ;;  %13347 = vmatprep.mubr.f32.mxu0 %v31035_v3 }
 0x684   :  { %13356 = vmatprep.subr.mxu0 %v12964_v7 }
 0x68a   :  { %13349 = vmatmul.mubr.f32.vlgmr.msra.gmra.mrb[4].mxu0 %v29816_v42 }
 0x68b   :  { %13358 = vmatpush1.msra.mxu0 %v12966_v57  ;;  %13421 = vmatprep.mubr.f32.mxu0 %v31035_v3 }
 0x68c   :  { %13895 = vmatprep.subr.mxu0 %v13894_v53 }
 0x692   :  { %13423 = vmatmul.mubr.f32.vlgmr.msra.gmra.mrb[4].mxu0 %v29816_v42 }
 0x693   :  { %13897 = vmatpush1.msra.mxu0 %v13896_v25  ;;  %13960 = vmatprep.mubr.f32.mxu0 %v31035_v3 }
 0x694   :  { %13977 = vmatprep.subr.mxu0 %v13976_v14 }
 0x696   :  { %13966 = vmatmul.mubr.f32.vlgmr.msra.gmra.mrb[8].mxu0 %v29849_v29  ;;  %v31044_v29 = vld [vmem:[#allocation4_spill] sm:$0xff] }
 0x697   :  { %13983 = vmatpush1.msra.mxu0 %v13982_v62  ;;  %14046 = vmatprep.mubr.f32.mxu0 %v31035_v3  ;;  %v14368_v18 = vsub.s32 0, %v31044_v29  ;;  %v14376_v4 = vsub.s32 2, %v31044_v29  ;;  %v14380_v20 = vsub.s32 3, %v31044_v29  ;;  %v14384_v16 = vsub.s32 4, %v31044_v29 }
 0x698   :  { %14056 = vmatprep.subr.mxu0 %v13973_v52  ;;  %v14388_v27 = vsub.s32 5, %v31044_v29 }
 0x699   :  { %v30222_v36 = vrot.slane %v35_v2, %v14376_v4  ;;  %v30227_v6 = vrot.slane %v35_v2, %v14380_v20  ;;  %v30234_v50 = vrot.slane %v35_v2, %v14384_v16 }
 0x69a   :  { %v30236_v8 = vrot.slane %v35_v2, %v14388_v27 }
 0x69b   :  { %v14398_v40 = vmul.f32 %v30140_v30, %v30222_v36  ;;  %v14399_v23 = vmul.f32 %v30144_v63, %v30227_v6 }
 0x69d   :  { %v14406_v32 = vsel %vm14402_vm9, %v14398_v40, 0.0  ;;  %v14408_v24 = vsel %vm14402_vm9, %v14399_v23, 0.0 }
 0x69e   :  { %14048 = vmatmul.mubr.f32.vlgmr.msra.gmra.mrb[8].mxu0 %v29816_v42 }
 0x69f   :  { %14059 = vmatpush1.msra.mxu0 %v13979_v22  ;;  %14122 = vmatprep.mubr.f32.mxu0 %v31035_v3 }
 0x6a0   :  { %14132 = vmatprep.subr.mxu0 %v13894_v53 }
 0x6a6   :  { %14125 = vmatmul.mubr.f32.vlgmr.msra.gmra.mrb[8].mxu0 %v29828_v43  ;;  %v14372_v43 = vsub.s32 1, %v31044_v29 }
 0x6a7   :  { %14134 = vmatpush1.msra.mxu0 %v13896_v25  ;;  %14197 = vmatprep.mubr.f32.mxu0 %v31035_v3 }
 0x6a8   :  { %14210 = vmatprep.subr.mxu0 %v13974_v5  ;;  %v30215_v55 = vrot.slane %v35_v2, %v14372_v43 }
 0x6ae   :  { %14201 = vmatmul.mubr.f32.vlgmr.msra.gmra.mrb[8].mxu0 %v29839_v0  ;;  %v30213_v0 = vrot.slane %v35_v2, %v14368_v18  ;;  %v28638_v2 = vmov 0  }
 0x6af   :  { %14214 = vmatpush1.msra.mxu0 %v13980_v15  ;;  %14277 = vmatprep.mubr.f32.mxu0 %v31035_v3 }
 0x6b0   :  { %14286 = vmatprep.subr.mxu0 %v13894_v53  ;;  %28614 = vset.pattern.permute.xlu0 %v28638_v2 }
 0x6b1   :  { %28615 = vset.pattern.permute.xlu1 %v28638_v2 }
 0x6b6   :  { %14279 = vmatmul.mubr.f32.vlgmr.msra.gmra.mrb[8].mxu0 %v29816_v42 }
 0x6b7   :  { %14288 = vmatpush1.msra.mxu0 %v13896_v25  ;;  %14351 = vmatprep.mubr.f32.mxu0 %v31035_v3 }
 0x6be   :  { %14353 = vmatmul.mubr.f32.vlgmr.msra.gmra.mrb[8].mxu0 %v29816_v42 }
 0x765   :  { %v13424_v10 = vpop.f32.mrb[4].mxu0 }
 0x766   :  { %v14396_v37 = vmul.f32 %v30213_v0, %v13424_v10  ;;  %v13426_v47 = vpop.f32.mrb[5].mxu0 }
 0x767   :  { %v14397_v1 = vmul.f32 %v30215_v55, %v13426_v47 }
 0x768   :  { %v14403_v42 = vsel %vm14402_vm9, %v14396_v37, 0.0 }
 0x769   :  { %v14404_v48 = vsel %vm14402_vm9, %v14397_v1, 0.0 }
 0x76a   :  { %v14405_v21 = vadd.f32 %v14404_v48, %v14403_v42  ;;  %v1456_v42 = vld [vmem:[%s31007_s5] sm:$0xf] }
 0x76c   :  { %v14407_v38 = vadd.f32 %v14406_v32, %v14405_v21 }
 0x76e   :  { %v14409_v49 = vadd.f32 %v14408_v24, %v14407_v38 }
 0x791   :  { %v14354_v41 = vpop.f32.mrb[8].mxu0 }
 0x792   :  { %v14400_v26 = vmul.f32 %v30234_v50, %v14354_v41  ;;  %v14356_v11 = vpop.f32.mrb[9].mxu0 }
 0x793   :  { %v14401_v58 = vmul.f32 %v30236_v8, %v14356_v11 }
 0x794   :  { %v14410_v44 = vsel %vm14402_vm9, %v14400_v26, 0.0 }
 0x795   :  { %v14411_v13 = vadd.f32 %v14410_v44, %v14409_v49  ;;  %v14413_v17 = vsel %vm14412_vm10, %v14401_v58, 0.0 }
 0x797   :  { %v14414_v39 = vadd.f32 %v14413_v17, %v14411_v13 }
 0x799   :  { %14415 = vadd.xlane.f32.xlu0 %v14414_v39 }
 0x826   :  { %v14416_v31 = vpop.xlane.xlu0 %14415 }
 0x827   :  { %v14417_v61 = vmul.f32 0.001953125, %v14416_v31 }
 0x829   :  { %v14418_v7 = vsub.f32 %v13424_v10, %v14417_v61  ;;  %v14419_v57 = vsub.f32 %v13426_v47, %v14417_v61  ;;  %v14420_v19 = vsub.f32 %v30140_v30, %v14417_v61  ;;  %v14421_v28 = vsub.f32 %v30144_v63, %v14417_v61  ;;  %v1457_v10 = vld [vmem:[%s31006_s6] sm:$0xf] }
 0x82a   :  { %v14422_v33 = vsub.f32 %v14354_v41, %v14417_v61  ;;  %v14423_v34 = vsub.f32 %v14356_v11, %v14417_v61 }
 0x82b   :  { %v14424_v56 = vmul.f32 %v14418_v7, %v30213_v0  ;;  %v14425_v60 = vmul.f32 %v14419_v57, %v30215_v55  ;;  %v14426_v12 = vmul.f32 %v14420_v19, %v30222_v36  ;;  %v14427_v51 = vmul.f32 %v14421_v28, %v30227_v6 }
 0x82c   :  { %v14428_v35 = vmul.f32 %v14422_v33, %v30234_v50  ;;  %v14429_v53 = vmul.f32 %v14423_v34, %v30236_v8 }
 0x82d   :  { %v14430_v54 = vmul.f32 %v14424_v56, %v14424_v56  ;;  %v14431_v9 = vmul.f32 %v14425_v60, %v14425_v60  ;;  %v14432_v59 = vmul.f32 %v14426_v12, %v14426_v12  ;;  %v14433_v30 = vmul.f32 %v14427_v51, %v14427_v51 }
 0x82e   :  { %v14434_v22 = vmul.f32 %v14428_v35, %v14428_v35  ;;  %v14435_v45 = vmul.f32 %v14429_v53, %v14429_v53 }
 0x82f   :  { %v14436_v63 = vsel %vm14402_vm9, %v14430_v54, 0.0  ;;  %v14437_v25 = vsel %vm14402_vm9, %v14431_v9, 0.0  ;;  %v14439_v5 = vsel %vm14402_vm9, %v14432_v59, 0.0  ;;  %v14441_v46 = vsel %vm14402_vm9, %v14433_v30, 0.0 }
 0x830   :  { %v14438_v52 = vadd.f32 %v14437_v25, %v14436_v63  ;;  %v14443_v62 = vsel %vm14402_vm9, %v14434_v22, 0.0  ;;  %v14445_v18 = vsel %vm14412_vm10, %v14435_v45, 0.0 }
 0x832   :  { %v14440_v15 = vadd.f32 %v14439_v5, %v14438_v52 }
 0x834   :  { %v14442_v14 = vadd.f32 %v14441_v46, %v14440_v15 }
 0x836   :  { %v14444_v29 = vadd.f32 %v14443_v62, %v14442_v14  ;;  %v27598_v62 = vld [vmem:[%s31008_s7 + $0x4] sm:$0xf] }
 0x838   :  { %v14446_v43 = vadd.f32 %v14445_v18, %v14444_v29 }
 0x83a   :  { %14447 = vadd.xlane.f32.xlu1 %v14446_v43 }
 0x84b   :  { %14466 = vperm.xlu1 %28615, %v1457_v10  }
 0x8c7   :  { %v14448_v37 = vpop.xlane.xlu1 %14447 }
 0x8c8   :  { %v14449_v47 = vmul.f32 0.001953125, %v14448_v37 }
 0x8ca   :  { %v14450_v1 = vadd.f32 1e-05, %v14449_v47 }
 0x8cb   :  { %v14467_v20 = vpop.permute.xlu1 %14466 }
 0x8cc   :  { %28619 = vrsqrt.f32 %v14450_v1 }
 0x8d6   :  { %v28620_v48 = vpop.eup %28619 }
 0x8d7   :  { %v14452_v21 = vmul.f32 %v28620_v48, %v1456_v42 }
 0x8d9   :  { %14455 = vperm.xlu0 %28614, %v14452_v21  }
 0x958   :  { %v14456_v4 = vpop.permute.xlu0 %14455 }
 0x959   :  { %v14458_v40 = vmul.f32 %v14456_v4, %v14418_v7  ;;  %v14459_v16 = vmul.f32 %v14456_v4, %v14419_v57  ;;  %v14460_v27 = vmul.f32 %v14456_v4, %v14420_v19  ;;  %v14461_v32 = vmul.f32 %v14456_v4, %v14421_v28 }
 0x95a   :  { %v14462_v23 = vmul.f32 %v14456_v4, %v14422_v33  ;;  %v14463_v38 = vmul.f32 %v14456_v4, %v14423_v34 }
 0x95b   :  { %v14469_v41 = vadd.f32 %v14467_v20, %v14458_v40  ;;  %v14470_v24 = vadd.f32 %v14467_v20, %v14459_v16  ;;  %v14471_v26 = vadd.f32 %v14467_v20, %v14460_v27  ;;  %v14472_v11 = vadd.f32 %v14467_v20, %v14461_v32 }
 0x95c   :  { %v14473_v58 = vadd.f32 %v14467_v20, %v14462_v23  ;;  %v14474_v49 = vadd.f32 %v14467_v20, %v14463_v38 }
 0x95d   :  { %v14475_v44 = vmax.f32 %v14469_v41, 0.0  ;;  %v14476_v13 = vmax.f32 %v14470_v24, 0.0  ;;  %v14477_v17 = vmax.f32 %v14471_v26, 0.0  ;;  %v14478_v39 = vmax.f32 %v14472_v11, 0.0 }
 0x95e   :  { %v14479_v7 = vmax.f32 %v14473_v58, 0.0  ;;  %v14480_v33 = vmax.f32 %v14474_v49, 0.0 }
 0x95f   :  { %v14485_v31 = vmul.f32 %v14475_v44, %v30213_v0  ;;  %v14486_v61 = vmul.f32 %v14476_v13, %v30215_v55  ;;  %v14487_v19 = vmul.f32 %v14477_v17, %v30222_v36  ;;  %v14488_v28 = vmul.f32 %v14478_v39, %v30227_v6 }
 0x960   :  { %v14489_v56 = vmul.f32 %v14479_v7, %v30234_v50  ;;  %v14490_v60 = vmul.f32 %v14480_v33, %v30236_v8 }
 0x961   :  { %v14497_v57 = vcombine.low %v14485_v31, %v14486_v61  ;;  %v14498_v34 = vcombine.low %v14487_v19, %v14488_v28 }
 0x962   :  { %v14499_v12 = vcombine.low %v14489_v56, %v14490_v60 }
 0x963   :  { %14500 = vrot.lane.b32.xlu1 %v14497_v57, %s28627_s23 }
 0x967   :  { %14502 = vrot.lane.b32.xlu1 %v14498_v34, %s28627_s23 }
 0x96b   :  { %14504 = vrot.lane.b32.xlu1 %v14499_v12, %s28627_s23 }
 0x9d5   :  { %v14501_v51 = vpop.permute.xlu1 %14500 }
 0x9d6   :  { %v14506_v35 = vrot.slane %v14501_v51, 4 }
 0x9d8   :  { %v14509_v54 = vsel %vm1294_vm7, %v14506_v35, %v14501_v51 }
 0x9d9   :  { %14520 = vst.msk [vmem:[#allocation3] sm:$0xff] %vm14519_vm0, %v14509_v54  ;;  %v14503_v9 = vpop.permute.xlu1 %14502 }
 0x9da   :  { %v14507_v59 = vrot.slane %v14503_v9, 4 }
 0x9dc   :  { %v14510_v53 = vsel %vm14402_vm9, %v14506_v35, %v14507_v59 }
 0x9dd   :  { %v30277_v30 = vsel %vm1294_vm7, %v14510_v53, %v14503_v9  ;;  %v14505_v63 = vpop.permute.xlu1 %14504 }
 0x9de   :  { %v14508_v25 = vrot.slane %v14505_v63, 4  ;;  %14543 = vrot.lane.b32.xlu1 %v30277_v30, %s28630_s2  ;;  %v30283_v52 = vcombine.high %v30277_v30, %v30277_v30 }
 0x9e0   :  { %v14512_v22 = vsel %vm14402_vm9, %v14507_v59, %v14508_v25  ;;  %14545 = vrot.lane.b32.xlu0 %v30283_v52, %s28630_s2  ;;  %v30289_v5 = vld [vmem:[#allocation3] sm:$0xff] }
 0x9e1   :  { %v14513_v15 = vsel %vm1294_vm7, %v14512_v22, %v14505_v63  ;;  %v30294_v45 = vcombine.high %v30289_v5, %v30289_v5  ;;  %vm14556_vm7 = vcmask 31744  }
 0x9e2   :  { %14524 = vst.msk [vmem:[#allocation3 + $0x10] sm:$0xff] %vm14523_vm12, %v14513_v15  ;;  %v14558_v29 = vsel %vm14556_vm7, %v27598_v62, 0 }
 0x9e3   :  { %14541 = vrot.lane.b32.xlu1 %v30294_v45, %s28630_s2  ;;  %v30398_v18 = vand.u32 4294901760, %v14558_v29 }
 0x9e5   :  { %v30401_v43 = vsub.f32 %v14558_v29, %v30398_v18 }
 0x9e7   :  { %14539 = vrot.lane.b32.xlu1 %v30289_v5, %s28630_s2  ;;  %v30404_v10 = vand.u32 4294901760, %v30401_v43 }
 0x9e9   :  { %v30300_v46 = vld [vmem:[#allocation3 + $0x10] sm:$0xff]  ;;  %v14642_v42 = vsub.f32 %v30401_v43, %v30404_v10 }
 0x9ea   :  { %v30304_v14 = vcombine.high %v30300_v46, %v30300_v46 }
 0x9eb   :  { %14547 = vrot.lane.b32.xlu1 %v30300_v46, %s28630_s2  ;;  %v30412_v16 = vand.u32 4294901760, %v14642_v42 }
 0x9ec   :  { %14549 = vrot.lane.b32.xlu0 %v30304_v14, %s28630_s2 }
 0x9ef   :  { %17390 = vrot.lane.b32.xlu1 %v30294_v45, %s28631_s0 }
 0x9f0   :  { %17392 = vrot.lane.b32.xlu0 %v30277_v30, %s28631_s0 }
 0x9f3   :  { %17388 = vrot.lane.b32.xlu1 %v30289_v5, %s28631_s0 }
 0x9f4   :  { %17394 = vrot.lane.b32.xlu0 %v30283_v52, %s28631_s0 }
 0x9f7   :  { %17396 = vrot.lane.b32.xlu1 %v30300_v46, %s28631_s0 }
 0x9f8   :  { %17398 = vrot.lane.b32.xlu0 %v30304_v14, %s28631_s0 }
 0x9fb   :  { %18834 = vrot.lane.b32.xlu1 %v30294_v45, %s28632_s27 }
 0x9fc   :  { %18836 = vrot.lane.b32.xlu0 %v30277_v30, %s28632_s27 }
 0x9ff   :  { %18832 = vrot.lane.b32.xlu1 %v30289_v5, %s28632_s27 }
 0xa00   :  { %18838 = vrot.lane.b32.xlu0 %v30283_v52, %s28632_s27 }
 0xa03   :  { %18840 = vrot.lane.b32.xlu1 %v30300_v46, %s28632_s27 }
 0xa04   :  { %18842 = vrot.lane.b32.xlu0 %v30304_v14, %s28632_s27 }
 0xa07   :  { %20278 = vrot.lane.b32.xlu1 %v30294_v45, %s28633_s28 }
 0xa08   :  { %20280 = vrot.lane.b32.xlu0 %v30277_v30, %s28633_s28 }
 0xa0b   :  { %20276 = vrot.lane.b32.xlu1 %v30289_v5, %s28633_s28 }
 0xa0c   :  { %20282 = vrot.lane.b32.xlu0 %v30283_v52, %s28633_s28 }
 0xa0f   :  { %20284 = vrot.lane.b32.xlu1 %v30300_v46, %s28633_s28 }
 0xa10   :  { %20286 = vrot.lane.b32.xlu0 %v30304_v14, %s28633_s28 }
 0xa13   :  { %21722 = vrot.lane.b32.xlu1 %v30294_v45, %s28634_s29 }
 0xa14   :  { %21724 = vrot.lane.b32.xlu0 %v30277_v30, %s28634_s29 }
 0xa17   :  { %21720 = vrot.lane.b32.xlu1 %v30289_v5, %s28634_s29 }
 0xa18   :  { %21726 = vrot.lane.b32.xlu0 %v30283_v52, %s28634_s29 }
 0xa1b   :  { %21728 = vrot.lane.b32.xlu1 %v30300_v46, %s28634_s29 }
 0xa1c   :  { %21730 = vrot.lane.b32.xlu0 %v30304_v14, %s28634_s29 }
 0xa1f   :  { %23166 = vrot.lane.b32.xlu1 %v30294_v45, %s28635_s12 }
 0xa20   :  { %23168 = vrot.lane.b32.xlu0 %v30277_v30, %s28635_s12 }
 0xa23   :  { %23164 = vrot.lane.b32.xlu1 %v30289_v5, %s28635_s12 }
 0xa24   :  { %23170 = vrot.lane.b32.xlu0 %v30283_v52, %s28635_s12 }
 0xa27   :  { %23172 = vrot.lane.b32.xlu1 %v30300_v46, %s28635_s12 }
 0xa28   :  { %23174 = vrot.lane.b32.xlu0 %v30304_v14, %s28635_s12 }
 0xa2b   :  { %24610 = vrot.lane.b32.xlu1 %v30294_v45, %s28636_s13 }
 0xa2c   :  { %24612 = vrot.lane.b32.xlu0 %v30277_v30, %s28636_s13 }
 0xa2f   :  { %24608 = vrot.lane.b32.xlu1 %v30289_v5, %s28636_s13 }
 0xa30   :  { %24614 = vrot.lane.b32.xlu0 %v30283_v52, %s28636_s13 }
 0xa33   :  { %24616 = vrot.lane.b32.xlu1 %v30300_v46, %s28636_s13 }
 0xa34   :  { %24618 = vrot.lane.b32.xlu0 %v30304_v14, %s28636_s13 }
 0xa37   :  { %26054 = vrot.lane.b32.xlu1 %v30294_v45, %s28637_s14 }
 0xa38   :  { %26056 = vrot.lane.b32.xlu0 %v30277_v30, %s28637_s14 }
 0xa3b   :  { %26052 = vrot.lane.b32.xlu1 %v30289_v5, %s28637_s14 }
 0xa3c   :  { %26058 = vrot.lane.b32.xlu0 %v30283_v52, %s28637_s14 }
 0xa3f   :  { %26060 = vrot.lane.b32.xlu1 %v30300_v46, %s28637_s14 }
 0xa40   :  { %26062 = vrot.lane.b32.xlu0 %v30304_v14, %s28637_s14 }
 0xa50   :  { %v14544_v2 = vpop.permute.xlu1 %14543 }
 0xa52   :  { %v14546_v49 = vpop.permute.xlu0 %14545 }
 0xa53   :  { %v14553_v13 = vsel %vm1485_vm14, %v14544_v2, %v14546_v49 }
 0xa54   :  { %v14564_v39 = vsel %vm14402_vm9, %v14553_v13, 0 }
 0xa55   :  { %v14542_v37 = vpop.permute.xlu1 %14541  ;;  %v15039_v61 = vand.u32 4294901760, %v14564_v39 }
 0xa56   :  { %v14552_v47 = vsel %vm1485_vm14, %v14542_v37, %v14544_v2 }
 0xa57   :  { %v14562_v1 = vsel %vm14402_vm9, %v14552_v47, 0  ;;  %v15122_v57 = vsub.f32 %v14564_v39, %v15039_v61  ;;  %v15972_v47 = vsel %vm14402_vm9, %v30294_v45, 0 }
 0xa58   :  { %v14572_v48 = vand.u32 4294901760, %v14562_v1  ;;  %v15982_v42 = vand.u32 4294901760, %v15972_v47 }
 0xa59   :  { %v14540_v21 = vpop.permute.xlu1 %14539  ;;  %v15123_v28 = vand.u32 4294901760, %v15122_v57 }
 0xa5a   :  { %v14651_v4 = vsub.f32 %v14562_v1, %v14572_v48  ;;  %v14551_v20 = vsel %vm1485_vm14, %v14540_v21, %v14542_v37  ;;  %14573 = vmatprep.subr.mxu1 %v14572_v48  ;;  %v14530_v37 = vld [vmem:[%s31008_s7] sm:$0xf] }
 0xa5b   :  { %v14560_v40 = vsel %vm14402_vm9, %v14551_v20, 0  ;;  %v15124_v34 = vsub.f32 %v15122_v57, %v15123_v28  ;;  %v15968_v1 = vsel %vm14556_vm7, %v14530_v37, 0 }
 0xa5c   :  { %v14574_v27 = vand.u32 4294901760, %v14560_v40  ;;  %v14652_v32 = vand.u32 4294901760, %v14651_v4 }
 0xa5d   :  { %v14548_v58 = vpop.permute.xlu1 %14547  ;;  %v15125_v60 = vand.u32 4294901760, %v15124_v34 }
 0xa5e   :  { %v14657_v23 = vsub.f32 %v14560_v40, %v14574_v27  ;;  %14575 = vmatpush1.msra.mxu1 %v14574_v27  ;;  %v14653_v38 = vsub.f32 %v14651_v4, %v14652_v32  ;;  %v14554_v44 = vsel %vm1485_vm14, %v14546_v49, %v14548_v58  ;;  %v14550_v12 = vpop.permute.xlu0 %14549 }
 0xa5f   :  { %14644 = vmatmul.mubr.f32.vlgmr.msra.gmra.mrb[2].mxu1 %v30412_v16  ;;  %v14566_v17 = vsel %vm14402_vm9, %v14554_v44, 0  ;;  %v14570_v51 = vsel %vm14402_vm9, %v14550_v12, 0  ;;  %v14555_v35 = vsel %vm1485_vm14, %v14548_v58, %v14550_v12  ;;  %vm27582_vm14 = vcmask 64516  }
 0xa60   :  { %v14658_v41 = vand.u32 4294901760, %v14657_v23  ;;  %14724 = vmatprep.mubr.f32.mxu1 %v31035_v3  ;;  %v14654_v24 = vand.u32 4294901760, %v14653_v38  ;;  %v15037_v31 = vand.u32 4294901760, %v14566_v17  ;;  %v15502_v54 = vand.u32 4294901760, %v14570_v51 }
 0xa61   :  { %v14568_v9 = vsel %vm14402_vm9, %v14555_v35, 0  ;;  %v17391_v12 = vpop.permute.xlu1 %17390 }
 0xa62   :  { %v14659_v26 = vsub.f32 %v14657_v23, %v14658_v41  ;;  %14655 = vmatprep.subr.mxu1 %v14654_v24  ;;  %v15116_v7 = vsub.f32 %v14566_v17, %v15037_v31  ;;  %v15504_v59 = vand.u32 4294901760, %v14568_v9  ;;  %v15581_v53 = vsub.f32 %v14570_v51, %v15502_v54  ;;  %v17393_v51 = vpop.permute.xlu0 %17392 }
 0xa63   :  { %v15974_v24 = vsel %vm14402_vm9, %v30277_v30, 0  ;;  %v17401_v35 = vsel %vm4327_vm6, %v17391_v12, %v17393_v51 }
 0xa64   :  { %v14660_v11 = vand.u32 4294901760, %v14659_v26  ;;  %v15117_v19 = vand.u32 4294901760, %v15116_v7  ;;  %v15587_v63 = vsub.f32 %v14568_v9, %v15504_v59  ;;  %v15582_v25 = vand.u32 4294901760, %v15581_v53  ;;  %v27599_v9 = vld [vmem:[%s31008_s7 + $0x8] sm:$0xf] }
 0xa66   :  { %14661 = vmatpush1.msra.mxu1 %v14660_v11  ;;  %v15118_v33 = vsub.f32 %v15116_v7, %v15117_v19  ;;  %v15588_v22 = vand.u32 4294901760, %v15587_v63  ;;  %v15583_v15 = vsub.f32 %v15581_v53, %v15582_v25  ;;  %v16449_v11 = vand.u32 4294901760, %v15974_v24 }
 0xa67   :  { %14726 = vmatmul.mubr.f32.vlgmr.msra.gmra.mrb[2].mxu1 %v30398_v18  ;;  %14734 = vmatprep.subr.mxu1 %v14651_v4  ;;  %v16061_v4 = vsub.f32 %v15972_v47, %v15982_v42 }
 0xa68   :  { %14737 = vmatpush1.msra.mxu1 %v14657_v23  ;;  %14800 = vmatprep.mubr.f32.mxu1 %v31035_v3  ;;  %v15119_v56 = vand.u32 4294901760, %v15118_v33  ;;  %v15589_v62 = vsub.f32 %v15587_v63, %v15588_v22  ;;  %v15584_v29 = vand.u32 4294901760, %v15583_v15  ;;  %v16532_v49 = vsub.f32 %v15974_v24, %v16449_v11 }
 0xa69   :  { %14810 = vmatprep.subr.mxu1 %v14572_v48  ;;  %v16062_v40 = vand.u32 4294901760, %v16061_v4 }
 0xa6a   :  { %v15590_v2 = vand.u32 4294901760, %v15589_v62 }
 0xa6f   :  { %14803 = vmatmul.mubr.f32.vlgmr.msra.gmra.mrb[2].mxu1 %v30401_v43 }
 0xa70   :  { %14812 = vmatpush1.msra.mxu1 %v14574_v27  ;;  %14875 = vmatprep.mubr.f32.mxu1 %v31035_v3 }
 0xa71   :  { %14888 = vmatprep.subr.mxu1 %v14652_v32 }
 0xa77   :  { %14879 = vmatmul.mubr.f32.vlgmr.msra.gmra.mrb[2].mxu1 %v30404_v10 }
 0xa78   :  { %14892 = vmatpush1.msra.mxu1 %v14658_v41  ;;  %14955 = vmatprep.mubr.f32.mxu1 %v31035_v3 }
 0xa79   :  { %14964 = vmatprep.subr.mxu1 %v14572_v48  ;;  %v15970_v48 = vsel %vm14402_vm9, %v30289_v5, 0 }
 0xa7a   :  { %v15984_v21 = vand.u32 4294901760, %v15970_v48 }
 0xa7c   :  { %v16067_v45 = vsub.f32 %v15970_v48, %v15984_v21 }
 0xa7e   :  { %v16068_v5 = vand.u32 4294901760, %v16067_v45 }
 0xa7f   :  { %14957 = vmatmul.mubr.f32.vlgmr.msra.gmra.mrb[2].mxu1 %v30398_v18 }
 0xa80   :  { %14966 = vmatpush1.msra.mxu1 %v14574_v27  ;;  %15029 = vmatprep.mubr.f32.mxu1 %v31035_v3  ;;  %v16069_v32 = vsub.f32 %v16067_v45, %v16068_v5 }
 0xa81   :  { %15038 = vmatprep.subr.mxu1 %v15037_v31 }
 0xa82   :  { %v16070_v41 = vand.u32 4294901760, %v16069_v32 }
 0xa87   :  { %15031 = vmatmul.mubr.f32.vlgmr.msra.gmra.mrb[2].mxu1 %v30398_v18 }
 0xa88   :  { %15040 = vmatpush1.msra.mxu1 %v15039_v61  ;;  %15103 = vmatprep.mubr.f32.mxu1 %v31035_v3 }
 0xa89   :  { %15120 = vmatprep.subr.mxu1 %v15119_v56 }
 0xa8b   :  { %15109 = vmatmul.mubr.f32.vlgmr.msra.gmra.mrb[4].mxu1 %v30412_v16 }
 0xa8c   :  { %15126 = vmatpush1.msra.mxu1 %v15125_v60  ;;  %15189 = vmatprep.mubr.f32.mxu1 %v31035_v3 }
 0xa8d   :  { %15199 = vmatprep.subr.mxu1 %v15116_v7  ;;  %v15978_v7 = vsel %vm14402_vm9, %v30300_v46, 0 }
 0xa93   :  { %15191 = vmatmul.mubr.f32.vlgmr.msra.gmra.mrb[4].mxu1 %v30398_v18 }
 0xa94   :  { %15202 = vmatpush1.msra.mxu1 %v15122_v57  ;;  %15265 = vmatprep.mubr.f32.mxu1 %v31035_v3  ;;  %v16914_v57 = vand.u32 4294901760, %v15978_v7 }
 0xa95   :  { %15275 = vmatprep.subr.mxu1 %v15037_v31 }
 0xa9b   :  { %15268 = vmatmul.mubr.f32.vlgmr.msra.gmra.mrb[4].mxu1 %v30401_v43 }
 0xa9c   :  { %15277 = vmatpush1.msra.mxu1 %v15039_v61  ;;  %15340 = vmatprep.mubr.f32.mxu1 %v31035_v3 }
 0xa9d   :  { %15353 = vmatprep.subr.mxu1 %v15117_v19 }
 0xaa3   :  { %15344 = vmatmul.mubr.f32.vlgmr.msra.gmra.mrb[4].mxu1 %v30404_v10 }
 0xaa4   :  { %15357 = vmatpush1.msra.mxu1 %v15123_v28  ;;  %15420 = vmatprep.mubr.f32.mxu1 %v31035_v3  ;;  %v16997_v28 = vsub.f32 %v15978_v7, %v16914_v57 }
 0xaa5   :  { %15429 = vmatprep.subr.mxu1 %v15037_v31  ;;  %v15980_v31 = vsel %vm14402_vm9, %v30304_v14, 0 }
 0xaa6   :  { %v16998_v14 = vand.u32 4294901760, %v16997_v28 }
 0xaa8   :  { %v16999_v56 = vsub.f32 %v16997_v28, %v16998_v14 }
 0xaaa   :  { %v17000_v60 = vand.u32 4294901760, %v16999_v56 }
 0xaab   :  { %15422 = vmatmul.mubr.f32.vlgmr.msra.gmra.mrb[4].mxu1 %v30398_v18 }
 0xaac   :  { %15431 = vmatpush1.msra.mxu1 %v15039_v61  ;;  %15494 = vmatprep.mubr.f32.mxu1 %v31035_v3  ;;  %v16912_v61 = vand.u32 4294901760, %v15980_v31 }
 0xaad   :  { %15503 = vmatprep.subr.mxu1 %v15502_v54 }
 0xaae   :  { %v16991_v19 = vsub.f32 %v15980_v31, %v16912_v61 }
 0xab0   :  { %v16992_v33 = vand.u32 4294901760, %v16991_v19 }
 0xab2   :  { %v16993_v34 = vsub.f32 %v16991_v19, %v16992_v33 }
 0xab3   :  { %15496 = vmatmul.mubr.f32.vlgmr.msra.gmra.mrb[4].mxu1 %v30398_v18 }
 0xab4   :  { %15505 = vmatpush1.msra.mxu1 %v15504_v59  ;;  %15568 = vmatprep.mubr.f32.mxu1 %v31035_v3  ;;  %v16994_v46 = vand.u32 4294901760, %v16993_v34 }
 0xab5   :  { %15585 = vmatprep.subr.mxu1 %v15584_v29 }
 0xab7   :  { %15574 = vmatmul.mubr.f32.vlgmr.msra.gmra.mrb[6].mxu1 %v30412_v16  ;;  %v16063_v16 = vsub.f32 %v16061_v4, %v16062_v40 }
 0xab8   :  { %15591 = vmatpush1.msra.mxu1 %v15590_v2  ;;  %15654 = vmatprep.mubr.f32.mxu1 %v31035_v3 }
 0xab9   :  { %15664 = vmatprep.subr.mxu1 %v15581_v53  ;;  %v16064_v23 = vand.u32 4294901760, %v16063_v16 }
 0xabf   :  { %15656 = vmatmul.mubr.f32.vlgmr.msra.gmra.mrb[6].mxu1 %v30398_v18 }
 0xac0   :  { %15667 = vmatpush1.msra.mxu1 %v15587_v63  ;;  %15730 = vmatprep.mubr.f32.mxu1 %v31035_v3  ;;  %v17406_v63 = vsel %vm14556_vm7, %v27599_v9, 0 }
 0xac1   :  { %15740 = vmatprep.subr.mxu1 %v15502_v54  ;;  %v30524_v15 = vand.u32 4294901760, %v17406_v63 }
 0xac3   :  { %v30528_v2 = vsub.f32 %v17406_v63, %v30524_v15 }
 0xac7   :  { %15733 = vmatmul.mubr.f32.vlgmr.msra.gmra.mrb[6].mxu1 %v30401_v43  ;;  %v30460_v43 = vand.u32 4294901760, %v15968_v1 }
 0xac8   :  { %15742 = vmatpush1.msra.mxu1 %v15504_v59  ;;  %15805 = vmatprep.mubr.f32.mxu1 %v31035_v3 }
 0xac9   :  { %15818 = vmatprep.subr.mxu1 %v15582_v25  ;;  %v30464_v20 = vsub.f32 %v15968_v1, %v30460_v43  ;;  %v30532_v1 = vand.u32 4294901760, %v30528_v2 }
 0xacf   :  { %15809 = vmatmul.mubr.f32.vlgmr.msra.gmra.mrb[6].mxu1 %v30404_v10  ;;  %v30468_v10 = vand.u32 4294901760, %v30464_v20 }
 0xad0   :  { %15822 = vmatpush1.msra.mxu1 %v15588_v22  ;;  %15885 = vmatprep.mubr.f32.mxu1 %v31035_v3 }
 0xad1   :  { %15894 = vmatprep.subr.mxu1 %v15502_v54  ;;  %v16052_v27 = vsub.f32 %v30464_v20, %v30468_v10  ;;  %v17389_v54 = vpop.permute.xlu1 %17388 }
 0xad2   :  { %v17400_v53 = vsel %vm4327_vm6, %v17389_v54, %v17391_v12 }
 0xad3   :  { %v30474_v38 = vand.u32 4294901760, %v16052_v27  ;;  %v17408_v22 = vsel %vm14402_vm9, %v17400_v53, 0 }
 0xad4   :  { %v17422_v62 = vand.u32 4294901760, %v17408_v22 }
 0xad6   :  { %v17505_v37 = vsub.f32 %v17408_v22, %v17422_v62 }
 0xad7   :  { %15887 = vmatmul.mubr.f32.vlgmr.msra.gmra.mrb[6].mxu1 %v30398_v18 }
 0xad8   :  { %15896 = vmatpush1.msra.mxu1 %v15504_v59  ;;  %15959 = vmatprep.mubr.f32.mxu1 %v31035_v3  ;;  %v17410_v59 = vsel %vm14402_vm9, %v17401_v35, 0 }
 0xad9   :  { %15983 = vmatprep.subr.mxu1 %v15982_v42  ;;  %v17420_v25 = vand.u32 4294901760, %v17410_v59 }
 0xadb   :  { %v17499_v29 = vsub.f32 %v17410_v59, %v17420_v25 }
 0xadd   :  { %v17500_v47 = vand.u32 4294901760, %v17499_v29 }
 0xadf   :  { %15961 = vmatmul.mubr.f32.vlgmr.msra.gmra.mrb[6].mxu1 %v30398_v18  ;;  %v15976_v18 = vsel %vm14402_vm9, %v30283_v52, 0  ;;  %v16533_v52 = vand.u32 4294901760, %v16532_v49  ;;  %v17501_v48 = vsub.f32 %v17499_v29, %v17500_v47 }
 0xae0   :  { %15985 = vmatpush1.msra.mxu1 %v15984_v21  ;;  %16048 = vmatprep.mubr.f32.mxu1 %v31035_v3  ;;  %v16447_v26 = vand.u32 4294901760, %v15976_v18 }
 0xae1   :  { %16065 = vmatprep.subr.mxu1 %v16064_v23  ;;  %v16534_v30 = vsub.f32 %v16532_v49, %v16533_v52 }
 0xae2   :  { %v16526_v58 = vsub.f32 %v15976_v18, %v16447_v26 }
 0xae3   :  { %16054 = vmatmul.mubr.f32.vlgmr.msra.gmra.mrb[2].mxu1 %v30474_v38  ;;  %v16535_v39 = vand.u32 4294901760, %v16534_v30 }
 0xae4   :  { %16071 = vmatpush1.msra.mxu1 %v16070_v41  ;;  %16134 = vmatprep.mubr.f32.mxu1 %v31035_v3  ;;  %v16527_v44 = vand.u32 4294901760, %v16526_v58 }
 0xae5   :  { %16144 = vmatprep.subr.mxu1 %v16061_v4 }
 0xae6   :  { %v16528_v13 = vsub.f32 %v16526_v58, %v16527_v44 }
 0xae8   :  { %v16529_v17 = vand.u32 4294901760, %v16528_v13 }
 0xaeb   :  { %16136 = vmatmul.mubr.f32.vlgmr.msra.gmra.mrb[2].mxu1 %v30460_v43 }
 0xaec   :  { %16147 = vmatpush1.msra.mxu1 %v16067_v45  ;;  %16210 = vmatprep.mubr.f32.mxu1 %v31035_v3 }
 0xaed   :  { %16220 = vmatprep.subr.mxu1 %v15982_v42 }
 0xaf3   :  { %16213 = vmatmul.mubr.f32.vlgmr.msra.gmra.mrb[2].mxu1 %v30464_v20 }
 0xaf4   :  { %16222 = vmatpush1.msra.mxu1 %v15984_v21  ;;  %16285 = vmatprep.mubr.f32.mxu1 %v31035_v3 }
 0xaf5   :  { %16298 = vmatprep.subr.mxu1 %v16062_v40 }
 0xafb   :  { %16289 = vmatmul.mubr.f32.vlgmr.msra.gmra.mrb[2].mxu1 %v30468_v10 }
 0xafc   :  { %16302 = vmatpush1.msra.mxu1 %v16068_v5  ;;  %16365 = vmatprep.mubr.f32.mxu1 %v31035_v3 }
 0xafd   :  { %16374 = vmatprep.subr.mxu1 %v15982_v42  ;;  %v17506_v42 = vand.u32 4294901760, %v17505_v37 }
 0xaff   :  { %v17507_v4 = vsub.f32 %v17505_v37, %v17506_v42 }
 0xb01   :  { %v17508_v40 = vand.u32 4294901760, %v17507_v4 }
 0xb03   :  { %16367 = vmatmul.mubr.f32.vlgmr.msra.gmra.mrb[2].mxu1 %v30460_v43 }
 0xb04   :  { %16376 = vmatpush1.msra.mxu1 %v15984_v21  ;;  %16439 = vmatprep.mubr.f32.mxu1 %v31035_v3  ;;  %v17490_v21 = vsub.f32 %v30528_v2, %v30532_v1 }
 0xb05   :  { %16448 = vmatprep.subr.mxu1 %v16447_v26 }
 0xb06   :  { %v30538_v45 = vand.u32 4294901760, %v17490_v21 }
 0xb0b   :  { %16441 = vmatmul.mubr.f32.vlgmr.msra.gmra.mrb[2].mxu1 %v30460_v43 }
 0xb0c   :  { %16450 = vmatpush1.msra.mxu1 %v16449_v11  ;;  %16513 = vmatprep.mubr.f32.mxu1 %v31035_v3 }
 0xb0d   :  { %16530 = vmatprep.subr.mxu1 %v16529_v17 }
 0xb0f   :  { %16519 = vmatmul.mubr.f32.vlgmr.msra.gmra.mrb[4].mxu1 %v30474_v38 }
 0xb10   :  { %16536 = vmatpush1.msra.mxu1 %v16535_v39  ;;  %16599 = vmatprep.mubr.f32.mxu1 %v31035_v3 }
 0xb11   :  { %16609 = vmatprep.subr.mxu1 %v16526_v58 }
 0xb17   :  { %16601 = vmatmul.mubr.f32.vlgmr.msra.gmra.mrb[4].mxu1 %v30460_v43 }
 0xb18   :  { %16612 = vmatpush1.msra.mxu1 %v16532_v49  ;;  %16675 = vmatprep.mubr.f32.mxu1 %v31035_v3 }
 0xb19   :  { %16685 = vmatprep.subr.mxu1 %v16447_v26 }
 0xb1f   :  { %16678 = vmatmul.mubr.f32.vlgmr.msra.gmra.mrb[4].mxu1 %v30464_v20 }
 0xb20   :  { %16687 = vmatpush1.msra.mxu1 %v16449_v11  ;;  %16750 = vmatprep.mubr.f32.mxu1 %v31035_v3 }
 0xb21   :  { %16763 = vmatprep.subr.mxu1 %v16527_v44 }
 0xb27   :  { %16754 = vmatmul.mubr.f32.vlgmr.msra.gmra.mrb[4].mxu1 %v30468_v10 }
 0xb28   :  { %16767 = vmatpush1.msra.mxu1 %v16533_v52  ;;  %16830 = vmatprep.mubr.f32.mxu1 %v31035_v3 }
 0xb29   :  { %16839 = vmatprep.subr.mxu1 %v16447_v26 }
 0xb2f   :  { %16832 = vmatmul.mubr.f32.vlgmr.msra.gmra.mrb[4].mxu1 %v30460_v43 }
 0xb30   :  { %16841 = vmatpush1.msra.mxu1 %v16449_v11  ;;  %16904 = vmatprep.mubr.f32.mxu1 %v31035_v3 }
 0xb31   :  { %16913 = vmatprep.subr.mxu1 %v16912_v61 }
 0xb37   :  { %16906 = vmatmul.mubr.f32.vlgmr.msra.gmra.mrb[4].mxu1 %v30460_v43 }
 0xb38   :  { %16915 = vmatpush1.msra.mxu1 %v16914_v57  ;;  %16978 = vmatprep.mubr.f32.mxu1 %v31035_v3 }
 0xb39   :  { %16995 = vmatprep.subr.mxu1 %v16994_v46 }
 0xb3b   :  { %16984 = vmatmul.mubr.f32.vlgmr.msra.gmra.mrb[6].mxu1 %v30474_v38 }
 0xb3c   :  { %17001 = vmatpush1.msra.mxu1 %v17000_v60  ;;  %17064 = vmatprep.mubr.f32.mxu1 %v31035_v3 }
 0xb3d   :  { %17074 = vmatprep.subr.mxu1 %v16991_v19 }
 0xb43   :  { %17066 = vmatmul.mubr.f32.vlgmr.msra.gmra.mrb[6].mxu1 %v30460_v43 }
 0xb44   :  { %17077 = vmatpush1.msra.mxu1 %v16997_v28  ;;  %17140 = vmatprep.mubr.f32.mxu1 %v31035_v3 }
 0xb45   :  { %17150 = vmatprep.subr.mxu1 %v16912_v61 }
 0xb4b   :  { %17143 = vmatmul.mubr.f32.vlgmr.msra.gmra.mrb[6].mxu1 %v30464_v20  ;;  %v17502_v20 = vand.u32 4294901760, %v17501_v48 }
 0xb4c   :  { %17152 = vmatpush1.msra.mxu1 %v16914_v57  ;;  %17215 = vmatprep.mubr.f32.mxu1 %v31035_v3 }
 0xb4d   :  { %17228 = vmatprep.subr.mxu1 %v16992_v33 }
 0xb53   :  { %17219 = vmatmul.mubr.f32.vlgmr.msra.gmra.mrb[6].mxu1 %v30468_v10  ;;  %v17395_v10 = vpop.permute.xlu0 %17394 }
 0xb54   :  { %17232 = vmatpush1.msra.mxu1 %v16998_v14  ;;  %17295 = vmatprep.mubr.f32.mxu1 %v31035_v3  ;;  %v17402_v16 = vsel %vm4327_vm6, %v17393_v51, %v17395_v10  ;;  %v27600_v51 = vld [vmem:[%s31008_s7 + $0xc] sm:$0xf] }
 0xb55   :  { %17304 = vmatprep.subr.mxu1 %v16912_v61  ;;  %v17412_v32 = vsel %vm14402_vm9, %v17402_v16, 0  ;;  %v18850_v9 = vsel %vm14556_vm7, %v27600_v51, 0 }
 0xb56   :  { %v17887_v38 = vand.u32 4294901760, %v17412_v32  ;;  %v30587_v63 = vand.u32 4294901760, %v18850_v9 }
 0xb57   :  { %v17399_v52 = vpop.permute.xlu0 %17398 }
 0xb58   :  { %v17970_v18 = vsub.f32 %v17412_v32, %v17887_v38  ;;  %v17418_v13 = vsel %vm14402_vm9, %v17399_v52, 0 }
 0xb59   :  { %v18350_v17 = vand.u32 4294901760, %v17418_v13 }
 0xb5a   :  { %v17971_v26 = vand.u32 4294901760, %v17970_v18 }
 0xb5b   :  { %17297 = vmatmul.mubr.f32.vlgmr.msra.gmra.mrb[6].mxu1 %v30460_v43  ;;  %v18429_v61 = vsub.f32 %v17418_v13, %v18350_v17  ;;  %v18837_v46 = vpop.permute.xlu0 %18836 }
 0xb5c   :  { %17306 = vmatpush1.msra.mxu1 %v16914_v57  ;;  %17369 = vmatprep.mubr.f32.mxu1 %v31035_v3  ;;  %v17972_v58 = vsub.f32 %v17970_v18, %v17971_v26 }
 0xb5d   :  { %17421 = vmatprep.subr.mxu1 %v17420_v25  ;;  %v18430_v57 = vand.u32 4294901760, %v18429_v61 }
 0xb5e   :  { %v17973_v44 = vand.u32 4294901760, %v17972_v58 }
 0xb5f   :  { %v18431_v28 = vsub.f32 %v18429_v61, %v18430_v57 }
 0xb61   :  { %v18432_v14 = vand.u32 4294901760, %v18431_v28 }
 0xb63   :  { %17371 = vmatmul.mubr.f32.vlgmr.msra.gmra.mrb[6].mxu1 %v30460_v43  ;;  %v17397_v43 = vpop.permute.xlu1 %17396 }
 0xb64   :  { %17423 = vmatpush1.msra.mxu1 %v17422_v62  ;;  %17486 = vmatprep.mubr.f32.mxu1 %v31035_v3  ;;  %v17403_v5 = vsel %vm4327_vm6, %v17395_v10, %v17397_v43  ;;  %v17404_v30 = vsel %vm4327_vm6, %v17397_v43, %v17399_v52 }
 0xb65   :  { %17503 = vmatprep.subr.mxu1 %v17502_v20  ;;  %v17414_v27 = vsel %vm14402_vm9, %v17403_v5, 0  ;;  %v17416_v39 = vsel %vm14402_vm9, %v17404_v30, 0 }
 0xb66   :  { %v17885_v23 = vand.u32 4294901760, %v17414_v27  ;;  %v18352_v31 = vand.u32 4294901760, %v17416_v39 }
 0xb67   :  { %17492 = vmatmul.mubr.f32.vlgmr.msra.gmra.mrb[2].mxu1 %v30538_v45  ;;  %v18835_v56 = vpop.permute.xlu1 %18834 }
 0xb68   :  { %17509 = vmatpush1.msra.mxu1 %v17508_v40  ;;  %17572 = vmatprep.mubr.f32.mxu1 %v31035_v3  ;;  %v17964_v41 = vsub.f32 %v17414_v27, %v17885_v23  ;;  %v18435_v7 = vsub.f32 %v17416_v39, %v18352_v31  ;;  %v18845_v60 = vsel %vm5763_vm8, %v18835_v56, %v18837_v46 }
 0xb69   :  { %17582 = vmatprep.subr.mxu1 %v17499_v29  ;;  %v18854_v35 = vsel %vm14402_vm9, %v18845_v60, 0 }
 0xb6a   :  { %v17965_v24 = vand.u32 4294901760, %v17964_v41  ;;  %v18436_v19 = vand.u32 4294901760, %v18435_v7  ;;  %v18864_v59 = vand.u32 4294901760, %v18854_v35 }
 0xb6b   :  { %v18833_v12 = vpop.permute.xlu1 %18832 }
 0xb6c   :  { %v17966_v11 = vsub.f32 %v17964_v41, %v17965_v24  ;;  %v18437_v33 = vsub.f32 %v18435_v7, %v18436_v19  ;;  %v18844_v54 = vsel %vm5763_vm8, %v18833_v12, %v18835_v56  ;;  %v18943_v22 = vsub.f32 %v18854_v35, %v18864_v59 }
 0xb6d   :  { %v18852_v53 = vsel %vm14402_vm9, %v18844_v54, 0 }
 0xb6e   :  { %v17967_v49 = vand.u32 4294901760, %v17966_v11  ;;  %v18438_v34 = vand.u32 4294901760, %v18437_v33 }
 0xb6f   :  { %17574 = vmatmul.mubr.f32.vlgmr.msra.gmra.mrb[2].mxu1 %v30524_v15 }
 0xb70   :  { %17585 = vmatpush1.msra.mxu1 %v17505_v37  ;;  %17648 = vmatprep.mubr.f32.mxu1 %v31035_v3 }
 0xb71   :  { %17658 = vmatprep.subr.mxu1 %v17420_v25 }
 0xb77   :  { %17651 = vmatmul.mubr.f32.vlgmr.msra.gmra.mrb[2].mxu1 %v30528_v2 }
 0xb78   :  { %17660 = vmatpush1.msra.mxu1 %v17422_v62  ;;  %17723 = vmatprep.mubr.f32.mxu1 %v31035_v3 }
 0xb79   :  { %17736 = vmatprep.subr.mxu1 %v17500_v47 }
 0xb7f   :  { %17727 = vmatmul.mubr.f32.vlgmr.msra.gmra.mrb[2].mxu1 %v30532_v1 }
 0xb80   :  { %17740 = vmatpush1.msra.mxu1 %v17506_v42  ;;  %17803 = vmatprep.mubr.f32.mxu1 %v31035_v3 }
 0xb81   :  { %17812 = vmatprep.subr.mxu1 %v17420_v25  ;;  %v18866_v25 = vand.u32 4294901760, %v18852_v53 }
 0xb83   :  { %v18949_v29 = vsub.f32 %v18852_v53, %v18866_v25 }
 0xb85   :  { %v18950_v47 = vand.u32 4294901760, %v18949_v29 }
 0xb87   :  { %17805 = vmatmul.mubr.f32.vlgmr.msra.gmra.mrb[2].mxu1 %v30524_v15  ;;  %v18951_v48 = vsub.f32 %v18949_v29, %v18950_v47 }
 0xb88   :  { %17814 = vmatpush1.msra.mxu1 %v17422_v62  ;;  %17877 = vmatprep.mubr.f32.mxu1 %v31035_v3  ;;  %v30591_v62 = vsub.f32 %v18850_v9, %v30587_v63 }
 0xb89   :  { %17886 = vmatprep.subr.mxu1 %v17885_v23  ;;  %v18952_v20 = vand.u32 4294901760, %v18951_v48 }
 0xb8a   :  { %v30595_v37 = vand.u32 4294901760, %v30591_v62 }
 0xb8c   :  { %v18934_v42 = vsub.f32 %v30591_v62, %v30595_v37 }
 0xb8e   :  { %v30601_v4 = vand.u32 4294901760, %v18934_v42 }
 0xb8f   :  { %17879 = vmatmul.mubr.f32.vlgmr.msra.gmra.mrb[2].mxu1 %v30524_v15 }
 0xb90   :  { %17888 = vmatpush1.msra.mxu1 %v17887_v38  ;;  %17951 = vmatprep.mubr.f32.mxu1 %v31035_v3 }
 0xb91   :  { %17968 = vmatprep.subr.mxu1 %v17967_v49 }
 0xb93   :  { %17957 = vmatmul.mubr.f32.vlgmr.msra.gmra.mrb[4].mxu1 %v30538_v45 }
 0xb94   :  { %17974 = vmatpush1.msra.mxu1 %v17973_v44  ;;  %18037 = vmatprep.mubr.f32.mxu1 %v31035_v3 }
 0xb95   :  { %18047 = vmatprep.subr.mxu1 %v17964_v41 }
 0xb9b   :  { %18039 = vmatmul.mubr.f32.vlgmr.msra.gmra.mrb[4].mxu1 %v30524_v15 }
 0xb9c   :  { %18050 = vmatpush1.msra.mxu1 %v17970_v18  ;;  %18113 = vmatprep.mubr.f32.mxu1 %v31035_v3 }
 0xb9d   :  { %18123 = vmatprep.subr.mxu1 %v17885_v23 }
 0xba3   :  { %18116 = vmatmul.mubr.f32.vlgmr.msra.gmra.mrb[4].mxu1 %v30528_v2 }
 0xba4   :  { %18125 = vmatpush1.msra.mxu1 %v17887_v38  ;;  %18188 = vmatprep.mubr.f32.mxu1 %v31035_v3 }
 0xba5   :  { %18201 = vmatprep.subr.mxu1 %v17965_v24 }
 0xbab   :  { %18192 = vmatmul.mubr.f32.vlgmr.msra.gmra.mrb[4].mxu1 %v30532_v1 }
 0xbac   :  { %18205 = vmatpush1.msra.mxu1 %v17971_v26  ;;  %18268 = vmatprep.mubr.f32.mxu1 %v31035_v3 }
 0xbad   :  { %18277 = vmatprep.subr.mxu1 %v17885_v23 }
 0xbb3   :  { %18270 = vmatmul.mubr.f32.vlgmr.msra.gmra.mrb[4].mxu1 %v30524_v15 }
 0xbb4   :  { %18279 = vmatpush1.msra.mxu1 %v17887_v38  ;;  %18342 = vmatprep.mubr.f32.mxu1 %v31035_v3 }
 0xbb5   :  { %18351 = vmatprep.subr.mxu1 %v18350_v17 }
 0xbbb   :  { %18344 = vmatmul.mubr.f32.vlgmr.msra.gmra.mrb[4].mxu1 %v30524_v15 }
 0xbbc   :  { %18353 = vmatpush1.msra.mxu1 %v18352_v31  ;;  %18416 = vmatprep.mubr.f32.mxu1 %v31035_v3 }
 0xbbd   :  { %18433 = vmatprep.subr.mxu1 %v18432_v14 }
 0xbbf   :  { %18422 = vmatmul.mubr.f32.vlgmr.msra.gmra.mrb[6].mxu1 %v30538_v45  ;;  %v18839_v45 = vpop.permute.xlu0 %18838 }
 0xbc0   :  { %18439 = vmatpush1.msra.mxu1 %v18438_v34  ;;  %18502 = vmatprep.mubr.f32.mxu1 %v31035_v3  ;;  %v18846_v43 = vsel %vm5763_vm8, %v18837_v46, %v18839_v45  ;;  %v27601_v46 = vld [vmem:[%s31008_s7 + $0x10] sm:$0xf] }
 0xbc1   :  { %18512 = vmatprep.subr.mxu1 %v18429_v61  ;;  %v18856_v5 = vsel %vm14402_vm9, %v18846_v43, 0  ;;  %v20294_v51 = vsel %vm14556_vm7, %v27601_v46, 0 }
 0xbc2   :  { %v19331_v27 = vand.u32 4294901760, %v18856_v5  ;;  %v30650_v9 = vand.u32 4294901760, %v20294_v51 }
 0xbc3   :  { %v18843_v58 = vpop.permute.xlu0 %18842 }
 0xbc4   :  { %v19414_v23 = vsub.f32 %v18856_v5, %v19331_v27  ;;  %v18862_v49 = vsel %vm14402_vm9, %v18843_v58, 0 }
 0xbc5   :  { %v19794_v52 = vand.u32 4294901760, %v18862_v49 }
 0xbc6   :  { %v19415_v41 = vand.u32 4294901760, %v19414_v23 }
 0xbc7   :  { %18504 = vmatmul.mubr.f32.vlgmr.msra.gmra.mrb[6].mxu1 %v30524_v15  ;;  %v20281_v14 = vpop.permute.xlu0 %20280 }
 0xbc8   :  { %18515 = vmatpush1.msra.mxu1 %v18435_v7  ;;  %18578 = vmatprep.mubr.f32.mxu1 %v31035_v3  ;;  %v19416_v24 = vsub.f32 %v19414_v23, %v19415_v41 }
 0xbc9   :  { %18588 = vmatprep.subr.mxu1 %v18350_v17 }
 0xbca   :  { %v19417_v11 = vand.u32 4294901760, %v19416_v24 }
 0xbcf   :  { %18581 = vmatmul.mubr.f32.vlgmr.msra.gmra.mrb[6].mxu1 %v30528_v2  ;;  %v18944_v2 = vand.u32 4294901760, %v18943_v22 }
 0xbd0   :  { %18590 = vmatpush1.msra.mxu1 %v18352_v31  ;;  %18653 = vmatprep.mubr.f32.mxu1 %v31035_v3 }
 0xbd1   :  { %18666 = vmatprep.subr.mxu1 %v18430_v57 }
 0xbd7   :  { %18657 = vmatmul.mubr.f32.vlgmr.msra.gmra.mrb[6].mxu1 %v30532_v1  ;;  %v18945_v1 = vsub.f32 %v18943_v22, %v18944_v2 }
 0xbd8   :  { %18670 = vmatpush1.msra.mxu1 %v18436_v19  ;;  %18733 = vmatprep.mubr.f32.mxu1 %v31035_v3 }
 0xbd9   :  { %18742 = vmatprep.subr.mxu1 %v18350_v17  ;;  %v18946_v21 = vand.u32 4294901760, %v18945_v1  ;;  %v19873_v17 = vsub.f32 %v18862_v49, %v19794_v52 }
 0xbdf   :  { %18735 = vmatmul.mubr.f32.vlgmr.msra.gmra.mrb[6].mxu1 %v30524_v15 }
 0xbe0   :  { %18744 = vmatpush1.msra.mxu1 %v18352_v31  ;;  %18807 = vmatprep.mubr.f32.mxu1 %v31035_v3  ;;  %v19874_v31 = vand.u32 4294901760, %v19873_v17 }
 0xbe1   :  { %18865 = vmatprep.subr.mxu1 %v18864_v59 }
 0xbe2   :  { %v19875_v7 = vsub.f32 %v19873_v17, %v19874_v31 }
 0xbe4   :  { %v19876_v19 = vand.u32 4294901760, %v19875_v7 }
 0xbe7   :  { %18809 = vmatmul.mubr.f32.vlgmr.msra.gmra.mrb[6].mxu1 %v30524_v15  ;;  %v18841_v15 = vpop.permute.xlu1 %18840 }
 0xbe8   :  { %18867 = vmatpush1.msra.mxu1 %v18866_v25  ;;  %18930 = vmatprep.mubr.f32.mxu1 %v31035_v3  ;;  %v18847_v40 = vsel %vm5763_vm8, %v18839_v45, %v18841_v15  ;;  %v18848_v44 = vsel %vm5763_vm8, %v18841_v15, %v18843_v58 }
 0xbe9   :  { %18947 = vmatprep.subr.mxu1 %v18946_v21  ;;  %v18858_v10 = vsel %vm14402_vm9, %v18847_v40, 0  ;;  %v18860_v13 = vsel %vm14402_vm9, %v18848_v44, 0 }
 0xbea   :  { %v19329_v16 = vand.u32 4294901760, %v18858_v10  ;;  %v19796_v30 = vand.u32 4294901760, %v18860_v13 }
 0xbeb   :  { %18936 = vmatmul.mubr.f32.vlgmr.msra.gmra.mrb[2].mxu1 %v30601_v4  ;;  %v20279_v33 = vpop.permute.xlu1 %20278 }
 0xbec   :  { %18953 = vmatpush1.msra.mxu1 %v18952_v20  ;;  %19016 = vmatprep.mubr.f32.mxu1 %v31035_v3  ;;  %v19408_v32 = vsub.f32 %v18858_v10, %v19329_v16  ;;  %v19879_v39 = vsub.f32 %v18860_v13, %v19796_v30  ;;  %v20289_v34 = vsel %vm7199_vm2, %v20279_v33, %v20281_v14 }
 0xbed   :  { %19026 = vmatprep.subr.mxu1 %v18943_v22  ;;  %v20298_v60 = vsel %vm14402_vm9, %v20289_v34, 0 }
 0xbee   :  { %v19409_v38 = vand.u32 4294901760, %v19408_v32  ;;  %v19880_v61 = vand.u32 4294901760, %v19879_v39  ;;  %v20308_v35 = vand.u32 4294901760, %v20298_v60 }
 0xbef   :  { %v20277_v56 = vpop.permute.xlu1 %20276 }
 0xbf0   :  { %v19410_v18 = vsub.f32 %v19408_v32, %v19409_v38  ;;  %v19881_v57 = vsub.f32 %v19879_v39, %v19880_v61  ;;  %v20288_v12 = vsel %vm7199_vm2, %v20277_v56, %v20279_v33  ;;  %v20387_v53 = vsub.f32 %v20298_v60, %v20308_v35 }
 0xbf1   :  { %v20296_v54 = vsel %vm14402_vm9, %v20288_v12, 0 }
 0xbf2   :  { %v19411_v26 = vand.u32 4294901760, %v19410_v18  ;;  %v19882_v28 = vand.u32 4294901760, %v19881_v57 }
 0xbf3   :  { %19018 = vmatmul.mubr.f32.vlgmr.msra.gmra.mrb[2].mxu1 %v30587_v63 }
 0xbf4   :  { %19029 = vmatpush1.msra.mxu1 %v18949_v29  ;;  %19092 = vmatprep.mubr.f32.mxu1 %v31035_v3 }
 0xbf5   :  { %19102 = vmatprep.subr.mxu1 %v18864_v59 }
 0xbfb   :  { %19095 = vmatmul.mubr.f32.vlgmr.msra.gmra.mrb[2].mxu1 %v30591_v62 }
 0xbfc   :  { %19104 = vmatpush1.msra.mxu1 %v18866_v25  ;;  %19167 = vmatprep.mubr.f32.mxu1 %v31035_v3 }
 0xbfd   :  { %19180 = vmatprep.subr.mxu1 %v18944_v2 }
 0xc03   :  { %19171 = vmatmul.mubr.f32.vlgmr.msra.gmra.mrb[2].mxu1 %v30595_v37 }
 0xc04   :  { %19184 = vmatpush1.msra.mxu1 %v18950_v47  ;;  %19247 = vmatprep.mubr.f32.mxu1 %v31035_v3 }
 0xc05   :  { %19256 = vmatprep.subr.mxu1 %v18864_v59  ;;  %v20310_v59 = vand.u32 4294901760, %v20296_v54 }
 0xc07   :  { %v20393_v22 = vsub.f32 %v20296_v54, %v20310_v59 }
 0xc09   :  { %v20394_v2 = vand.u32 4294901760, %v20393_v22 }
 0xc0b   :  { %19249 = vmatmul.mubr.f32.vlgmr.msra.gmra.mrb[2].mxu1 %v30587_v63  ;;  %v20395_v1 = vsub.f32 %v20393_v22, %v20394_v2 }
 0xc0c   :  { %19258 = vmatpush1.msra.mxu1 %v18866_v25  ;;  %19321 = vmatprep.mubr.f32.mxu1 %v31035_v3  ;;  %v30654_v25 = vsub.f32 %v20294_v51, %v30650_v9 }
 0xc0d   :  { %19330 = vmatprep.subr.mxu1 %v19329_v16  ;;  %v20396_v21 = vand.u32 4294901760, %v20395_v1 }
 0xc0e   :  { %v30658_v29 = vand.u32 4294901760, %v30654_v25 }
 0xc10   :  { %v20378_v47 = vsub.f32 %v30654_v25, %v30658_v29 }
 0xc12   :  { %v30664_v48 = vand.u32 4294901760, %v20378_v47 }
 0xc13   :  { %19323 = vmatmul.mubr.f32.vlgmr.msra.gmra.mrb[2].mxu1 %v30587_v63 }
 0xc14   :  { %19332 = vmatpush1.msra.mxu1 %v19331_v27  ;;  %19395 = vmatprep.mubr.f32.mxu1 %v31035_v3 }
 0xc15   :  { %19412 = vmatprep.subr.mxu1 %v19411_v26 }
 0xc17   :  { %19401 = vmatmul.mubr.f32.vlgmr.msra.gmra.mrb[4].mxu1 %v30601_v4 }
 0xc18   :  { %19418 = vmatpush1.msra.mxu1 %v19417_v11  ;;  %19481 = vmatprep.mubr.f32.mxu1 %v31035_v3 }
 0xc19   :  { %19491 = vmatprep.subr.mxu1 %v19408_v32 }
 0xc1f   :  { %19483 = vmatmul.mubr.f32.vlgmr.msra.gmra.mrb[4].mxu1 %v30587_v63 }
 0xc20   :  { %19494 = vmatpush1.msra.mxu1 %v19414_v23  ;;  %19557 = vmatprep.mubr.f32.mxu1 %v31035_v3 }
 0xc21   :  { %19567 = vmatprep.subr.mxu1 %v19329_v16 }
 0xc27   :  { %19560 = vmatmul.mubr.f32.vlgmr.msra.gmra.mrb[4].mxu1 %v30591_v62 }
 0xc28   :  { %19569 = vmatpush1.msra.mxu1 %v19331_v27  ;;  %19632 = vmatprep.mubr.f32.mxu1 %v31035_v3 }
 0xc29   :  { %19645 = vmatprep.subr.mxu1 %v19409_v38 }
 0xc2f   :  { %19636 = vmatmul.mubr.f32.vlgmr.msra.gmra.mrb[4].mxu1 %v30595_v37 }
 0xc30   :  { %19649 = vmatpush1.msra.mxu1 %v19415_v41  ;;  %19712 = vmatprep.mubr.f32.mxu1 %v31035_v3 }
 0xc31   :  { %19721 = vmatprep.subr.mxu1 %v19329_v16 }
 0xc37   :  { %19714 = vmatmul.mubr.f32.vlgmr.msra.gmra.mrb[4].mxu1 %v30587_v63 }
 0xc38   :  { %19723 = vmatpush1.msra.mxu1 %v19331_v27  ;;  %19786 = vmatprep.mubr.f32.mxu1 %v31035_v3 }
 0xc39   :  { %19795 = vmatprep.subr.mxu1 %v19794_v52 }
 0xc3f   :  { %19788 = vmatmul.mubr.f32.vlgmr.msra.gmra.mrb[4].mxu1 %v30587_v63 }
 0xc40   :  { %19797 = vmatpush1.msra.mxu1 %v19796_v30  ;;  %19860 = vmatprep.mubr.f32.mxu1 %v31035_v3 }
 0xc41   :  { %19877 = vmatprep.subr.mxu1 %v19876_v19 }
 0xc43   :  { %19866 = vmatmul.mubr.f32.vlgmr.msra.gmra.mrb[6].mxu1 %v30601_v4  ;;  %v20283_v4 = vpop.permute.xlu0 %20282 }
 0xc44   :  { %19883 = vmatpush1.msra.mxu1 %v19882_v28  ;;  %19946 = vmatprep.mubr.f32.mxu1 %v31035_v3  ;;  %v20290_v15 = vsel %vm7199_vm2, %v20281_v14, %v20283_v4  ;;  %v27602_v14 = vld [vmem:[%s31008_s7 + $0x14] sm:$0xf] }
 0xc45   :  { %19956 = vmatprep.subr.mxu1 %v19873_v17  ;;  %v20300_v40 = vsel %vm14402_vm9, %v20290_v15, 0  ;;  %v21738_v46 = vsel %vm14556_vm7, %v27602_v14, 0 }
 0xc46   :  { %v20775_v10 = vand.u32 4294901760, %v20300_v40  ;;  %v30713_v51 = vand.u32 4294901760, %v21738_v46 }
 0xc47   :  { %v20287_v24 = vpop.permute.xlu0 %20286 }
 0xc48   :  { %v20858_v16 = vsub.f32 %v20300_v40, %v20775_v10  ;;  %v20306_v26 = vsel %vm14402_vm9, %v20287_v24, 0 }
 0xc49   :  { %v21238_v58 = vand.u32 4294901760, %v20306_v26 }
 0xc4a   :  { %v20859_v32 = vand.u32 4294901760, %v20858_v16 }
 0xc4b   :  { %19948 = vmatmul.mubr.f32.vlgmr.msra.gmra.mrb[6].mxu1 %v30587_v63  ;;  %v21725_v19 = vpop.permute.xlu0 %21724 }
 0xc4c   :  { %19959 = vmatpush1.msra.mxu1 %v19879_v39  ;;  %20022 = vmatprep.mubr.f32.mxu1 %v31035_v3  ;;  %v20860_v38 = vsub.f32 %v20858_v16, %v20859_v32 }
 0xc4d   :  { %20032 = vmatprep.subr.mxu1 %v19794_v52 }
 0xc4e   :  { %v20861_v18 = vand.u32 4294901760, %v20860_v38 }
 0xc53   :  { %20025 = vmatmul.mubr.f32.vlgmr.msra.gmra.mrb[6].mxu1 %v30591_v62  ;;  %v20388_v62 = vand.u32 4294901760, %v20387_v53 }
 0xc54   :  { %20034 = vmatpush1.msra.mxu1 %v19796_v30  ;;  %20097 = vmatprep.mubr.f32.mxu1 %v31035_v3 }
 0xc55   :  { %20110 = vmatprep.subr.mxu1 %v19874_v31 }
 0xc5b   :  { %20101 = vmatmul.mubr.f32.vlgmr.msra.gmra.mrb[6].mxu1 %v30595_v37  ;;  %v20389_v37 = vsub.f32 %v20387_v53, %v20388_v62 }
 0xc5c   :  { %20114 = vmatpush1.msra.mxu1 %v19880_v61  ;;  %20177 = vmatprep.mubr.f32.mxu1 %v31035_v3 }
 0xc5d   :  { %20186 = vmatprep.subr.mxu1 %v19794_v52  ;;  %v20390_v42 = vand.u32 4294901760, %v20389_v37  ;;  %v21317_v52 = vsub.f32 %v20306_v26, %v21238_v58 }
 0xc63   :  { %20179 = vmatmul.mubr.f32.vlgmr.msra.gmra.mrb[6].mxu1 %v30587_v63 }
 0xc64   :  { %20188 = vmatpush1.msra.mxu1 %v19796_v30  ;;  %20251 = vmatprep.mubr.f32.mxu1 %v31035_v3  ;;  %v21318_v30 = vand.u32 4294901760, %v21317_v52 }
 0xc65   :  { %20309 = vmatprep.subr.mxu1 %v20308_v35 }
 0xc66   :  { %v21319_v39 = vsub.f32 %v21317_v52, %v21318_v30 }
 0xc68   :  { %v21320_v61 = vand.u32 4294901760, %v21319_v39 }
 0xc6b   :  { %20253 = vmatmul.mubr.f32.vlgmr.msra.gmra.mrb[6].mxu1 %v30587_v63  ;;  %v20285_v63 = vpop.permute.xlu1 %20284 }
 0xc6c   :  { %20311 = vmatpush1.msra.mxu1 %v20310_v59  ;;  %20374 = vmatprep.mubr.f32.mxu1 %v31035_v3  ;;  %v20291_v20 = vsel %vm7199_vm2, %v20283_v4, %v20285_v63  ;;  %v20292_v11 = vsel %vm7199_vm2, %v20285_v63, %v20287_v24 }
 0xc6d   :  { %20391 = vmatprep.subr.mxu1 %v20390_v42  ;;  %v20302_v45 = vsel %vm14402_vm9, %v20291_v20, 0  ;;  %v20304_v49 = vsel %vm14402_vm9, %v20292_v11, 0 }
 0xc6e   :  { %v20773_v43 = vand.u32 4294901760, %v20302_v45  ;;  %v21240_v44 = vand.u32 4294901760, %v20304_v49 }
 0xc6f   :  { %20380 = vmatmul.mubr.f32.vlgmr.msra.gmra.mrb[2].mxu1 %v30664_v48  ;;  %v21723_v57 = vpop.permute.xlu1 %21722 }
 0xc70   :  { %20397 = vmatpush1.msra.mxu1 %v20396_v21  ;;  %20460 = vmatprep.mubr.f32.mxu1 %v31035_v3  ;;  %v20852_v5 = vsub.f32 %v20302_v45, %v20773_v43  ;;  %v21323_v13 = vsub.f32 %v20304_v49, %v21240_v44  ;;  %v21733_v28 = vsel %vm8635_vm3, %v21723_v57, %v21725_v19 }
 0xc71   :  { %20470 = vmatprep.subr.mxu1 %v20387_v53  ;;  %v21742_v34 = vsel %vm14402_vm9, %v21733_v28, 0 }
 0xc72   :  { %v20853_v27 = vand.u32 4294901760, %v20852_v5  ;;  %v21324_v17 = vand.u32 4294901760, %v21323_v13  ;;  %v21752_v60 = vand.u32 4294901760, %v21742_v34 }
 0xc73   :  { %v21721_v33 = vpop.permute.xlu1 %21720 }
 0xc74   :  { %v20854_v23 = vsub.f32 %v20852_v5, %v20853_v27  ;;  %v21325_v31 = vsub.f32 %v21323_v13, %v21324_v17  ;;  %v21732_v56 = vsel %vm8635_vm3, %v21721_v33, %v21723_v57  ;;  %v21831_v54 = vsub.f32 %v21742_v34, %v21752_v60 }
 0xc75   :  { %v21740_v12 = vsel %vm14402_vm9, %v21732_v56, 0 }
 0xc76   :  { %v20855_v41 = vand.u32 4294901760, %v20854_v23  ;;  %v21326_v7 = vand.u32 4294901760, %v21325_v31 }
 0xc77   :  { %20462 = vmatmul.mubr.f32.vlgmr.msra.gmra.mrb[2].mxu1 %v30650_v9 }
 0xc78   :  { %20473 = vmatpush1.msra.mxu1 %v20393_v22  ;;  %20536 = vmatprep.mubr.f32.mxu1 %v31035_v3 }
 0xc79   :  { %20546 = vmatprep.subr.mxu1 %v20308_v35 }
 0xc7f   :  { %20539 = vmatmul.mubr.f32.vlgmr.msra.gmra.mrb[2].mxu1 %v30654_v25 }
 0xc80   :  { %20548 = vmatpush1.msra.mxu1 %v20310_v59  ;;  %20611 = vmatprep.mubr.f32.mxu1 %v31035_v3 }
 0xc81   :  { %20624 = vmatprep.subr.mxu1 %v20388_v62 }
 0xc87   :  { %20615 = vmatmul.mubr.f32.vlgmr.msra.gmra.mrb[2].mxu1 %v30658_v29 }
 0xc88   :  { %20628 = vmatpush1.msra.mxu1 %v20394_v2  ;;  %20691 = vmatprep.mubr.f32.mxu1 %v31035_v3 }
 0xc89   :  { %20700 = vmatprep.subr.mxu1 %v20308_v35  ;;  %v21754_v35 = vand.u32 4294901760, %v21740_v12 }
 0xc8b   :  { %v21837_v53 = vsub.f32 %v21740_v12, %v21754_v35 }
 0xc8d   :  { %v21838_v62 = vand.u32 4294901760, %v21837_v53 }
 0xc8f   :  { %20693 = vmatmul.mubr.f32.vlgmr.msra.gmra.mrb[2].mxu1 %v30650_v9  ;;  %v21839_v37 = vsub.f32 %v21837_v53, %v21838_v62 }
 0xc90   :  { %20702 = vmatpush1.msra.mxu1 %v20310_v59  ;;  %20765 = vmatprep.mubr.f32.mxu1 %v31035_v3  ;;  %v30717_v59 = vsub.f32 %v21738_v46, %v30713_v51 }
 0xc91   :  { %20774 = vmatprep.subr.mxu1 %v20773_v43  ;;  %v21840_v42 = vand.u32 4294901760, %v21839_v37 }
 0xc92   :  { %v30721_v22 = vand.u32 4294901760, %v30717_v59 }
 0xc94   :  { %v21822_v2 = vsub.f32 %v30717_v59, %v30721_v22 }
 0xc96   :  { %v30727_v1 = vand.u32 4294901760, %v21822_v2 }
 0xc97   :  { %20767 = vmatmul.mubr.f32.vlgmr.msra.gmra.mrb[2].mxu1 %v30650_v9 }
 0xc98   :  { %20776 = vmatpush1.msra.mxu1 %v20775_v10  ;;  %20839 = vmatprep.mubr.f32.mxu1 %v31035_v3 }
 0xc99   :  { %20856 = vmatprep.subr.mxu1 %v20855_v41 }
 0xc9b   :  { %20845 = vmatmul.mubr.f32.vlgmr.msra.gmra.mrb[4].mxu1 %v30664_v48 }
 0xc9c   :  { %20862 = vmatpush1.msra.mxu1 %v20861_v18  ;;  %20925 = vmatprep.mubr.f32.mxu1 %v31035_v3 }
 0xc9d   :  { %20935 = vmatprep.subr.mxu1 %v20852_v5 }
 0xca3   :  { %20927 = vmatmul.mubr.f32.vlgmr.msra.gmra.mrb[4].mxu1 %v30650_v9 }
 0xca4   :  { %20938 = vmatpush1.msra.mxu1 %v20858_v16  ;;  %21001 = vmatprep.mubr.f32.mxu1 %v31035_v3 }
 0xca5   :  { %21011 = vmatprep.subr.mxu1 %v20773_v43 }
 0xcab   :  { %21004 = vmatmul.mubr.f32.vlgmr.msra.gmra.mrb[4].mxu1 %v30654_v25 }
 0xcac   :  { %21013 = vmatpush1.msra.mxu1 %v20775_v10  ;;  %21076 = vmatprep.mubr.f32.mxu1 %v31035_v3 }
 0xcad   :  { %21089 = vmatprep.subr.mxu1 %v20853_v27 }
 0xcb3   :  { %21080 = vmatmul.mubr.f32.vlgmr.msra.gmra.mrb[4].mxu1 %v30658_v29 }
 0xcb4   :  { %21093 = vmatpush1.msra.mxu1 %v20859_v32  ;;  %21156 = vmatprep.mubr.f32.mxu1 %v31035_v3 }
 0xcb5   :  { %21165 = vmatprep.subr.mxu1 %v20773_v43 }
 0xcbb   :  { %21158 = vmatmul.mubr.f32.vlgmr.msra.gmra.mrb[4].mxu1 %v30650_v9 }
 0xcbc   :  { %21167 = vmatpush1.msra.mxu1 %v20775_v10  ;;  %21230 = vmatprep.mubr.f32.mxu1 %v31035_v3 }
 0xcbd   :  { %21239 = vmatprep.subr.mxu1 %v21238_v58 }
 0xcc3   :  { %21232 = vmatmul.mubr.f32.vlgmr.msra.gmra.mrb[4].mxu1 %v30650_v9 }
 0xcc4   :  { %21241 = vmatpush1.msra.mxu1 %v21240_v44  ;;  %21304 = vmatprep.mubr.f32.mxu1 %v31035_v3 }
 0xcc5   :  { %21321 = vmatprep.subr.mxu1 %v21320_v61 }
 0xcc7   :  { %21310 = vmatmul.mubr.f32.vlgmr.msra.gmra.mrb[6].mxu1 %v30664_v48  ;;  %v21727_v48 = vpop.permute.xlu0 %21726 }
 0xcc8   :  { %21327 = vmatpush1.msra.mxu1 %v21326_v7  ;;  %21390 = vmatprep.mubr.f32.mxu1 %v31035_v3  ;;  %v21734_v63 = vsel %vm8635_vm3, %v21725_v19, %v21727_v48  ;;  %v27603_v19 = vld [vmem:[%s31008_s7 + $0x18] sm:$0xf] }
 0xcc9   :  { %21400 = vmatprep.subr.mxu1 %v21317_v52  ;;  %v21744_v20 = vsel %vm14402_vm9, %v21734_v63, 0  ;;  %v23182_v14 = vsel %vm14556_vm7, %v27603_v19, 0 }
 0xcca   :  { %v22219_v45 = vand.u32 4294901760, %v21744_v20  ;;  %v30776_v46 = vand.u32 4294901760, %v23182_v14 }
 0xccb   :  { %v21731_v38 = vpop.permute.xlu0 %21730 }
 0xccc   :  { %v22302_v43 = vsub.f32 %v21744_v20, %v22219_v45  ;;  %v21750_v41 = vsel %vm14402_vm9, %v21731_v38, 0 }
 0xccd   :  { %v22682_v24 = vand.u32 4294901760, %v21750_v41 }
 0xcce   :  { %v22303_v5 = vand.u32 4294901760, %v22302_v43 }
 0xccf   :  { %21392 = vmatmul.mubr.f32.vlgmr.msra.gmra.mrb[6].mxu1 %v30650_v9  ;;  %v23169_v61 = vpop.permute.xlu0 %23168 }
 0xcd0   :  { %21403 = vmatpush1.msra.mxu1 %v21323_v13  ;;  %21466 = vmatprep.mubr.f32.mxu1 %v31035_v3  ;;  %v22304_v27 = vsub.f32 %v22302_v43, %v22303_v5 }
 0xcd1   :  { %21476 = vmatprep.subr.mxu1 %v21238_v58 }
 0xcd2   :  { %v22305_v23 = vand.u32 4294901760, %v22304_v27 }
 0xcd7   :  { %21469 = vmatmul.mubr.f32.vlgmr.msra.gmra.mrb[6].mxu1 %v30654_v25  ;;  %v21832_v25 = vand.u32 4294901760, %v21831_v54 }
 0xcd8   :  { %21478 = vmatpush1.msra.mxu1 %v21240_v44  ;;  %21541 = vmatprep.mubr.f32.mxu1 %v31035_v3 }
 0xcd9   :  { %21554 = vmatprep.subr.mxu1 %v21318_v30 }
 0xcdf   :  { %21545 = vmatmul.mubr.f32.vlgmr.msra.gmra.mrb[6].mxu1 %v30658_v29  ;;  %v21833_v29 = vsub.f32 %v21831_v54, %v21832_v25 }
 0xce0   :  { %21558 = vmatpush1.msra.mxu1 %v21324_v17  ;;  %21621 = vmatprep.mubr.f32.mxu1 %v31035_v3 }
 0xce1   :  { %21630 = vmatprep.subr.mxu1 %v21238_v58  ;;  %v21834_v47 = vand.u32 4294901760, %v21833_v29  ;;  %v22761_v58 = vsub.f32 %v21750_v41, %v22682_v24 }
 0xce7   :  { %21623 = vmatmul.mubr.f32.vlgmr.msra.gmra.mrb[6].mxu1 %v30650_v9 }
 0xce8   :  { %21632 = vmatpush1.msra.mxu1 %v21240_v44  ;;  %21695 = vmatprep.mubr.f32.mxu1 %v31035_v3  ;;  %v22762_v44 = vand.u32 4294901760, %v22761_v58 }
 0xce9   :  { %21753 = vmatprep.subr.mxu1 %v21752_v60 }
 0xcea   :  { %v22763_v13 = vsub.f32 %v22761_v58, %v22762_v44 }
 0xcec   :  { %v22764_v17 = vand.u32 4294901760, %v22763_v13 }
 0xcef   :  { %21697 = vmatmul.mubr.f32.vlgmr.msra.gmra.mrb[6].mxu1 %v30650_v9  ;;  %v21729_v9 = vpop.permute.xlu1 %21728 }
 0xcf0   :  { %21755 = vmatpush1.msra.mxu1 %v21754_v35  ;;  %21818 = vmatprep.mubr.f32.mxu1 %v31035_v3  ;;  %v21735_v21 = vsel %vm8635_vm3, %v21727_v48, %v21729_v9  ;;  %v21736_v18 = vsel %vm8635_vm3, %v21729_v9, %v21731_v38 }
 0xcf1   :  { %21835 = vmatprep.subr.mxu1 %v21834_v47  ;;  %v21746_v4 = vsel %vm14402_vm9, %v21735_v21, 0  ;;  %v21748_v26 = vsel %vm14402_vm9, %v21736_v18, 0 }
 0xcf2   :  { %v22217_v15 = vand.u32 4294901760, %v21746_v4  ;;  %v22684_v11 = vand.u32 4294901760, %v21748_v26 }
 0xcf3   :  { %21824 = vmatmul.mubr.f32.vlgmr.msra.gmra.mrb[2].mxu1 %v30727_v1  ;;  %v23167_v31 = vpop.permute.xlu1 %23166 }
 0xcf4   :  { %21841 = vmatpush1.msra.mxu1 %v21840_v42  ;;  %21904 = vmatprep.mubr.f32.mxu1 %v31035_v3  ;;  %v22296_v40 = vsub.f32 %v21746_v4, %v22217_v15  ;;  %v22767_v49 = vsub.f32 %v21748_v26, %v22684_v11  ;;  %v23177_v7 = vsel %vm10071_vm4, %v23167_v31, %v23169_v61 }
 0xcf5   :  { %21914 = vmatprep.subr.mxu1 %v21831_v54  ;;  %v23186_v28 = vsel %vm14402_vm9, %v23177_v7, 0 }
 0xcf6   :  { %v22297_v10 = vand.u32 4294901760, %v22296_v40  ;;  %v22768_v52 = vand.u32 4294901760, %v22767_v49  ;;  %v23196_v34 = vand.u32 4294901760, %v23186_v28 }
 0xcf7   :  { %v23165_v57 = vpop.permute.xlu1 %23164 }
 0xcf8   :  { %v22298_v16 = vsub.f32 %v22296_v40, %v22297_v10  ;;  %v22769_v30 = vsub.f32 %v22767_v49, %v22768_v52  ;;  %v23176_v33 = vsel %vm10071_vm4, %v23165_v57, %v23167_v31  ;;  %v23275_v12 = vsub.f32 %v23186_v28, %v23196_v34 }
 0xcf9   :  { %v23184_v56 = vsel %vm14402_vm9, %v23176_v33, 0 }
 0xcfa   :  { %v22299_v32 = vand.u32 4294901760, %v22298_v16  ;;  %v22770_v39 = vand.u32 4294901760, %v22769_v30 }
 0xcfb   :  { %21906 = vmatmul.mubr.f32.vlgmr.msra.gmra.mrb[2].mxu1 %v30713_v51 }
 0xcfc   :  { %21917 = vmatpush1.msra.mxu1 %v21837_v53  ;;  %21980 = vmatprep.mubr.f32.mxu1 %v31035_v3 }
 0xcfd   :  { %21990 = vmatprep.subr.mxu1 %v21752_v60 }
 0xd03   :  { %21983 = vmatmul.mubr.f32.vlgmr.msra.gmra.mrb[2].mxu1 %v30717_v59 }
 0xd04   :  { %21992 = vmatpush1.msra.mxu1 %v21754_v35  ;;  %22055 = vmatprep.mubr.f32.mxu1 %v31035_v3 }
 0xd05   :  { %22068 = vmatprep.subr.mxu1 %v21832_v25 }
 0xd0b   :  { %22059 = vmatmul.mubr.f32.vlgmr.msra.gmra.mrb[2].mxu1 %v30721_v22 }
 0xd0c   :  { %22072 = vmatpush1.msra.mxu1 %v21838_v62  ;;  %22135 = vmatprep.mubr.f32.mxu1 %v31035_v3 }
 0xd0d   :  { %22144 = vmatprep.subr.mxu1 %v21752_v60  ;;  %v23198_v60 = vand.u32 4294901760, %v23184_v56 }
 0xd0f   :  { %v23281_v54 = vsub.f32 %v23184_v56, %v23198_v60 }
 0xd11   :  { %v23282_v25 = vand.u32 4294901760, %v23281_v54 }
 0xd13   :  { %22137 = vmatmul.mubr.f32.vlgmr.msra.gmra.mrb[2].mxu1 %v30713_v51  ;;  %v23283_v29 = vsub.f32 %v23281_v54, %v23282_v25 }
 0xd14   :  { %22146 = vmatpush1.msra.mxu1 %v21754_v35  ;;  %22209 = vmatprep.mubr.f32.mxu1 %v31035_v3  ;;  %v30780_v35 = vsub.f32 %v23182_v14, %v30776_v46 }
 0xd15   :  { %22218 = vmatprep.subr.mxu1 %v22217_v15  ;;  %v23284_v47 = vand.u32 4294901760, %v23283_v29 }
 0xd16   :  { %v30784_v53 = vand.u32 4294901760, %v30780_v35 }
 0xd18   :  { %v23266_v62 = vsub.f32 %v30780_v35, %v30784_v53 }
 0xd1a   :  { %v30790_v37 = vand.u32 4294901760, %v23266_v62 }
 0xd1b   :  { %22211 = vmatmul.mubr.f32.vlgmr.msra.gmra.mrb[2].mxu1 %v30713_v51 }
 0xd1c   :  { %22220 = vmatpush1.msra.mxu1 %v22219_v45  ;;  %22283 = vmatprep.mubr.f32.mxu1 %v31035_v3 }
 0xd1d   :  { %22300 = vmatprep.subr.mxu1 %v22299_v32 }
 0xd1f   :  { %22289 = vmatmul.mubr.f32.vlgmr.msra.gmra.mrb[4].mxu1 %v30727_v1 }
 0xd20   :  { %22306 = vmatpush1.msra.mxu1 %v22305_v23  ;;  %22369 = vmatprep.mubr.f32.mxu1 %v31035_v3 }
 0xd21   :  { %22379 = vmatprep.subr.mxu1 %v22296_v40 }
 0xd27   :  { %22371 = vmatmul.mubr.f32.vlgmr.msra.gmra.mrb[4].mxu1 %v30713_v51 }
 0xd28   :  { %22382 = vmatpush1.msra.mxu1 %v22302_v43  ;;  %22445 = vmatprep.mubr.f32.mxu1 %v31035_v3 }
 0xd29   :  { %22455 = vmatprep.subr.mxu1 %v22217_v15 }
 0xd2f   :  { %22448 = vmatmul.mubr.f32.vlgmr.msra.gmra.mrb[4].mxu1 %v30717_v59 }
 0xd30   :  { %22457 = vmatpush1.msra.mxu1 %v22219_v45  ;;  %22520 = vmatprep.mubr.f32.mxu1 %v31035_v3 }
 0xd31   :  { %22533 = vmatprep.subr.mxu1 %v22297_v10 }
 0xd37   :  { %22524 = vmatmul.mubr.f32.vlgmr.msra.gmra.mrb[4].mxu1 %v30721_v22 }
 0xd38   :  { %22537 = vmatpush1.msra.mxu1 %v22303_v5  ;;  %22600 = vmatprep.mubr.f32.mxu1 %v31035_v3 }
 0xd39   :  { %22609 = vmatprep.subr.mxu1 %v22217_v15 }
 0xd3f   :  { %22602 = vmatmul.mubr.f32.vlgmr.msra.gmra.mrb[4].mxu1 %v30713_v51 }
 0xd40   :  { %22611 = vmatpush1.msra.mxu1 %v22219_v45  ;;  %22674 = vmatprep.mubr.f32.mxu1 %v31035_v3 }
 0xd41   :  { %22683 = vmatprep.subr.mxu1 %v22682_v24 }
 0xd47   :  { %22676 = vmatmul.mubr.f32.vlgmr.msra.gmra.mrb[4].mxu1 %v30713_v51 }
 0xd48   :  { %22685 = vmatpush1.msra.mxu1 %v22684_v11  ;;  %22748 = vmatprep.mubr.f32.mxu1 %v31035_v3 }
 0xd49   :  { %22765 = vmatprep.subr.mxu1 %v22764_v17 }
 0xd4b   :  { %22754 = vmatmul.mubr.f32.vlgmr.msra.gmra.mrb[6].mxu1 %v30727_v1  ;;  %v23171_v1 = vpop.permute.xlu0 %23170 }
 0xd4c   :  { %22771 = vmatpush1.msra.mxu1 %v22770_v39  ;;  %22834 = vmatprep.mubr.f32.mxu1 %v31035_v3  ;;  %v23178_v9 = vsel %vm10071_vm4, %v23169_v61, %v23171_v1  ;;  %v27604_v61 = vld [vmem:[%s31008_s7 + $0x1c] sm:$0xf] }
 0xd4d   :  { %22844 = vmatprep.subr.mxu1 %v22761_v58  ;;  %v23188_v21 = vsel %vm14402_vm9, %v23178_v9, 0  ;;  %v24626_v19 = vsel %vm14556_vm7, %v27604_v61, 0 }
 0xd4e   :  { %v23663_v4 = vand.u32 4294901760, %v23188_v21  ;;  %v30839_v14 = vand.u32 4294901760, %v24626_v19 }
 0xd4f   :  { %v23175_v27 = vpop.permute.xlu0 %23174 }
 0xd50   :  { %v23746_v15 = vsub.f32 %v23188_v21, %v23663_v4  ;;  %v23194_v32 = vsel %vm14402_vm9, %v23175_v27, 0 }
 0xd51   :  { %v24126_v38 = vand.u32 4294901760, %v23194_v32 }
 0xd52   :  { %v23747_v40 = vand.u32 4294901760, %v23746_v15 }
 0xd53   :  { %22836 = vmatmul.mubr.f32.vlgmr.msra.gmra.mrb[6].mxu1 %v30713_v51  ;;  %v24613_v17 = vpop.permute.xlu0 %24612 }
 0xd54   :  { %22847 = vmatpush1.msra.mxu1 %v22767_v49  ;;  %22910 = vmatprep.mubr.f32.mxu1 %v31035_v3  ;;  %v23748_v10 = vsub.f32 %v23746_v15, %v23747_v40 }
 0xd55   :  { %22920 = vmatprep.subr.mxu1 %v22682_v24 }
 0xd56   :  { %v23749_v16 = vand.u32 4294901760, %v23748_v10 }
 0xd5b   :  { %22913 = vmatmul.mubr.f32.vlgmr.msra.gmra.mrb[6].mxu1 %v30717_v59  ;;  %v23276_v59 = vand.u32 4294901760, %v23275_v12 }
 0xd5c   :  { %22922 = vmatpush1.msra.mxu1 %v22684_v11  ;;  %22985 = vmatprep.mubr.f32.mxu1 %v31035_v3 }
 0xd5d   :  { %22998 = vmatprep.subr.mxu1 %v22762_v44 }
 0xd63   :  { %22989 = vmatmul.mubr.f32.vlgmr.msra.gmra.mrb[6].mxu1 %v30721_v22  ;;  %v23277_v22 = vsub.f32 %v23275_v12, %v23276_v59 }
 0xd64   :  { %23002 = vmatpush1.msra.mxu1 %v22768_v52  ;;  %23065 = vmatprep.mubr.f32.mxu1 %v31035_v3 }
 0xd65   :  { %23074 = vmatprep.subr.mxu1 %v22682_v24  ;;  %v23278_v2 = vand.u32 4294901760, %v23277_v22  ;;  %v24205_v24 = vsub.f32 %v23194_v32, %v24126_v38 }
 0xd6b   :  { %23067 = vmatmul.mubr.f32.vlgmr.msra.gmra.mrb[6].mxu1 %v30713_v51 }
 0xd6c   :  { %23076 = vmatpush1.msra.mxu1 %v22684_v11  ;;  %23139 = vmatprep.mubr.f32.mxu1 %v31035_v3  ;;  %v24206_v11 = vand.u32 4294901760, %v24205_v24 }
 0xd6d   :  { %23197 = vmatprep.subr.mxu1 %v23196_v34 }
 0xd6e   :  { %v24207_v49 = vsub.f32 %v24205_v24, %v24206_v11 }
 0xd70   :  { %v24208_v52 = vand.u32 4294901760, %v24207_v49 }
 0xd73   :  { %23141 = vmatmul.mubr.f32.vlgmr.msra.gmra.mrb[6].mxu1 %v30713_v51  ;;  %v23173_v51 = vpop.permute.xlu1 %23172 }
 0xd74   :  { %23199 = vmatpush1.msra.mxu1 %v23198_v60  ;;  %23262 = vmatprep.mubr.f32.mxu1 %v31035_v3  ;;  %v23179_v42 = vsel %vm10071_vm4, %v23171_v1, %v23173_v51  ;;  %v23180_v23 = vsel %vm10071_vm4, %v23173_v51, %v23175_v27 }
 0xd75   :  { %23279 = vmatprep.subr.mxu1 %v23278_v2  ;;  %v23190_v48 = vsel %vm14402_vm9, %v23179_v42, 0  ;;  %v23192_v41 = vsel %vm14402_vm9, %v23180_v23, 0 }
 0xd76   :  { %v23661_v63 = vand.u32 4294901760, %v23190_v48  ;;  %v24128_v18 = vand.u32 4294901760, %v23192_v41 }
 0xd77   :  { %23268 = vmatmul.mubr.f32.vlgmr.msra.gmra.mrb[2].mxu1 %v30790_v37  ;;  %v24611_v30 = vpop.permute.xlu1 %24610 }
 0xd78   :  { %23285 = vmatpush1.msra.mxu1 %v23284_v47  ;;  %23348 = vmatprep.mubr.f32.mxu1 %v31035_v3  ;;  %v23740_v20 = vsub.f32 %v23190_v48, %v23661_v63  ;;  %v24211_v26 = vsub.f32 %v23192_v41, %v24128_v18  ;;  %v24621_v39 = vsel %vm11507_vm5, %v24611_v30, %v24613_v17 }
 0xd79   :  { %23358 = vmatprep.subr.mxu1 %v23275_v12  ;;  %v24630_v7 = vsel %vm14402_vm9, %v24621_v39, 0 }
 0xd7a   :  { %v23741_v45 = vand.u32 4294901760, %v23740_v20  ;;  %v24212_v58 = vand.u32 4294901760, %v24211_v26  ;;  %v24640_v28 = vand.u32 4294901760, %v24630_v7 }
 0xd7b   :  { %v24609_v31 = vpop.permute.xlu1 %24608 }
 0xd7c   :  { %v23742_v43 = vsub.f32 %v23740_v20, %v23741_v45  ;;  %v24213_v44 = vsub.f32 %v24211_v26, %v24212_v58  ;;  %v24620_v57 = vsel %vm11507_vm5, %v24609_v31, %v24611_v30  ;;  %v24719_v56 = vsub.f32 %v24630_v7, %v24640_v28 }
 0xd7d   :  { %v24628_v33 = vsel %vm14402_vm9, %v24620_v57, 0 }
 0xd7e   :  { %v23743_v5 = vand.u32 4294901760, %v23742_v43  ;;  %v24214_v13 = vand.u32 4294901760, %v24213_v44 }
 0xd7f   :  { %23350 = vmatmul.mubr.f32.vlgmr.msra.gmra.mrb[2].mxu1 %v30776_v46 }
 0xd80   :  { %23361 = vmatpush1.msra.mxu1 %v23281_v54  ;;  %23424 = vmatprep.mubr.f32.mxu1 %v31035_v3 }
 0xd81   :  { %23434 = vmatprep.subr.mxu1 %v23196_v34 }
 0xd87   :  { %23427 = vmatmul.mubr.f32.vlgmr.msra.gmra.mrb[2].mxu1 %v30780_v35 }
 0xd88   :  { %23436 = vmatpush1.msra.mxu1 %v23198_v60  ;;  %23499 = vmatprep.mubr.f32.mxu1 %v31035_v3 }
 0xd89   :  { %23512 = vmatprep.subr.mxu1 %v23276_v59 }
 0xd8f   :  { %23503 = vmatmul.mubr.f32.vlgmr.msra.gmra.mrb[2].mxu1 %v30784_v53 }
 0xd90   :  { %23516 = vmatpush1.msra.mxu1 %v23282_v25  ;;  %23579 = vmatprep.mubr.f32.mxu1 %v31035_v3 }
 0xd91   :  { %23588 = vmatprep.subr.mxu1 %v23196_v34  ;;  %v24642_v34 = vand.u32 4294901760, %v24628_v33 }
 0xd93   :  { %v24725_v12 = vsub.f32 %v24628_v33, %v24642_v34 }
 0xd95   :  { %v24726_v59 = vand.u32 4294901760, %v24725_v12 }
 0xd97   :  { %23581 = vmatmul.mubr.f32.vlgmr.msra.gmra.mrb[2].mxu1 %v30776_v46  ;;  %v24727_v22 = vsub.f32 %v24725_v12, %v24726_v59 }
 0xd98   :  { %23590 = vmatpush1.msra.mxu1 %v23198_v60  ;;  %23653 = vmatprep.mubr.f32.mxu1 %v31035_v3  ;;  %v30843_v60 = vsub.f32 %v24626_v19, %v30839_v14 }
 0xd99   :  { %23662 = vmatprep.subr.mxu1 %v23661_v63  ;;  %v24728_v2 = vand.u32 4294901760, %v24727_v22 }
 0xd9a   :  { %v30847_v54 = vand.u32 4294901760, %v30843_v60 }
 0xd9c   :  { %v24710_v25 = vsub.f32 %v30843_v60, %v30847_v54 }
 0xd9e   :  { %v30853_v29 = vand.u32 4294901760, %v24710_v25 }
 0xd9f   :  { %23655 = vmatmul.mubr.f32.vlgmr.msra.gmra.mrb[2].mxu1 %v30776_v46 }
 0xda0   :  { %23664 = vmatpush1.msra.mxu1 %v23663_v4  ;;  %23727 = vmatprep.mubr.f32.mxu1 %v31035_v3 }
 0xda1   :  { %23744 = vmatprep.subr.mxu1 %v23743_v5 }
 0xda3   :  { %23733 = vmatmul.mubr.f32.vlgmr.msra.gmra.mrb[4].mxu1 %v30790_v37 }
 0xda4   :  { %23750 = vmatpush1.msra.mxu1 %v23749_v16  ;;  %23813 = vmatprep.mubr.f32.mxu1 %v31035_v3 }
 0xda5   :  { %23823 = vmatprep.subr.mxu1 %v23740_v20 }
 0xdab   :  { %23815 = vmatmul.mubr.f32.vlgmr.msra.gmra.mrb[4].mxu1 %v30776_v46 }
 0xdac   :  { %23826 = vmatpush1.msra.mxu1 %v23746_v15  ;;  %23889 = vmatprep.mubr.f32.mxu1 %v31035_v3 }
 0xdad   :  { %23899 = vmatprep.subr.mxu1 %v23661_v63 }
 0xdb3   :  { %23892 = vmatmul.mubr.f32.vlgmr.msra.gmra.mrb[4].mxu1 %v30780_v35 }
 0xdb4   :  { %23901 = vmatpush1.msra.mxu1 %v23663_v4  ;;  %23964 = vmatprep.mubr.f32.mxu1 %v31035_v3 }
 0xdb5   :  { %23977 = vmatprep.subr.mxu1 %v23741_v45 }
 0xdbb   :  { %23968 = vmatmul.mubr.f32.vlgmr.msra.gmra.mrb[4].mxu1 %v30784_v53 }
 0xdbc   :  { %23981 = vmatpush1.msra.mxu1 %v23747_v40  ;;  %24044 = vmatprep.mubr.f32.mxu1 %v31035_v3 }
 0xdbd   :  { %24053 = vmatprep.subr.mxu1 %v23661_v63 }
 0xdc3   :  { %24046 = vmatmul.mubr.f32.vlgmr.msra.gmra.mrb[4].mxu1 %v30776_v46 }
 0xdc4   :  { %24055 = vmatpush1.msra.mxu1 %v23663_v4  ;;  %24118 = vmatprep.mubr.f32.mxu1 %v31035_v3 }
 0xdc5   :  { %24127 = vmatprep.subr.mxu1 %v24126_v38 }
 0xdcb   :  { %24120 = vmatmul.mubr.f32.vlgmr.msra.gmra.mrb[4].mxu1 %v30776_v46 }
 0xdcc   :  { %24129 = vmatpush1.msra.mxu1 %v24128_v18  ;;  %24192 = vmatprep.mubr.f32.mxu1 %v31035_v3 }
 0xdcd   :  { %24209 = vmatprep.subr.mxu1 %v24208_v52 }
 0xdcf   :  { %24198 = vmatmul.mubr.f32.vlgmr.msra.gmra.mrb[6].mxu1 %v30790_v37  ;;  %v24615_v37 = vpop.permute.xlu0 %24614 }
 0xdd0   :  { %24215 = vmatpush1.msra.mxu1 %v24214_v13  ;;  %24278 = vmatprep.mubr.f32.mxu1 %v31035_v3  ;;  %v24622_v51 = vsel %vm11507_vm5, %v24613_v17, %v24615_v37  ;;  %v27605_v17 = vld [vmem:[%s31008_s7 + $0x20] sm:$0xf] }
 0xdd1   :  { %24288 = vmatprep.subr.mxu1 %v24205_v24  ;;  %v24632_v42 = vsel %vm14402_vm9, %v24622_v51, 0  ;;  %v26070_v61 = vsel %vm14556_vm7, %v27605_v17, 0 }
 0xdd2   :  { %v25107_v48 = vand.u32 4294901760, %v24632_v42  ;;  %v30902_v19 = vand.u32 4294901760, %v26070_v61 }
 0xdd3   :  { %v24619_v10 = vpop.permute.xlu0 %24618 }
 0xdd4   :  { %v25190_v63 = vsub.f32 %v24632_v42, %v25107_v48  ;;  %v24638_v5 = vsel %vm14402_vm9, %v24619_v10, 0 }
 0xdd5   :  { %v25570_v27 = vand.u32 4294901760, %v24638_v5 }
 0xdd6   :  { %v25191_v20 = vand.u32 4294901760, %v25190_v63 }
 0xdd7   :  { %24280 = vmatmul.mubr.f32.vlgmr.msra.gmra.mrb[6].mxu1 %v30776_v46  ;;  %v26057_v52 = vpop.permute.xlu0 %26056 }
 0xdd8   :  { %24291 = vmatpush1.msra.mxu1 %v24211_v26  ;;  %24354 = vmatprep.mubr.f32.mxu1 %v31035_v3  ;;  %v25192_v45 = vsub.f32 %v25190_v63, %v25191_v20 }
 0xdd9   :  { %24364 = vmatprep.subr.mxu1 %v24126_v38 }
 0xdda   :  { %v25193_v43 = vand.u32 4294901760, %v25192_v45 }
 0xddf   :  { %24357 = vmatmul.mubr.f32.vlgmr.msra.gmra.mrb[6].mxu1 %v30780_v35  ;;  %v24720_v35 = vand.u32 4294901760, %v24719_v56 }
 0xde0   :  { %24366 = vmatpush1.msra.mxu1 %v24128_v18  ;;  %24429 = vmatprep.mubr.f32.mxu1 %v31035_v3 }
 0xde1   :  { %24442 = vmatprep.subr.mxu1 %v24206_v11 }
 0xde7   :  { %24433 = vmatmul.mubr.f32.vlgmr.msra.gmra.mrb[6].mxu1 %v30784_v53  ;;  %v24721_v53 = vsub.f32 %v24719_v56, %v24720_v35 }
 0xde8   :  { %24446 = vmatpush1.msra.mxu1 %v24212_v58  ;;  %24509 = vmatprep.mubr.f32.mxu1 %v31035_v3 }
 0xde9   :  { %24518 = vmatprep.subr.mxu1 %v24126_v38  ;;  %v24722_v62 = vand.u32 4294901760, %v24721_v53  ;;  %v25649_v38 = vsub.f32 %v24638_v5, %v25570_v27 }
 0xdef   :  { %24511 = vmatmul.mubr.f32.vlgmr.msra.gmra.mrb[6].mxu1 %v30776_v46 }
 0xdf0   :  { %24520 = vmatpush1.msra.mxu1 %v24128_v18  ;;  %24583 = vmatprep.mubr.f32.mxu1 %v31035_v3  ;;  %v25650_v18 = vand.u32 4294901760, %v25649_v38 }
 0xdf1   :  { %24641 = vmatprep.subr.mxu1 %v24640_v28 }
 0xdf2   :  { %v25651_v26 = vsub.f32 %v25649_v38, %v25650_v18 }
 0xdf4   :  { %v25652_v58 = vand.u32 4294901760, %v25651_v26 }
 0xdf7   :  { %24585 = vmatmul.mubr.f32.vlgmr.msra.gmra.mrb[6].mxu1 %v30776_v46  ;;  %v24617_v46 = vpop.permute.xlu1 %24616 }
 0xdf8   :  { %24643 = vmatpush1.msra.mxu1 %v24642_v34  ;;  %24706 = vmatprep.mubr.f32.mxu1 %v31035_v3  ;;  %v24623_v47 = vsel %vm11507_vm5, %v24615_v37, %v24617_v46  ;;  %v24624_v16 = vsel %vm11507_vm5, %v24617_v46, %v24619_v10 }
 0xdf9   :  { %24723 = vmatprep.subr.mxu1 %v24722_v62  ;;  %v24634_v1 = vsel %vm14402_vm9, %v24623_v47, 0  ;;  %v24636_v32 = vsel %vm14402_vm9, %v24624_v16, 0 }
 0xdfa   :  { %v25105_v9 = vand.u32 4294901760, %v24634_v1  ;;  %v25572_v23 = vand.u32 4294901760, %v24636_v32 }
 0xdfb   :  { %24712 = vmatmul.mubr.f32.vlgmr.msra.gmra.mrb[2].mxu1 %v30853_v29  ;;  %v26055_v44 = vpop.permute.xlu1 %26054 }
 0xdfc   :  { %24729 = vmatpush1.msra.mxu1 %v24728_v2  ;;  %24792 = vmatprep.mubr.f32.mxu1 %v31035_v3  ;;  %v25184_v21 = vsub.f32 %v24634_v1, %v25105_v9  ;;  %v25655_v41 = vsub.f32 %v24636_v32, %v25572_v23  ;;  %v26065_v13 = vsel %vm12943_vm1, %v26055_v44, %v26057_v52 }
 0xdfd   :  { %24802 = vmatprep.subr.mxu1 %v24719_v56  ;;  %v26074_v39 = vsel %vm14402_vm9, %v26065_v13, 0 }
 0xdfe   :  { %v25185_v4 = vand.u32 4294901760, %v25184_v21  ;;  %v25656_v24 = vand.u32 4294901760, %v25655_v41  ;;  %v26084_v7 = vand.u32 4294901760, %v26074_v39 }
 0xdff   :  { %v26053_v30 = vpop.permute.xlu1 %26052 }
 0xe00   :  { %v25186_v15 = vsub.f32 %v25184_v21, %v25185_v4  ;;  %v25657_v11 = vsub.f32 %v25655_v41, %v25656_v24  ;;  %v26064_v31 = vsel %vm12943_vm1, %v26053_v30, %v26055_v44  ;;  %v26163_v33 = vsub.f32 %v26074_v39, %v26084_v7 }
 0xe01   :  { %v26072_v57 = vsel %vm14402_vm9, %v26064_v31, 0 }
 0xe02   :  { %v25187_v40 = vand.u32 4294901760, %v25186_v15  ;;  %v25658_v49 = vand.u32 4294901760, %v25657_v11 }
 0xe03   :  { %24794 = vmatmul.mubr.f32.vlgmr.msra.gmra.mrb[2].mxu1 %v30839_v14 }
 0xe04   :  { %24805 = vmatpush1.msra.mxu1 %v24725_v12  ;;  %24868 = vmatprep.mubr.f32.mxu1 %v31035_v3 }
 0xe05   :  { %24878 = vmatprep.subr.mxu1 %v24640_v28 }
 0xe0b   :  { %24871 = vmatmul.mubr.f32.vlgmr.msra.gmra.mrb[2].mxu1 %v30843_v60 }
 0xe0c   :  { %24880 = vmatpush1.msra.mxu1 %v24642_v34  ;;  %24943 = vmatprep.mubr.f32.mxu1 %v31035_v3 }
 0xe0d   :  { %24956 = vmatprep.subr.mxu1 %v24720_v35 }
 0xe13   :  { %24947 = vmatmul.mubr.f32.vlgmr.msra.gmra.mrb[2].mxu1 %v30847_v54 }
 0xe14   :  { %24960 = vmatpush1.msra.mxu1 %v24726_v59  ;;  %25023 = vmatprep.mubr.f32.mxu1 %v31035_v3 }
 0xe15   :  { %25032 = vmatprep.subr.mxu1 %v24640_v28  ;;  %v26086_v28 = vand.u32 4294901760, %v26072_v57 }
 0xe17   :  { %v26169_v56 = vsub.f32 %v26072_v57, %v26086_v28 }
 0xe19   :  { %v26170_v35 = vand.u32 4294901760, %v26169_v56 }
 0xe1b   :  { %25025 = vmatmul.mubr.f32.vlgmr.msra.gmra.mrb[2].mxu1 %v30839_v14  ;;  %v26171_v53 = vsub.f32 %v26169_v56, %v26170_v35 }
 0xe1c   :  { %25034 = vmatpush1.msra.mxu1 %v24642_v34  ;;  %25097 = vmatprep.mubr.f32.mxu1 %v31035_v3  ;;  %v30906_v34 = vsub.f32 %v26070_v61, %v30902_v19 }
 0xe1d   :  { %25106 = vmatprep.subr.mxu1 %v25105_v9  ;;  %v26172_v62 = vand.u32 4294901760, %v26171_v53 }
 0xe1e   :  { %v30910_v12 = vand.u32 4294901760, %v30906_v34 }
 0xe20   :  { %v26154_v59 = vsub.f32 %v30906_v34, %v30910_v12 }
 0xe22   :  { %v30916_v22 = vand.u32 4294901760, %v26154_v59  ;;  %v14526_v59 = vld [vmem:[%s31009_s9] sm:$0xf] }
 0xe23   :  { %25099 = vmatmul.mubr.f32.vlgmr.msra.gmra.mrb[2].mxu1 %v30839_v14 }
 0xe24   :  { %25108 = vmatpush1.msra.mxu1 %v25107_v48  ;;  %25171 = vmatprep.mubr.f32.mxu1 %v31035_v3 }
 0xe25   :  { %25188 = vmatprep.subr.mxu1 %v25187_v40 }
 0xe27   :  { %25177 = vmatmul.mubr.f32.vlgmr.msra.gmra.mrb[4].mxu1 %v30853_v29 }
 0xe28   :  { %25194 = vmatpush1.msra.mxu1 %v25193_v43  ;;  %25257 = vmatprep.mubr.f32.mxu1 %v31035_v3 }
 0xe29   :  { %25267 = vmatprep.subr.mxu1 %v25184_v21 }
 0xe2f   :  { %25259 = vmatmul.mubr.f32.vlgmr.msra.gmra.mrb[4].mxu1 %v30839_v14 }
 0xe30   :  { %25270 = vmatpush1.msra.mxu1 %v25190_v63  ;;  %25333 = vmatprep.mubr.f32.mxu1 %v31035_v3 }
 0xe31   :  { %25343 = vmatprep.subr.mxu1 %v25105_v9 }
 0xe37   :  { %25336 = vmatmul.mubr.f32.vlgmr.msra.gmra.mrb[4].mxu1 %v30843_v60 }
 0xe38   :  { %25345 = vmatpush1.msra.mxu1 %v25107_v48  ;;  %25408 = vmatprep.mubr.f32.mxu1 %v31035_v3 }
 0xe39   :  { %25421 = vmatprep.subr.mxu1 %v25185_v4 }
 0xe3f   :  { %25412 = vmatmul.mubr.f32.vlgmr.msra.gmra.mrb[4].mxu1 %v30847_v54 }
 0xe40   :  { %25425 = vmatpush1.msra.mxu1 %v25191_v20  ;;  %25488 = vmatprep.mubr.f32.mxu1 %v31035_v3 }
 0xe41   :  { %25497 = vmatprep.subr.mxu1 %v25105_v9 }
 0xe47   :  { %25490 = vmatmul.mubr.f32.vlgmr.msra.gmra.mrb[4].mxu1 %v30839_v14 }
 0xe48   :  { %25499 = vmatpush1.msra.mxu1 %v25107_v48  ;;  %25562 = vmatprep.mubr.f32.mxu1 %v31035_v3 }
 0xe49   :  { %25571 = vmatprep.subr.mxu1 %v25570_v27 }
 0xe4f   :  { %25564 = vmatmul.mubr.f32.vlgmr.msra.gmra.mrb[4].mxu1 %v30839_v14 }
 0xe50   :  { %25573 = vmatpush1.msra.mxu1 %v25572_v23  ;;  %25636 = vmatprep.mubr.f32.mxu1 %v31035_v3 }
 0xe51   :  { %25653 = vmatprep.subr.mxu1 %v25652_v58 }
 0xe53   :  { %25642 = vmatmul.mubr.f32.vlgmr.msra.gmra.mrb[6].mxu1 %v30853_v29  ;;  %v26059_v29 = vpop.permute.xlu0 %26058 }
 0xe54   :  { %25659 = vmatpush1.msra.mxu1 %v25658_v49  ;;  %25722 = vmatprep.mubr.f32.mxu1 %v31035_v3  ;;  %v26066_v46 = vsel %vm12943_vm1, %v26057_v52, %v26059_v29 }
 0xe55   :  { %25732 = vmatprep.subr.mxu1 %v25649_v38  ;;  %v26076_v47 = vsel %vm14402_vm9, %v26066_v46, 0 }
 0xe56   :  { %v26551_v1 = vand.u32 4294901760, %v26076_v47 }
 0xe57   :  { %v26063_v45 = vpop.permute.xlu0 %26062 }
 0xe58   :  { %v26634_v9 = vsub.f32 %v26076_v47, %v26551_v1  ;;  %v26082_v40 = vsel %vm14402_vm9, %v26063_v45, 0 }
 0xe59   :  { %v27014_v10 = vand.u32 4294901760, %v26082_v40 }
 0xe5a   :  { %v26635_v21 = vand.u32 4294901760, %v26634_v9 }
 0xe5b   :  { %25724 = vmatmul.mubr.f32.vlgmr.msra.gmra.mrb[6].mxu1 %v30839_v14 }
 0xe5c   :  { %25735 = vmatpush1.msra.mxu1 %v25655_v41  ;;  %25798 = vmatprep.mubr.f32.mxu1 %v31035_v3  ;;  %v26636_v4 = vsub.f32 %v26634_v9, %v26635_v21 }
 0xe5d   :  { %25808 = vmatprep.subr.mxu1 %v25570_v27 }
 0xe5e   :  { %v26637_v15 = vand.u32 4294901760, %v26636_v4 }
 0xe63   :  { %25801 = vmatmul.mubr.f32.vlgmr.msra.gmra.mrb[6].mxu1 %v30843_v60  ;;  %v26164_v60 = vand.u32 4294901760, %v26163_v33 }
 0xe64   :  { %25810 = vmatpush1.msra.mxu1 %v25572_v23  ;;  %25873 = vmatprep.mubr.f32.mxu1 %v31035_v3 }
 0xe65   :  { %25886 = vmatprep.subr.mxu1 %v25650_v18 }
 0xe6b   :  { %25877 = vmatmul.mubr.f32.vlgmr.msra.gmra.mrb[6].mxu1 %v30847_v54  ;;  %v26165_v54 = vsub.f32 %v26163_v33, %v26164_v60 }
 0xe6c   :  { %25890 = vmatpush1.msra.mxu1 %v25656_v24  ;;  %25953 = vmatprep.mubr.f32.mxu1 %v31035_v3 }
 0xe6d   :  { %25962 = vmatprep.subr.mxu1 %v25570_v27  ;;  %v26166_v25 = vand.u32 4294901760, %v26165_v54  ;;  %v27093_v27 = vsub.f32 %v26082_v40, %v27014_v10 }
 0xe73   :  { %25955 = vmatmul.mubr.f32.vlgmr.msra.gmra.mrb[6].mxu1 %v30839_v14 }
 0xe74   :  { %25964 = vmatpush1.msra.mxu1 %v25572_v23  ;;  %26027 = vmatprep.mubr.f32.mxu1 %v31035_v3  ;;  %v27094_v23 = vand.u32 4294901760, %v27093_v27 }
 0xe75   :  { %26085 = vmatprep.subr.mxu1 %v26084_v7 }
 0xe76   :  { %v27095_v41 = vsub.f32 %v27093_v27, %v27094_v23 }
 0xe78   :  { %v27096_v24 = vand.u32 4294901760, %v27095_v41 }
 0xe7b   :  { %26029 = vmatmul.mubr.f32.vlgmr.msra.gmra.mrb[6].mxu1 %v30839_v14  ;;  %v26061_v14 = vpop.permute.xlu1 %26060 }
 0xe7c   :  { %26087 = vmatpush1.msra.mxu1 %v26086_v28  ;;  %26150 = vmatprep.mubr.f32.mxu1 %v31035_v3  ;;  %v26067_v2 = vsel %vm12943_vm1, %v26059_v29, %v26061_v14  ;;  %v26068_v43 = vsel %vm12943_vm1, %v26061_v14, %v26063_v45  ;;  %vm27583_vm1 = vmor %vm27582_vm14, %vm14402_vm9 }
 0xe7d   :  { %26167 = vmatprep.subr.mxu1 %v26166_v25  ;;  %v26078_v37 = vsel %vm14402_vm9, %v26067_v2, 0  ;;  %v26080_v5 = vsel %vm14402_vm9, %v26068_v43, 0 }
 0xe7e   :  { %v26549_v51 = vand.u32 4294901760, %v26078_v37  ;;  %v27016_v16 = vand.u32 4294901760, %v26080_v5 }
 0xe7f   :  { %26156 = vmatmul.mubr.f32.vlgmr.msra.gmra.mrb[2].mxu1 %v30916_v22 }
 0xe80   :  { %26173 = vmatpush1.msra.mxu1 %v26172_v62  ;;  %26236 = vmatprep.mubr.f32.mxu1 %v31035_v3  ;;  %v26628_v42 = vsub.f32 %v26078_v37, %v26549_v51  ;;  %v27099_v32 = vsub.f32 %v26080_v5, %v27016_v16 }
 0xe81   :  { %26246 = vmatprep.subr.mxu1 %v26163_v33 }
 0xe82   :  { %v26629_v48 = vand.u32 4294901760, %v26628_v42  ;;  %v27100_v38 = vand.u32 4294901760, %v27099_v32 }
 0xe84   :  { %v26630_v63 = vsub.f32 %v26628_v42, %v26629_v48  ;;  %v27101_v18 = vsub.f32 %v27099_v32, %v27100_v38 }
 0xe86   :  { %v26631_v20 = vand.u32 4294901760, %v26630_v63  ;;  %v27102_v26 = vand.u32 4294901760, %v27101_v18 }
 0xe87   :  { %26238 = vmatmul.mubr.f32.vlgmr.msra.gmra.mrb[2].mxu1 %v30902_v19 }
 0xe88   :  { %26249 = vmatpush1.msra.mxu1 %v26169_v56  ;;  %26312 = vmatprep.mubr.f32.mxu1 %v31035_v3 }
 0xe89   :  { %26322 = vmatprep.subr.mxu1 %v26084_v7 }
 0xe8f   :  { %26315 = vmatmul.mubr.f32.vlgmr.msra.gmra.mrb[2].mxu1 %v30906_v34 }
 0xe90   :  { %26324 = vmatpush1.msra.mxu1 %v26086_v28  ;;  %26387 = vmatprep.mubr.f32.mxu1 %v31035_v3 }
 0xe91   :  { %26400 = vmatprep.subr.mxu1 %v26164_v60 }
 0xe97   :  { %26391 = vmatmul.mubr.f32.vlgmr.msra.gmra.mrb[2].mxu1 %v30910_v12 }
 0xe98   :  { %26404 = vmatpush1.msra.mxu1 %v26170_v35  ;;  %26467 = vmatprep.mubr.f32.mxu1 %v31035_v3 }
 0xe99   :  { %26476 = vmatprep.subr.mxu1 %v26084_v7 }
 0xe9f   :  { %26469 = vmatmul.mubr.f32.vlgmr.msra.gmra.mrb[2].mxu1 %v30902_v19 }
 0xea0   :  { %26478 = vmatpush1.msra.mxu1 %v26086_v28  ;;  %26541 = vmatprep.mubr.f32.mxu1 %v31035_v3 }
 0xea1   :  { %26550 = vmatprep.subr.mxu1 %v26549_v51 }
 0xea7   :  { %26543 = vmatmul.mubr.f32.vlgmr.msra.gmra.mrb[2].mxu1 %v30902_v19 }
 0xea8   :  { %26552 = vmatpush1.msra.mxu1 %v26551_v1  ;;  %26615 = vmatprep.mubr.f32.mxu1 %v31035_v3 }
 0xea9   :  { %26632 = vmatprep.subr.mxu1 %v26631_v20 }
 0xeab   :  { %26621 = vmatmul.mubr.f32.vlgmr.msra.gmra.mrb[4].mxu1 %v30916_v22 }
 0xeac   :  { %26638 = vmatpush1.msra.mxu1 %v26637_v15  ;;  %26701 = vmatprep.mubr.f32.mxu1 %v31035_v3 }
 0xead   :  { %26711 = vmatprep.subr.mxu1 %v26628_v42 }
 0xeb3   :  { %26703 = vmatmul.mubr.f32.vlgmr.msra.gmra.mrb[4].mxu1 %v30902_v19 }
 0xeb4   :  { %26714 = vmatpush1.msra.mxu1 %v26634_v9  ;;  %26777 = vmatprep.mubr.f32.mxu1 %v31035_v3 }
 0xeb5   :  { %26787 = vmatprep.subr.mxu1 %v26549_v51 }
 0xebb   :  { %26780 = vmatmul.mubr.f32.vlgmr.msra.gmra.mrb[4].mxu1 %v30906_v34 }
 0xebc   :  { %26789 = vmatpush1.msra.mxu1 %v26551_v1  ;;  %26852 = vmatprep.mubr.f32.mxu1 %v31035_v3 }
 0xebd   :  { %26865 = vmatprep.subr.mxu1 %v26629_v48 }
 0xec3   :  { %26856 = vmatmul.mubr.f32.vlgmr.msra.gmra.mrb[4].mxu1 %v30910_v12 }
 0xec4   :  { %26869 = vmatpush1.msra.mxu1 %v26635_v21  ;;  %26932 = vmatprep.mubr.f32.mxu1 %v31035_v3 }
 0xec5   :  { %26941 = vmatprep.subr.mxu1 %v26549_v51 }
 0xecb   :  { %26934 = vmatmul.mubr.f32.vlgmr.msra.gmra.mrb[4].mxu1 %v30902_v19 }
 0xecc   :  { %26943 = vmatpush1.msra.mxu1 %v26551_v1  ;;  %27006 = vmatprep.mubr.f32.mxu1 %v31035_v3 }
 0xecd   :  { %27015 = vmatprep.subr.mxu1 %v27014_v10 }
 0xed3   :  { %27008 = vmatmul.mubr.f32.vlgmr.msra.gmra.mrb[4].mxu1 %v30902_v19 }
 0xed4   :  { %27017 = vmatpush1.msra.mxu1 %v27016_v16  ;;  %27080 = vmatprep.mubr.f32.mxu1 %v31035_v3 }
 0xed5   :  { %27097 = vmatprep.subr.mxu1 %v27096_v24 }
 0xed7   :  { %27086 = vmatmul.mubr.f32.vlgmr.msra.gmra.mrb[6].mxu1 %v30916_v22 }
 0xed8   :  { %27103 = vmatpush1.msra.mxu1 %v27102_v26  ;;  %27166 = vmatprep.mubr.f32.mxu1 %v31035_v3 }
 0xed9   :  { %27176 = vmatprep.subr.mxu1 %v27093_v27 }
 0xedf   :  { %27168 = vmatmul.mubr.f32.vlgmr.msra.gmra.mrb[6].mxu1 %v30902_v19 }
 0xee0   :  { %27179 = vmatpush1.msra.mxu1 %v27099_v32  ;;  %27242 = vmatprep.mubr.f32.mxu1 %v31035_v3 }
 0xee1   :  { %27252 = vmatprep.subr.mxu1 %v27014_v10 }
 0xee7   :  { %27245 = vmatmul.mubr.f32.vlgmr.msra.gmra.mrb[6].mxu1 %v30906_v34 }
 0xee8   :  { %27254 = vmatpush1.msra.mxu1 %v27016_v16  ;;  %27317 = vmatprep.mubr.f32.mxu1 %v31035_v3 }
 0xee9   :  { %27330 = vmatprep.subr.mxu1 %v27094_v23  ;;  %v14525_v23 = vld [vmem:[%s31010_s8] sm:$0xf] }
 0xeef   :  { %27321 = vmatmul.mubr.f32.vlgmr.msra.gmra.mrb[6].mxu1 %v30910_v12 }
 0xef0   :  { %27334 = vmatpush1.msra.mxu1 %v27100_v38  ;;  %27397 = vmatprep.mubr.f32.mxu1 %v31035_v3 }
 0xef1   :  { %27406 = vmatprep.subr.mxu1 %v27014_v10 }
 0xef7   :  { %27399 = vmatmul.mubr.f32.vlgmr.msra.gmra.mrb[6].mxu1 %v30902_v19 }
 0xef8   :  { %27408 = vmatpush1.msra.mxu1 %v27016_v16  ;;  %27471 = vmatprep.mubr.f32.mxu1 %v31035_v3 }
 0xeff   :  { %27473 = vmatmul.mubr.f32.vlgmr.msra.gmra.mrb[6].mxu1 %v30902_v19 }
 0xf7a   :  { %v26544_v11 = vpop.f32.mrb[2].mxu1 }
 0xf7b   :  { %v27485_v58 = vmul.f32 %v26544_v11, %v30213_v0  ;;  %v26546_v49 = vpop.f32.mrb[3].mxu1 }
 0xf7c   :  { %v27486_v44 = vmul.f32 %v26546_v49, %v30215_v55 }
 0xf7d   :  { %v27491_v52 = vsel %vm14402_vm9, %v27485_v58, 0.0 }
 0xf7e   :  { %v27492_v13 = vsel %vm14402_vm9, %v27486_v44, 0.0 }
 0xf7f   :  { %v27493_v30 = vadd.f32 %v27492_v13, %v27491_v52 }
 0xfa6   :  { %v27009_v17 = vpop.f32.mrb[4].mxu1 }
 0xfa7   :  { %v27487_v39 = vmul.f32 %v27009_v17, %v30222_v36  ;;  %v27011_v31 = vpop.f32.mrb[5].mxu1 }
 0xfa8   :  { %v27488_v61 = vmul.f32 %v27011_v31, %v30227_v6 }
 0xfa9   :  { %v27494_v3 = vsel %vm14402_vm9, %v27487_v39, 0.0 }
 0xfaa   :  { %v27495_v7 = vadd.f32 %v27494_v3, %v27493_v30  ;;  %v27496_v57 = vsel %vm14402_vm9, %v27488_v61, 0.0 }
 0xfac   :  { %v27497_v19 = vadd.f32 %v27496_v57, %v27495_v7 }
 0xfd2   :  { %v27474_v28 = vpop.f32.mrb[6].mxu1 }
 0xfd3   :  { %v27489_v33 = vmul.f32 %v27474_v28, %v30234_v50  ;;  %v27476_v34 = vpop.f32.mrb[7].mxu1 }
 0xfd4   :  { %v27490_v56 = vmul.f32 %v27476_v34, %v30236_v8 }
 0xfd5   :  { %v27498_v60 = vsel %vm14402_vm9, %v27489_v33, 0.0 }
 0xfd6   :  { %v27499_v12 = vadd.f32 %v27498_v60, %v27497_v19  ;;  %v27500_v35 = vsel %vm14412_vm10, %v27490_v56, 0.0 }
 0xfd8   :  { %v27501_v54 = vadd.f32 %v27500_v35, %v27499_v12 }
 0xfda   :  { %27502 = vadd.xlane.f32.xlu1 %v27501_v54 }
 0xfeb   :  { %27553 = vperm.xlu1 %28615, %v14526_v59  }
0x1067   :  { %v27503_v53 = vpop.xlane.xlu1 %27502 }
0x1068   :  { %v27504_v25 = vmul.f32 0.001953125, %v27503_v53 }
0x106a   :  { %v27505_v22 = vsub.f32 %v26544_v11, %v27504_v25  ;;  %v27506_v62 = vsub.f32 %v26546_v49, %v27504_v25  ;;  %v27507_v14 = vsub.f32 %v27009_v17, %v27504_v25  ;;  %v27508_v29 = vsub.f32 %v27011_v31, %v27504_v25 }
0x106b   :  { %v27509_v2 = vsub.f32 %v27474_v28, %v27504_v25  ;;  %v27510_v46 = vsub.f32 %v27476_v34, %v27504_v25  ;;  %v27554_v49 = vpop.permute.xlu1 %27553 }
0x106c   :  { %v27511_v37 = vmul.f32 %v27505_v22, %v30213_v0  ;;  %v27512_v47 = vmul.f32 %v27506_v62, %v30215_v55  ;;  %v27513_v51 = vmul.f32 %v27507_v14, %v30222_v36  ;;  %v27514_v1 = vmul.f32 %v27508_v29, %v30227_v6 }
0x106d   :  { %v27515_v42 = vmul.f32 %v27509_v2, %v30234_v50  ;;  %v27516_v63 = vmul.f32 %v27510_v46, %v30236_v8 }
0x106e   :  { %v27517_v9 = vmul.f32 %v27511_v37, %v27511_v37  ;;  %v27518_v48 = vmul.f32 %v27512_v47, %v27512_v47  ;;  %v27519_v21 = vmul.f32 %v27513_v51, %v27513_v51  ;;  %v27520_v4 = vmul.f32 %v27514_v1, %v27514_v1 }
0x106f   :  { %v27521_v0 = vmul.f32 %v27515_v42, %v27515_v42  ;;  %v27522_v36 = vmul.f32 %v27516_v63, %v27516_v63 }
0x1070   :  { %v27523_v20 = vsel %vm14402_vm9, %v27517_v9, 0.0  ;;  %v27524_v15 = vsel %vm14402_vm9, %v27518_v48, 0.0  ;;  %v27526_v55 = vsel %vm14402_vm9, %v27519_v21, 0.0  ;;  %v27528_v6 = vsel %vm14402_vm9, %v27520_v4, 0.0 }
0x1071   :  { %v27525_v45 = vadd.f32 %v27524_v15, %v27523_v20  ;;  %v27530_v50 = vsel %vm14402_vm9, %v27521_v0, 0.0  ;;  %v27532_v5 = vsel %vm14412_vm10, %v27522_v36, 0.0 }
0x1073   :  { %v27527_v40 = vadd.f32 %v27526_v55, %v27525_v45 }
0x1075   :  { %v27529_v43 = vadd.f32 %v27528_v6, %v27527_v40 }
0x1077   :  { %v27531_v10 = vadd.f32 %v27530_v50, %v27529_v43 }
0x1079   :  { %v27533_v8 = vadd.f32 %v27532_v5, %v27531_v10 }
0x107b   :  { %27534 = vadd.xlane.f32.xlu0 %v27533_v8 }
0x1108   :  { %v27535_v16 = vpop.xlane.xlu0 %27534 }
0x1109   :  { %v27536_v27 = vmul.f32 0.001953125, %v27535_v16 }
0x110b   :  { %v27537_v32 = vadd.f32 1e-05, %v27536_v27 }
0x110d   :  { %28621 = vrsqrt.f32 %v27537_v32 }
0x1117   :  { %v28622_v38 = vpop.eup %28621 }
0x1118   :  { %v27539_v41 = vmul.f32 %v28622_v38, %v14525_v23 }
0x111a   :  { %27542 = vperm.xlu0 %28614, %v27539_v41  }
0x1199   :  { %v27543_v18 = vpop.permute.xlu0 %27542 }
0x119a   :  { %v27545_v24 = vmul.f32 %v27543_v18, %v27505_v22  ;;  %v27546_v26 = vmul.f32 %v27543_v18, %v27506_v62  ;;  %v27547_v11 = vmul.f32 %v27543_v18, %v27507_v14  ;;  %v27548_v58 = vmul.f32 %v27543_v18, %v27508_v29 }
0x119b   :  { %v27549_v44 = vmul.f32 %v27543_v18, %v27509_v2  ;;  %v27550_v52 = vmul.f32 %v27543_v18, %v27510_v46 }
0x119c   :  { %v27556_v13 = vadd.f32 %v27554_v49, %v27545_v24  ;;  %v27557_v30 = vadd.f32 %v27554_v49, %v27546_v26  ;;  %v27558_v17 = vadd.f32 %v27554_v49, %v27547_v11  ;;  %v27559_v39 = vadd.f32 %v27554_v49, %v27548_v58 }
0x119d   :  { %v27560_v31 = vadd.f32 %v27554_v49, %v27549_v44  ;;  %v27561_v61 = vadd.f32 %v27554_v49, %v27550_v52 }
0x119e   :  { %v27562_v3 = vmax.f32 %v27556_v13, 0.0  ;;  %v27563_v7 = vmax.f32 %v27557_v30, 0.0  ;;  %v27564_v57 = vmax.f32 %v27558_v17, 0.0  ;;  %v27565_v19 = vmax.f32 %v27559_v39, 0.0 }
0x119f   :  { %v27566_v28 = vmax.f32 %v27560_v31, 0.0  ;;  %v27567_v33 = vmax.f32 %v27561_v61, 0.0 }
0x11a0   :  { %v27574_v34 = vcombine.low %v27562_v3, %v27563_v7  ;;  %v27575_v56 = vcombine.low %v27564_v57, %v27565_v19 }
0x11a1   :  { %v27576_v60 = vcombine.low %v27566_v28, %v27567_v33 }
0x11a2   :  { %27580 = vst [vmem:[%s31011_s10] sm:$0xff] %v27574_v34  ;;  %27581 = vst [vmem:[%s31011_s10 + $0x8] sm:$0xff] %v27575_v56 }
0x11a3   :  { %27584 = vst.msk [vmem:[%s31011_s10 + $0x10] sm:$0xff] %vm27583_vm1, %v27576_v60 }

</bundles_post_ra>
